<compile_context>
chip_gen: v7x
topology: tpu7x:2x2x1
jax: 0.10.0
libtpu: 0.0.40
codegen_flags: <defaults>
</compile_context>

<pallas_src>
import functools

import numpy as np
import jax
import jax.numpy as jnp
from jax import lax
from jax.experimental import pallas as pl
from jax.experimental.pallas import tpu as pltpu


def _round_up(n, m):
    return ((n + m - 1) // m) * m


# ----------------------------------------------------------------------------
# Fused kernel: conv1 (im2col matmul) -> conv2 -> conv3 -> policy+value heads.
# One grid step = one batch sample; everything between the conv1 patches and
# the 128-wide output row lives in VMEM values only.
# ----------------------------------------------------------------------------
def _a2c_fused_kernel(p1_ref, w1_ref, b1_ref, s2_ref, w2_ref, b2_ref,
                      s3_ref, w3_ref, b3_ref, hw1_ref, hb1_ref,
                      hw2_ref, hb2_ref, o_ref):
    cdt = w1_ref.dtype          # MXU operand dtype (f32 or bf16)
    f32 = jnp.float32

    # ---- conv1 as im2col matmul: (Ho1*Wo1, C*8*8) @ (C*8*8, 32) ----
    x1 = p1_ref[0].astype(cdt)                                     # (64, 256)
    h1 = jnp.dot(x1, w1_ref[...], preferred_element_type=f32)
    h1 = jnp.maximum(h1 + b1_ref[...], 0.0)                        # (64, 32) f32
    h1c = h1.astype(cdt)

    # ---- conv2: sum over 4x4 kernel positions of  S2_p @ h1 @ W2_p ----
    n2 = s2_ref.shape[1]                                           # 9 output pixels
    acc2 = jnp.zeros((n2, w2_ref.shape[2]), f32)
    for p in range(s2_ref.shape[0]):                               # 16 positions
        g = jnp.dot(s2_ref[p], h1c, preferred_element_type=f32)    # (9, 32) gather
        acc2 = acc2 + jnp.dot(g.astype(cdt), w2_ref[p],
                              preferred_element_type=f32)          # (9, 64)
    h2 = jnp.maximum(acc2 + b2_ref[...], 0.0)                      # (9, 64) f32
    h2c = h2.astype(cdt)

    # ---- conv3 (3x3 kernel over the full 3x3 map -> 1x1 output) ----
    acc3 = jnp.zeros((1, w3_ref.shape[2]), f32)
    for p in range(s3_ref.shape[0]):                               # 9 positions
        r = jnp.dot(s3_ref[p], h2c, preferred_element_type=f32)    # (1, 64) row pick
        acc3 = acc3 + jnp.dot(r.astype(cdt), w3_ref[p],
                              preferred_element_type=f32)          # (1, 64)
    flat = jnp.maximum(acc3 + b3_ref[...], 0.0)                    # (1, 64) f32

    # ---- fused policy + value heads ----
    hid = jnp.dot(flat.astype(cdt), hw1_ref[...], preferred_element_type=f32)
    hid = jnp.maximum(hid + hb1_ref[...], 0.0)                     # (1, 1024) f32
    out = jnp.dot(hid.astype(cdt), hw2_ref[...], preferred_element_type=f32)
    o_ref[0] = (out + hb2_ref[...]).astype(o_ref.dtype)            # (1, 128)


# ----------------------------------------------------------------------------
# Parameters (PyTorch-style layout) + kernel-ready prepared parameters
# ----------------------------------------------------------------------------
def init_params(key, input_shape, n_actions):
    C, H, W = input_shape

    def uni(key, shape, fan_in):
        bound = 1.0 / np.sqrt(fan_in)
        return jax.random.uniform(key, shape, jnp.float32, -bound, bound)

    ks = jax.random.split(key, 14)
    p = {
        "c1w": uni(ks[0], (32, C, 8, 8), C * 8 * 8),
        "c1b": uni(ks[1], (32,), C * 8 * 8),
        "c2w": uni(ks[2], (64, 32, 4, 4), 32 * 4 * 4),
        "c2b": uni(ks[3], (64,), 32 * 4 * 4),
        "c3w": uni(ks[4], (64, 64, 3, 3), 64 * 3 * 3),
        "c3b": uni(ks[5], (64,), 64 * 3 * 3),
    }
    h1, w1 = (H - 8) // 4 + 1, (W - 8) // 4 + 1
    h2, w2 = (h1 - 4) // 2 + 1, (w1 - 4) // 2 + 1
    h3, w3 = (h2 - 3) // 1 + 1, (w2 - 3) // 1 + 1
    conv_out = 64 * h3 * w3
    p.update({
        "p1w": uni(ks[6], (conv_out, 512), conv_out),
        "p1b": uni(ks[7], (512,), conv_out),
        "p2w": uni(ks[8], (512, n_actions), 512),
        "p2b": uni(ks[9], (n_actions,), 512),
        "v1w": uni(ks[10], (conv_out, 512), conv_out),
        "v1b": uni(ks[11], (512,), conv_out),
        "v2w": uni(ks[12], (512, 1), 512),
        "v2b": uni(ks[13], (1,), 512),
    })
    return p


def prepare_params(params, input_shape, n_actions, *, use_bf16=True):
    """One-time transform to the fused-kernel layout (outside the hot path)."""
    C, H, W = input_shape
    h1, w1 = (H - 8) // 4 + 1, (W - 8) // 4 + 1
    h2, w2 = (h1 - 4) // 2 + 1, (w1 - 4) // 2 + 1
    h3, w3 = (h2 - 3) // 1 + 1, (w2 - 3) // 1 + 1
    if h3 != 1 or w3 != 1:
        raise NotImplementedError("fused A2C kernel assumes a 1x1 conv3 output")
    wdt = jnp.bfloat16 if use_bf16 else jnp.float32

    # conv1 im2col weight (C*8*8, 32), rows channel-major (C, kh, kw) to match
    # lax.conv_general_dilated_patches feature ordering; 1/255 folded in.
    c1 = np.asarray(params["c1w"], np.float32)                     # (32, C, 8, 8)
    w1m = (c1.reshape(32, -1) / 255.0).T                           # (C*64, 32)

    # conv2: selector S2_p (n2, h1*w1) gathers input pixels for kernel pos p;
    # W2_p (32, 64) is that position's channel-mixing matrix.
    n2 = h2 * w2
    s2 = np.zeros((16, n2, h1 * w1), np.float32)
    for kh in range(4):
        for kw in range(4):
            p = kh * 4 + kw
            for i in range(h2):
                for j in range(w2):
                    s2[p, i * w2 + j, (2 * i + kh) * w1 + (2 * j + kw)] = 1.0
    c2 = np.asarray(params["c2w"], np.float32)                     # OIHW (64,32,4,4)
    w2stk = np.transpose(c2, (2, 3, 1, 0)).reshape(16, 32, 64)     # [p, c, n]

    # conv3: 3x3 kernel covers the whole 3x3 conv2 map -> one output pixel.
    s3 = np.zeros((9, 1, n2), np.float32)
    for kh in range(3):
        for kw in range(3):
            s3[kh * 3 + kw, 0, kh * w2 + kw] = 1.0
    c3 = np.asarray(params["c3w"], np.float32)                     # (64,64,3,3)
    w3stk = np.transpose(c3, (2, 3, 1, 0)).reshape(9, 64, 64)      # [p, c, n]

    # Fused heads: flat(64) -> 1024 hidden (policy|value) -> 128-wide padded out.
    hw1 = np.concatenate([np.asarray(params["p1w"], np.float32),
                          np.asarray(params["v1w"], np.float32)], axis=1)
    hb1 = np.concatenate([np.asarray(params["p1b"], np.float32),
                          np.asarray(params["v1b"], np.float32)])
    n_out = n_actions + 1
    Np = _round_up(n_out, 128)
    hw2 = np.zeros((1024, Np), np.float32)
    hw2[:512, :n_actions] = np.asarray(params["p2w"], np.float32)
    hw2[512:, n_actions:n_actions + 1] = np.asarray(params["v2w"], np.float32)
    hb2 = np.zeros((Np,), np.float32)
    hb2[:n_actions] = np.asarray(params["p2b"], np.float32)
    hb2[n_actions:n_actions + 1] = np.asarray(params["v2b"], np.float32)

    def w(a):  # MXU operand (f32 or bf16)
        return jnp.asarray(np.asarray(a), dtype=wdt)

    def b(a):  # f32 epilogue operand, shaped (1, N)
        return jnp.asarray(np.asarray(a, np.float32).reshape(1, -1))

    return {
        "c1w": w(w1m), "c1b": b(params["c1b"]),
        "s2": w(s2), "c2w": w(w2stk), "c2b": b(params["c2b"]),
        "s3": w(s3), "c3w": w(w3stk), "c3b": b(params["c3b"]),
        "hw1": w(hw1), "hb1": b(hb1),
        "hw2": w(hw2), "hb2": b(hb2),
    }


# ----------------------------------------------------------------------------
# Forward
# ----------------------------------------------------------------------------
def a2c_forward(fp, x, *, n_actions):
    B, C, H, W = x.shape
    h1, w1 = (H - 8) // 4 + 1, (W - 8) // 4 + 1

    # conv1 im2col via one XLA op; raw pixel values (the /255 is in the weights).
    x_nhwc = jnp.transpose(x.astype(jnp.float32), (0, 2, 3, 1))
    patches = lax.conv_general_dilated_patches(
        x_nhwc, (8, 8), (4, 4), "VALID",
        dimension_numbers=("NHWC", "HWIO", "NHWC"))                # (B,h1,w1,C*64)
    p1 = patches.reshape(B, h1 * w1, C * 64)

    P1M, K1 = h1 * w1, C * 64
    n2 = int(fp["s2"].shape[1])
    Np = int(fp["hw2"].shape[1])

    weight_args = (fp["c1w"], fp["c1b"], fp["s2"], fp["c2w"], fp["c2b"],
                   fp["s3"], fp["c3w"], fp["c3b"], fp["hw1"], fp["hb1"],
                   fp["hw2"], fp["hb2"])

    def full_spec(arr):
        nd = arr.ndim
        return pl.BlockSpec(arr.shape, lambda b, _nd=nd: (0,) * _nd)

    flops = 2 * B * (
        P1M * K1 * 32
        + 16 * (n2 * P1M * 32 + n2 * 32 * 64)
        + 9 * (n2 * 64 + 64 * 64)
        + 64 * 1024 + 1024 * Np)
    weight_bytes = sum(int(np.prod(a.shape)) * a.dtype.itemsize for a in weight_args)
    bytes_accessed = int(B * P1M * K1 * 4 + weight_bytes + B * Np * 4)

    out = pl.pallas_call(
        _a2c_fused_kernel,
        out_shape=jax.ShapeDtypeStruct((B, 1, Np), jnp.float32),
        grid_spec=pltpu.PrefetchScalarGridSpec(
            num_scalar_prefetch=0,
            grid=(B,),
            in_specs=[pl.BlockSpec((1, P1M, K1), lambda b: (b, 0, 0))]
                     + [full_spec(a) for a in weight_args],
            out_specs=pl.BlockSpec((1, 1, Np), lambda b: (b, 0, 0)),
        ),
        compiler_params=pltpu.CompilerParams(
            dimension_semantics=("parallel",)),
        cost_estimate=pl.CostEstimate(flops=int(flops), transcendentals=0,
                                      bytes_accessed=bytes_accessed),
    )(p1, *weight_args)

    out = out.reshape(B, Np)
    return out[:, :n_actions], out[:, n_actions:n_actions + 1]


# ----------------------------------------------------------------------------
# Pure-JAX reference (matches the PyTorch module semantics)
# ----------------------------------------------------------------------------
def a2c_reference(params, x):
    dn = ("NCHW", "OIHW", "NCHW")
    fx = x.astype(jnp.float32) / 255.0

    def conv(h, w, b, s):
        y = lax.conv_general_dilated(h, w, (s, s), "VALID", dimension_numbers=dn)
        return jnp.maximum(y + b.reshape(1, -1, 1, 1), 0.0)

    h = conv(fx, params["c1w"], params["c1b"], 4)
    h = conv(h, params["c2w"], params["c2b"], 2)
    h = conv(h, params["c3w"], params["c3b"], 1)
    flat = h.reshape(h.shape[0], -1)
    ph = jnp.maximum(flat @ params["p1w"] + params["p1b"], 0.0)
    policy = ph @ params["p2w"] + params["p2b"]
    vh = jnp.maximum(flat @ params["v1w"] + params["v1b"], 0.0)
    value = vh @ params["v2w"] + params["v2b"]
    return policy, value


if __name__ == "__main__":
    input_shape = (4, 36, 36)   # (C, H, W): conv tower output is 64*1*1 = 64
    n_actions = 6
    batch = 2

    key = jax.random.PRNGKey(0)
    pkey, xkey = jax.random.split(key)
    params = init_params(pkey, input_shape, n_actions)
    x = jax.random.randint(xkey, (batch,) + input_shape, 0, 256,
                           dtype=jnp.int32).astype(jnp.float32)

    fwd = jax.jit(functools.partial(a2c_forward, n_actions=n_actions))
    ref_policy, ref_value = a2c_reference(params, x)

    # f32 MXU-operand path: tight check against the f32 reference.
    fp32 = prepare_params(params, input_shape, n_actions, use_bf16=False)
    policy, value = fwd(fp32, x)
    jax.block_until_ready((policy, value))
    assert policy.shape == (batch, n_actions) and value.shape == (batch, 1)
    np.testing.assert_allclose(np.asarray(policy), np.asarray(ref_policy),
                               rtol=1e-4, atol=1e-4)
    np.testing.assert_allclose(np.asarray(value), np.asarray(ref_value),
                               rtol=1e-4, atol=1e-4)

    # bf16 MXU-operand / f32-accumulate fast path (perf config for v5e/v6e/v7x).
    fpbf = prepare_params(params, input_shape, n_actions, use_bf16=True)
    policy_bf, value_bf = fwd(fpbf, x)
    jax.block_until_ready((policy_bf, value_bf))
    np.testing.assert_allclose(np.asarray(policy_bf), np.asarray(ref_policy),
                               rtol=5e-2, atol=5e-2)
    np.testing.assert_allclose(np.asarray(value_bf), np.asarray(ref_value),
                               rtol=5e-2, atol=5e-2)

    print("KERNEL_OK")
</pallas_src>

<mosaic_0001>
module attributes {stable_mosaic.version = 11 : i64} {
  func.func @_a2c_fused_kernel(%arg0: i32, %arg1: memref<1x64x256xf32, #tpu.memory_space<vmem>>, %arg2: memref<256x32xf32, #tpu.memory_space<vmem>>, %arg3: memref<1x32xf32, #tpu.memory_space<vmem>>, %arg4: memref<16x9x64xf32, #tpu.memory_space<vmem>>, %arg5: memref<16x32x64xf32, #tpu.memory_space<vmem>>, %arg6: memref<1x64xf32, #tpu.memory_space<vmem>>, %arg7: memref<9x1x9xf32, #tpu.memory_space<vmem>>, %arg8: memref<9x64x64xf32, #tpu.memory_space<vmem>>, %arg9: memref<1x64xf32, #tpu.memory_space<vmem>>, %arg10: memref<64x1024xf32, #tpu.memory_space<vmem>>, %arg11: memref<1x1024xf32, #tpu.memory_space<vmem>>, %arg12: memref<1024x128xf32, #tpu.memory_space<vmem>>, %arg13: memref<1x128xf32, #tpu.memory_space<vmem>>, %arg14: memref<1x1x128xf32, #tpu.memory_space<vmem>>) attributes {dimension_semantics = [#tpu.dimension_semantics<parallel>], iteration_bounds = array<i64: 2>, scalar_prefetch = 0 : i64, scratch_operands = 0 : i64, tpu.core_type = #tpu.core_type<tc>, window_params = [{transform_indices = @transform_0, window_bounds = array<i64: 1, 64, 256>}, {pipeline_mode = #tpu.pipeline_mode<synchronous>, transform_indices = @transform_1, window_bounds = array<i64: 256, 32>}, {pipeline_mode = #tpu.pipeline_mode<synchronous>, transform_indices = @transform_2, window_bounds = array<i64: 1, 32>}, {pipeline_mode = #tpu.pipeline_mode<synchronous>, transform_indices = @transform_3, window_bounds = array<i64: 16, 9, 64>}, {pipeline_mode = #tpu.pipeline_mode<synchronous>, transform_indices = @transform_4, window_bounds = array<i64: 16, 32, 64>}, {pipeline_mode = #tpu.pipeline_mode<synchronous>, transform_indices = @transform_5, window_bounds = array<i64: 1, 64>}, {pipeline_mode = #tpu.pipeline_mode<synchronous>, transform_indices = @transform_6, window_bounds = array<i64: 9, 1, 9>}, {pipeline_mode = #tpu.pipeline_mode<synchronous>, transform_indices = @transform_7, window_bounds = array<i64: 9, 64, 64>}, {pipeline_mode = #tpu.pipeline_mode<synchronous>, transform_indices = @transform_8, window_bounds = array<i64: 1, 64>}, {pipeline_mode = #tpu.pipeline_mode<synchronous>, transform_indices = @transform_9, window_bounds = array<i64: 64, 1024>}, {pipeline_mode = #tpu.pipeline_mode<synchronous>, transform_indices = @transform_10, window_bounds = array<i64: 1, 1024>}, {pipeline_mode = #tpu.pipeline_mode<synchronous>, transform_indices = @transform_11, window_bounds = array<i64: 1024, 128>}, {pipeline_mode = #tpu.pipeline_mode<synchronous>, transform_indices = @transform_12, window_bounds = array<i64: 1, 128>}, {transform_indices = @transform_13, window_bounds = array<i64: 1, 1, 128>}]} {
    %c0 = arith.constant 0 : index
    %c0_0 = arith.constant 0 : index
    %c0_1 = arith.constant 0 : index
    %0 = vector.load %arg1[%c0, %c0_0, %c0_1] : memref<1x64x256xf32, #tpu.memory_space<vmem>>, vector<1x64x256xf32>
    %1 = vector.shape_cast %0 : vector<1x64x256xf32> to vector<64x256xf32>
    %c0_2 = arith.constant 0 : index
    %c0_3 = arith.constant 0 : index
    %2 = vector.load %arg2[%c0_2, %c0_3] : memref<256x32xf32, #tpu.memory_space<vmem>>, vector<256x32xf32>
    %cst = arith.constant dense<0.000000e+00> : vector<64x32xf32>
    %3 = tpu.matmul %1, %2, %cst {dimension_numbers = #tpu.dot_dimension_numbers<[1], [0], [0], [1], [0, 0, 1, 1], [], []>} : vector<64x256xf32>, vector<256x32xf32>, vector<64x32xf32> -> vector<64x32xf32>
    %c0_4 = arith.constant 0 : index
    %c0_5 = arith.constant 0 : index
    %4 = vector.load %arg3[%c0_4, %c0_5] : memref<1x32xf32, #tpu.memory_space<vmem>>, vector<1x32xf32>
    %5 = vector.broadcast %4 : vector<1x32xf32> to vector<64x32xf32>
    %6 = arith.addf %3, %5 : vector<64x32xf32>
    %cst_6 = arith.constant 0.000000e+00 : f32
    %7 = vector.broadcast %cst_6 : f32 to vector<64x32xf32>
    %8 = arith.maximumf %6, %7 : vector<64x32xf32>
    %cst_7 = arith.constant 0.000000e+00 : f32
    %9 = vector.broadcast %cst_7 : f32 to vector<9x64xf32>
    %c0_8 = arith.constant 0 : index
    %c0_9 = arith.constant 0 : index
    %c0_10 = arith.constant 0 : index
    %10 = vector.load %arg4[%c0_8, %c0_9, %c0_10] : memref<16x9x64xf32, #tpu.memory_space<vmem>>, vector<1x9x64xf32>
    %11 = vector.shape_cast %10 : vector<1x9x64xf32> to vector<9x64xf32>
    %cst_11 = arith.constant dense<0.000000e+00> : vector<9x32xf32>
    %12 = tpu.matmul %11, %8, %cst_11 {dimension_numbers = #tpu.dot_dimension_numbers<[1], [0], [0], [1], [0, 0, 1, 1], [], []>} : vector<9x64xf32>, vector<64x32xf32>, vector<9x32xf32> -> vector<9x32xf32>
    %c0_12 = arith.constant 0 : index
    %c0_13 = arith.constant 0 : index
    %c0_14 = arith.constant 0 : index
    %13 = vector.load %arg5[%c0_12, %c0_13, %c0_14] : memref<16x32x64xf32, #tpu.memory_space<vmem>>, vector<1x32x64xf32>
    %14 = vector.shape_cast %13 : vector<1x32x64xf32> to vector<32x64xf32>
    %cst_15 = arith.constant dense<0.000000e+00> : vector<9x64xf32>
    %15 = tpu.matmul %12, %14, %cst_15 {dimension_numbers = #tpu.dot_dimension_numbers<[1], [0], [0], [1], [0, 0, 1, 1], [], []>} : vector<9x32xf32>, vector<32x64xf32>, vector<9x64xf32> -> vector<9x64xf32>
    %16 = arith.addf %9, %15 : vector<9x64xf32>
    %c1 = arith.constant 1 : index
    %c0_16 = arith.constant 0 : index
    %c0_17 = arith.constant 0 : index
    %17 = vector.load %arg4[%c1, %c0_16, %c0_17] : memref<16x9x64xf32, #tpu.memory_space<vmem>>, vector<1x9x64xf32>
    %18 = vector.shape_cast %17 : vector<1x9x64xf32> to vector<9x64xf32>
    %cst_18 = arith.constant dense<0.000000e+00> : vector<9x32xf32>
    %19 = tpu.matmul %18, %8, %cst_18 {dimension_numbers = #tpu.dot_dimension_numbers<[1], [0], [0], [1], [0, 0, 1, 1], [], []>} : vector<9x64xf32>, vector<64x32xf32>, vector<9x32xf32> -> vector<9x32xf32>
    %c1_19 = arith.constant 1 : index
    %c0_20 = arith.constant 0 : index
    %c0_21 = arith.constant 0 : index
    %20 = vector.load %arg5[%c1_19, %c0_20, %c0_21] : memref<16x32x64xf32, #tpu.memory_space<vmem>>, vector<1x32x64xf32>
    %21 = vector.shape_cast %20 : vector<1x32x64xf32> to vector<32x64xf32>
    %cst_22 = arith.constant dense<0.000000e+00> : vector<9x64xf32>
    %22 = tpu.matmul %19, %21, %cst_22 {dimension_numbers = #tpu.dot_dimension_numbers<[1], [0], [0], [1], [0, 0, 1, 1], [], []>} : vector<9x32xf32>, vector<32x64xf32>, vector<9x64xf32> -> vector<9x64xf32>
    %23 = arith.addf %16, %22 : vector<9x64xf32>
    %c2 = arith.constant 2 : index
    %c0_23 = arith.constant 0 : index
    %c0_24 = arith.constant 0 : index
    %24 = vector.load %arg4[%c2, %c0_23, %c0_24] : memref<16x9x64xf32, #tpu.memory_space<vmem>>, vector<1x9x64xf32>
    %25 = vector.shape_cast %24 : vector<1x9x64xf32> to vector<9x64xf32>
    %cst_25 = arith.constant dense<0.000000e+00> : vector<9x32xf32>
    %26 = tpu.matmul %25, %8, %cst_25 {dimension_numbers = #tpu.dot_dimension_numbers<[1], [0], [0], [1], [0, 0, 1, 1], [], []>} : vector<9x64xf32>, vector<64x32xf32>, vector<9x32xf32> -> vector<9x32xf32>
    %c2_26 = arith.constant 2 : index
    %c0_27 = arith.constant 0 : index
    %c0_28 = arith.constant 0 : index
    %27 = vector.load %arg5[%c2_26, %c0_27, %c0_28] : memref<16x32x64xf32, #tpu.memory_space<vmem>>, vector<1x32x64xf32>
    %28 = vector.shape_cast %27 : vector<1x32x64xf32> to vector<32x64xf32>
    %cst_29 = arith.constant dense<0.000000e+00> : vector<9x64xf32>
    %29 = tpu.matmul %26, %28, %cst_29 {dimension_numbers = #tpu.dot_dimension_numbers<[1], [0], [0], [1], [0, 0, 1, 1], [], []>} : vector<9x32xf32>, vector<32x64xf32>, vector<9x64xf32> -> vector<9x64xf32>
    %30 = arith.addf %23, %29 : vector<9x64xf32>
    %c3 = arith.constant 3 : index
    %c0_30 = arith.constant 0 : index
    %c0_31 = arith.constant 0 : index
    %31 = vector.load %arg4[%c3, %c0_30, %c0_31] : memref<16x9x64xf32, #tpu.memory_space<vmem>>, vector<1x9x64xf32>
    %32 = vector.shape_cast %31 : vector<1x9x64xf32> to vector<9x64xf32>
    %cst_32 = arith.constant dense<0.000000e+00> : vector<9x32xf32>
    %33 = tpu.matmul %32, %8, %cst_32 {dimension_numbers = #tpu.dot_dimension_numbers<[1], [0], [0], [1], [0, 0, 1, 1], [], []>} : vector<9x64xf32>, vector<64x32xf32>, vector<9x32xf32> -> vector<9x32xf32>
    %c3_33 = arith.constant 3 : index
    %c0_34 = arith.constant 0 : index
    %c0_35 = arith.constant 0 : index
    %34 = vector.load %arg5[%c3_33, %c0_34, %c0_35] : memref<16x32x64xf32, #tpu.memory_space<vmem>>, vector<1x32x64xf32>
    %35 = vector.shape_cast %34 : vector<1x32x64xf32> to vector<32x64xf32>
    %cst_36 = arith.constant dense<0.000000e+00> : vector<9x64xf32>
    %36 = tpu.matmul %33, %35, %cst_36 {dimension_numbers = #tpu.dot_dimension_numbers<[1], [0], [0], [1], [0, 0, 1, 1], [], []>} : vector<9x32xf32>, vector<32x64xf32>, vector<9x64xf32> -> vector<9x64xf32>
    %37 = arith.addf %30, %36 : vector<9x64xf32>
    %c4 = arith.constant 4 : index
    %c0_37 = arith.constant 0 : index
    %c0_38 = arith.constant 0 : index
    %38 = vector.load %arg4[%c4, %c0_37, %c0_38] : memref<16x9x64xf32, #tpu.memory_space<vmem>>, vector<1x9x64xf32>
    %39 = vector.shape_cast %38 : vector<1x9x64xf32> to vector<9x64xf32>
    %cst_39 = arith.constant dense<0.000000e+00> : vector<9x32xf32>
    %40 = tpu.matmul %39, %8, %cst_39 {dimension_numbers = #tpu.dot_dimension_numbers<[1], [0], [0], [1], [0, 0, 1, 1], [], []>} : vector<9x64xf32>, vector<64x32xf32>, vector<9x32xf32> -> vector<9x32xf32>
    %c4_40 = arith.constant 4 : index
    %c0_41 = arith.constant 0 : index
    %c0_42 = arith.constant 0 : index
    %41 = vector.load %arg5[%c4_40, %c0_41, %c0_42] : memref<16x32x64xf32, #tpu.memory_space<vmem>>, vector<1x32x64xf32>
    %42 = vector.shape_cast %41 : vector<1x32x64xf32> to vector<32x64xf32>
    %cst_43 = arith.constant dense<0.000000e+00> : vector<9x64xf32>
    %43 = tpu.matmul %40, %42, %cst_43 {dimension_numbers = #tpu.dot_dimension_numbers<[1], [0], [0], [1], [0, 0, 1, 1], [], []>} : vector<9x32xf32>, vector<32x64xf32>, vector<9x64xf32> -> vector<9x64xf32>
    %44 = arith.addf %37, %43 : vector<9x64xf32>
    %c5 = arith.constant 5 : index
    %c0_44 = arith.constant 0 : index
    %c0_45 = arith.constant 0 : index
    %45 = vector.load %arg4[%c5, %c0_44, %c0_45] : memref<16x9x64xf32, #tpu.memory_space<vmem>>, vector<1x9x64xf32>
    %46 = vector.shape_cast %45 : vector<1x9x64xf32> to vector<9x64xf32>
    %cst_46 = arith.constant dense<0.000000e+00> : vector<9x32xf32>
    %47 = tpu.matmul %46, %8, %cst_46 {dimension_numbers = #tpu.dot_dimension_numbers<[1], [0], [0], [1], [0, 0, 1, 1], [], []>} : vector<9x64xf32>, vector<64x32xf32>, vector<9x32xf32> -> vector<9x32xf32>
    %c5_47 = arith.constant 5 : index
    %c0_48 = arith.constant 0 : index
    %c0_49 = arith.constant 0 : index
    %48 = vector.load %arg5[%c5_47, %c0_48, %c0_49] : memref<16x32x64xf32, #tpu.memory_space<vmem>>, vector<1x32x64xf32>
    %49 = vector.shape_cast %48 : vector<1x32x64xf32> to vector<32x64xf32>
    %cst_50 = arith.constant dense<0.000000e+00> : vector<9x64xf32>
    %50 = tpu.matmul %47, %49, %cst_50 {dimension_numbers = #tpu.dot_dimension_numbers<[1], [0], [0], [1], [0, 0, 1, 1], [], []>} : vector<9x32xf32>, vector<32x64xf32>, vector<9x64xf32> -> vector<9x64xf32>
    %51 = arith.addf %44, %50 : vector<9x64xf32>
    %c6 = arith.constant 6 : index
    %c0_51 = arith.constant 0 : index
    %c0_52 = arith.constant 0 : index
    %52 = vector.load %arg4[%c6, %c0_51, %c0_52] : memref<16x9x64xf32, #tpu.memory_space<vmem>>, vector<1x9x64xf32>
    %53 = vector.shape_cast %52 : vector<1x9x64xf32> to vector<9x64xf32>
    %cst_53 = arith.constant dense<0.000000e+00> : vector<9x32xf32>
    %54 = tpu.matmul %53, %8, %cst_53 {dimension_numbers = #tpu.dot_dimension_numbers<[1], [0], [0], [1], [0, 0, 1, 1], [], []>} : vector<9x64xf32>, vector<64x32xf32>, vector<9x32xf32> -> vector<9x32xf32>
    %c6_54 = arith.constant 6 : index
    %c0_55 = arith.constant 0 : index
    %c0_56 = arith.constant 0 : index
    %55 = vector.load %arg5[%c6_54, %c0_55, %c0_56] : memref<16x32x64xf32, #tpu.memory_space<vmem>>, vector<1x32x64xf32>
    %56 = vector.shape_cast %55 : vector<1x32x64xf32> to vector<32x64xf32>
    %cst_57 = arith.constant dense<0.000000e+00> : vector<9x64xf32>
    %57 = tpu.matmul %54, %56, %cst_57 {dimension_numbers = #tpu.dot_dimension_numbers<[1], [0], [0], [1], [0, 0, 1, 1], [], []>} : vector<9x32xf32>, vector<32x64xf32>, vector<9x64xf32> -> vector<9x64xf32>
    %58 = arith.addf %51, %57 : vector<9x64xf32>
    %c7 = arith.constant 7 : index
    %c0_58 = arith.constant 0 : index
    %c0_59 = arith.constant 0 : index
    %59 = vector.load %arg4[%c7, %c0_58, %c0_59] : memref<16x9x64xf32, #tpu.memory_space<vmem>>, vector<1x9x64xf32>
    %60 = vector.shape_cast %59 : vector<1x9x64xf32> to vector<9x64xf32>
    %cst_60 = arith.constant dense<0.000000e+00> : vector<9x32xf32>
    %61 = tpu.matmul %60, %8, %cst_60 {dimension_numbers = #tpu.dot_dimension_numbers<[1], [0], [0], [1], [0, 0, 1, 1], [], []>} : vector<9x64xf32>, vector<64x32xf32>, vector<9x32xf32> -> vector<9x32xf32>
    %c7_61 = arith.constant 7 : index
    %c0_62 = arith.constant 0 : index
    %c0_63 = arith.constant 0 : index
    %62 = vector.load %arg5[%c7_61, %c0_62, %c0_63] : memref<16x32x64xf32, #tpu.memory_space<vmem>>, vector<1x32x64xf32>
    %63 = vector.shape_cast %62 : vector<1x32x64xf32> to vector<32x64xf32>
    %cst_64 = arith.constant dense<0.000000e+00> : vector<9x64xf32>
    %64 = tpu.matmul %61, %63, %cst_64 {dimension_numbers = #tpu.dot_dimension_numbers<[1], [0], [0], [1], [0, 0, 1, 1], [], []>} : vector<9x32xf32>, vector<32x64xf32>, vector<9x64xf32> -> vector<9x64xf32>
    %65 = arith.addf %58, %64 : vector<9x64xf32>
    %c8 = arith.constant 8 : index
    %c0_65 = arith.constant 0 : index
    %c0_66 = arith.constant 0 : index
    %66 = vector.load %arg4[%c8, %c0_65, %c0_66] : memref<16x9x64xf32, #tpu.memory_space<vmem>>, vector<1x9x64xf32>
    %67 = vector.shape_cast %66 : vector<1x9x64xf32> to vector<9x64xf32>
    %cst_67 = arith.constant dense<0.000000e+00> : vector<9x32xf32>
    %68 = tpu.matmul %67, %8, %cst_67 {dimension_numbers = #tpu.dot_dimension_numbers<[1], [0], [0], [1], [0, 0, 1, 1], [], []>} : vector<9x64xf32>, vector<64x32xf32>, vector<9x32xf32> -> vector<9x32xf32>
    %c8_68 = arith.constant 8 : index
    %c0_69 = arith.constant 0 : index
    %c0_70 = arith.constant 0 : index
    %69 = vector.load %arg5[%c8_68, %c0_69, %c0_70] : memref<16x32x64xf32, #tpu.memory_space<vmem>>, vector<1x32x64xf32>
    %70 = vector.shape_cast %69 : vector<1x32x64xf32> to vector<32x64xf32>
    %cst_71 = arith.constant dense<0.000000e+00> : vector<9x64xf32>
    %71 = tpu.matmul %68, %70, %cst_71 {dimension_numbers = #tpu.dot_dimension_numbers<[1], [0], [0], [1], [0, 0, 1, 1], [], []>} : vector<9x32xf32>, vector<32x64xf32>, vector<9x64xf32> -> vector<9x64xf32>
    %72 = arith.addf %65, %71 : vector<9x64xf32>
    %c9 = arith.constant 9 : index
    %c0_72 = arith.constant 0 : index
    %c0_73 = arith.constant 0 : index
    %73 = vector.load %arg4[%c9, %c0_72, %c0_73] : memref<16x9x64xf32, #tpu.memory_space<vmem>>, vector<1x9x64xf32>
    %74 = vector.shape_cast %73 : vector<1x9x64xf32> to vector<9x64xf32>
    %cst_74 = arith.constant dense<0.000000e+00> : vector<9x32xf32>
    %75 = tpu.matmul %74, %8, %cst_74 {dimension_numbers = #tpu.dot_dimension_numbers<[1], [0], [0], [1], [0, 0, 1, 1], [], []>} : vector<9x64xf32>, vector<64x32xf32>, vector<9x32xf32> -> vector<9x32xf32>
    %c9_75 = arith.constant 9 : index
    %c0_76 = arith.constant 0 : index
    %c0_77 = arith.constant 0 : index
    %76 = vector.load %arg5[%c9_75, %c0_76, %c0_77] : memref<16x32x64xf32, #tpu.memory_space<vmem>>, vector<1x32x64xf32>
    %77 = vector.shape_cast %76 : vector<1x32x64xf32> to vector<32x64xf32>
    %cst_78 = arith.constant dense<0.000000e+00> : vector<9x64xf32>
    %78 = tpu.matmul %75, %77, %cst_78 {dimension_numbers = #tpu.dot_dimension_numbers<[1], [0], [0], [1], [0, 0, 1, 1], [], []>} : vector<9x32xf32>, vector<32x64xf32>, vector<9x64xf32> -> vector<9x64xf32>
    %79 = arith.addf %72, %78 : vector<9x64xf32>
    %c10 = arith.constant 10 : index
    %c0_79 = arith.constant 0 : index
    %c0_80 = arith.constant 0 : index
    %80 = vector.load %arg4[%c10, %c0_79, %c0_80] : memref<16x9x64xf32, #tpu.memory_space<vmem>>, vector<1x9x64xf32>
    %81 = vector.shape_cast %80 : vector<1x9x64xf32> to vector<9x64xf32>
    %cst_81 = arith.constant dense<0.000000e+00> : vector<9x32xf32>
    %82 = tpu.matmul %81, %8, %cst_81 {dimension_numbers = #tpu.dot_dimension_numbers<[1], [0], [0], [1], [0, 0, 1, 1], [], []>} : vector<9x64xf32>, vector<64x32xf32>, vector<9x32xf32> -> vector<9x32xf32>
    %c10_82 = arith.constant 10 : index
    %c0_83 = arith.constant 0 : index
    %c0_84 = arith.constant 0 : index
    %83 = vector.load %arg5[%c10_82, %c0_83, %c0_84] : memref<16x32x64xf32, #tpu.memory_space<vmem>>, vector<1x32x64xf32>
    %84 = vector.shape_cast %83 : vector<1x32x64xf32> to vector<32x64xf32>
    %cst_85 = arith.constant dense<0.000000e+00> : vector<9x64xf32>
    %85 = tpu.matmul %82, %84, %cst_85 {dimension_numbers = #tpu.dot_dimension_numbers<[1], [0], [0], [1], [0, 0, 1, 1], [], []>} : vector<9x32xf32>, vector<32x64xf32>, vector<9x64xf32> -> vector<9x64xf32>
    %86 = arith.addf %79, %85 : vector<9x64xf32>
    %c11 = arith.constant 11 : index
    %c0_86 = arith.constant 0 : index
    %c0_87 = arith.constant 0 : index
    %87 = vector.load %arg4[%c11, %c0_86, %c0_87] : memref<16x9x64xf32, #tpu.memory_space<vmem>>, vector<1x9x64xf32>
    %88 = vector.shape_cast %87 : vector<1x9x64xf32> to vector<9x64xf32>
    %cst_88 = arith.constant dense<0.000000e+00> : vector<9x32xf32>
    %89 = tpu.matmul %88, %8, %cst_88 {dimension_numbers = #tpu.dot_dimension_numbers<[1], [0], [0], [1], [0, 0, 1, 1], [], []>} : vector<9x64xf32>, vector<64x32xf32>, vector<9x32xf32> -> vector<9x32xf32>
    %c11_89 = arith.constant 11 : index
    %c0_90 = arith.constant 0 : index
    %c0_91 = arith.constant 0 : index
    %90 = vector.load %arg5[%c11_89, %c0_90, %c0_91] : memref<16x32x64xf32, #tpu.memory_space<vmem>>, vector<1x32x64xf32>
    %91 = vector.shape_cast %90 : vector<1x32x64xf32> to vector<32x64xf32>
    %cst_92 = arith.constant dense<0.000000e+00> : vector<9x64xf32>
    %92 = tpu.matmul %89, %91, %cst_92 {dimension_numbers = #tpu.dot_dimension_numbers<[1], [0], [0], [1], [0, 0, 1, 1], [], []>} : vector<9x32xf32>, vector<32x64xf32>, vector<9x64xf32> -> vector<9x64xf32>
    %93 = arith.addf %86, %92 : vector<9x64xf32>
    %c12 = arith.constant 12 : index
    %c0_93 = arith.constant 0 : index
    %c0_94 = arith.constant 0 : index
    %94 = vector.load %arg4[%c12, %c0_93, %c0_94] : memref<16x9x64xf32, #tpu.memory_space<vmem>>, vector<1x9x64xf32>
    %95 = vector.shape_cast %94 : vector<1x9x64xf32> to vector<9x64xf32>
    %cst_95 = arith.constant dense<0.000000e+00> : vector<9x32xf32>
    %96 = tpu.matmul %95, %8, %cst_95 {dimension_numbers = #tpu.dot_dimension_numbers<[1], [0], [0], [1], [0, 0, 1, 1], [], []>} : vector<9x64xf32>, vector<64x32xf32>, vector<9x32xf32> -> vector<9x32xf32>
    %c12_96 = arith.constant 12 : index
    %c0_97 = arith.constant 0 : index
    %c0_98 = arith.constant 0 : index
    %97 = vector.load %arg5[%c12_96, %c0_97, %c0_98] : memref<16x32x64xf32, #tpu.memory_space<vmem>>, vector<1x32x64xf32>
    %98 = vector.shape_cast %97 : vector<1x32x64xf32> to vector<32x64xf32>
    %cst_99 = arith.constant dense<0.000000e+00> : vector<9x64xf32>
    %99 = tpu.matmul %96, %98, %cst_99 {dimension_numbers = #tpu.dot_dimension_numbers<[1], [0], [0], [1], [0, 0, 1, 1], [], []>} : vector<9x32xf32>, vector<32x64xf32>, vector<9x64xf32> -> vector<9x64xf32>
    %100 = arith.addf %93, %99 : vector<9x64xf32>
    %c13 = arith.constant 13 : index
    %c0_100 = arith.constant 0 : index
    %c0_101 = arith.constant 0 : index
    %101 = vector.load %arg4[%c13, %c0_100, %c0_101] : memref<16x9x64xf32, #tpu.memory_space<vmem>>, vector<1x9x64xf32>
    %102 = vector.shape_cast %101 : vector<1x9x64xf32> to vector<9x64xf32>
    %cst_102 = arith.constant dense<0.000000e+00> : vector<9x32xf32>
    %103 = tpu.matmul %102, %8, %cst_102 {dimension_numbers = #tpu.dot_dimension_numbers<[1], [0], [0], [1], [0, 0, 1, 1], [], []>} : vector<9x64xf32>, vector<64x32xf32>, vector<9x32xf32> -> vector<9x32xf32>
    %c13_103 = arith.constant 13 : index
    %c0_104 = arith.constant 0 : index
    %c0_105 = arith.constant 0 : index
    %104 = vector.load %arg5[%c13_103, %c0_104, %c0_105] : memref<16x32x64xf32, #tpu.memory_space<vmem>>, vector<1x32x64xf32>
    %105 = vector.shape_cast %104 : vector<1x32x64xf32> to vector<32x64xf32>
    %cst_106 = arith.constant dense<0.000000e+00> : vector<9x64xf32>
    %106 = tpu.matmul %103, %105, %cst_106 {dimension_numbers = #tpu.dot_dimension_numbers<[1], [0], [0], [1], [0, 0, 1, 1], [], []>} : vector<9x32xf32>, vector<32x64xf32>, vector<9x64xf32> -> vector<9x64xf32>
    %107 = arith.addf %100, %106 : vector<9x64xf32>
    %c14 = arith.constant 14 : index
    %c0_107 = arith.constant 0 : index
    %c0_108 = arith.constant 0 : index
    %108 = vector.load %arg4[%c14, %c0_107, %c0_108] : memref<16x9x64xf32, #tpu.memory_space<vmem>>, vector<1x9x64xf32>
    %109 = vector.shape_cast %108 : vector<1x9x64xf32> to vector<9x64xf32>
    %cst_109 = arith.constant dense<0.000000e+00> : vector<9x32xf32>
    %110 = tpu.matmul %109, %8, %cst_109 {dimension_numbers = #tpu.dot_dimension_numbers<[1], [0], [0], [1], [0, 0, 1, 1], [], []>} : vector<9x64xf32>, vector<64x32xf32>, vector<9x32xf32> -> vector<9x32xf32>
    %c14_110 = arith.constant 14 : index
    %c0_111 = arith.constant 0 : index
    %c0_112 = arith.constant 0 : index
    %111 = vector.load %arg5[%c14_110, %c0_111, %c0_112] : memref<16x32x64xf32, #tpu.memory_space<vmem>>, vector<1x32x64xf32>
    %112 = vector.shape_cast %111 : vector<1x32x64xf32> to vector<32x64xf32>
    %cst_113 = arith.constant dense<0.000000e+00> : vector<9x64xf32>
    %113 = tpu.matmul %110, %112, %cst_113 {dimension_numbers = #tpu.dot_dimension_numbers<[1], [0], [0], [1], [0, 0, 1, 1], [], []>} : vector<9x32xf32>, vector<32x64xf32>, vector<9x64xf32> -> vector<9x64xf32>
    %114 = arith.addf %107, %113 : vector<9x64xf32>
    %c15 = arith.constant 15 : index
    %c0_114 = arith.constant 0 : index
    %c0_115 = arith.constant 0 : index
    %115 = vector.load %arg4[%c15, %c0_114, %c0_115] : memref<16x9x64xf32, #tpu.memory_space<vmem>>, vector<1x9x64xf32>
    %116 = vector.shape_cast %115 : vector<1x9x64xf32> to vector<9x64xf32>
    %cst_116 = arith.constant dense<0.000000e+00> : vector<9x32xf32>
    %117 = tpu.matmul %116, %8, %cst_116 {dimension_numbers = #tpu.dot_dimension_numbers<[1], [0], [0], [1], [0, 0, 1, 1], [], []>} : vector<9x64xf32>, vector<64x32xf32>, vector<9x32xf32> -> vector<9x32xf32>
    %c15_117 = arith.constant 15 : index
    %c0_118 = arith.constant 0 : index
    %c0_119 = arith.constant 0 : index
    %118 = vector.load %arg5[%c15_117, %c0_118, %c0_119] : memref<16x32x64xf32, #tpu.memory_space<vmem>>, vector<1x32x64xf32>
    %119 = vector.shape_cast %118 : vector<1x32x64xf32> to vector<32x64xf32>
    %cst_120 = arith.constant dense<0.000000e+00> : vector<9x64xf32>
    %120 = tpu.matmul %117, %119, %cst_120 {dimension_numbers = #tpu.dot_dimension_numbers<[1], [0], [0], [1], [0, 0, 1, 1], [], []>} : vector<9x32xf32>, vector<32x64xf32>, vector<9x64xf32> -> vector<9x64xf32>
    %121 = arith.addf %114, %120 : vector<9x64xf32>
    %c0_121 = arith.constant 0 : index
    %c0_122 = arith.constant 0 : index
    %122 = vector.load %arg6[%c0_121, %c0_122] : memref<1x64xf32, #tpu.memory_space<vmem>>, vector<1x64xf32>
    %123 = vector.broadcast %122 : vector<1x64xf32> to vector<9x64xf32>
    %124 = arith.addf %121, %123 : vector<9x64xf32>
    %cst_123 = arith.constant 0.000000e+00 : f32
    %125 = vector.broadcast %cst_123 : f32 to vector<9x64xf32>
    %126 = arith.maximumf %124, %125 : vector<9x64xf32>
    %cst_124 = arith.constant 0.000000e+00 : f32
    %127 = vector.broadcast %cst_124 : f32 to vector<1x64xf32>
    %c0_125 = arith.constant 0 : index
    %c0_126 = arith.constant 0 : index
    %c0_127 = arith.constant 0 : index
    %128 = vector.load %arg7[%c0_125, %c0_126, %c0_127] : memref<9x1x9xf32, #tpu.memory_space<vmem>>, vector<1x1x9xf32>
    %129 = vector.shape_cast %128 : vector<1x1x9xf32> to vector<1x9xf32>
    %cst_128 = arith.constant dense<0.000000e+00> : vector<1x64xf32>
    %130 = tpu.matmul %129, %126, %cst_128 {dimension_numbers = #tpu.dot_dimension_numbers<[1], [0], [0], [1], [0, 0, 1, 1], [], []>} : vector<1x9xf32>, vector<9x64xf32>, vector<1x64xf32> -> vector<1x64xf32>
    %c0_129 = arith.constant 0 : index
    %c0_130 = arith.constant 0 : index
    %c0_131 = arith.constant 0 : index
    %131 = vector.load %arg8[%c0_129, %c0_130, %c0_131] : memref<9x64x64xf32, #tpu.memory_space<vmem>>, vector<1x64x64xf32>
    %132 = vector.shape_cast %131 : vector<1x64x64xf32> to vector<64x64xf32>
    %cst_132 = arith.constant dense<0.000000e+00> : vector<1x64xf32>
    %133 = tpu.matmul %130, %132, %cst_132 {dimension_numbers = #tpu.dot_dimension_numbers<[1], [0], [0], [1], [0, 0, 1, 1], [], []>} : vector<1x64xf32>, vector<64x64xf32>, vector<1x64xf32> -> vector<1x64xf32>
    %134 = arith.addf %127, %133 : vector<1x64xf32>
    %c1_133 = arith.constant 1 : index
    %c0_134 = arith.constant 0 : index
    %c0_135 = arith.constant 0 : index
    %135 = vector.load %arg7[%c1_133, %c0_134, %c0_135] : memref<9x1x9xf32, #tpu.memory_space<vmem>>, vector<1x1x9xf32>
    %136 = vector.shape_cast %135 : vector<1x1x9xf32> to vector<1x9xf32>
    %cst_136 = arith.constant dense<0.000000e+00> : vector<1x64xf32>
    %137 = tpu.matmul %136, %126, %cst_136 {dimension_numbers = #tpu.dot_dimension_numbers<[1], [0], [0], [1], [0, 0, 1, 1], [], []>} : vector<1x9xf32>, vector<9x64xf32>, vector<1x64xf32> -> vector<1x64xf32>
    %c1_137 = arith.constant 1 : index
    %c0_138 = arith.constant 0 : index
    %c0_139 = arith.constant 0 : index
    %138 = vector.load %arg8[%c1_137, %c0_138, %c0_139] : memref<9x64x64xf32, #tpu.memory_space<vmem>>, vector<1x64x64xf32>
    %139 = vector.shape_cast %138 : vector<1x64x64xf32> to vector<64x64xf32>
    %cst_140 = arith.constant dense<0.000000e+00> : vector<1x64xf32>
    %140 = tpu.matmul %137, %139, %cst_140 {dimension_numbers = #tpu.dot_dimension_numbers<[1], [0], [0], [1], [0, 0, 1, 1], [], []>} : vector<1x64xf32>, vector<64x64xf32>, vector<1x64xf32> -> vector<1x64xf32>
    %141 = arith.addf %134, %140 : vector<1x64xf32>
    %c2_141 = arith.constant 2 : index
    %c0_142 = arith.constant 0 : index
    %c0_143 = arith.constant 0 : index
    %142 = vector.load %arg7[%c2_141, %c0_142, %c0_143] : memref<9x1x9xf32, #tpu.memory_space<vmem>>, vector<1x1x9xf32>
    %143 = vector.shape_cast %142 : vector<1x1x9xf32> to vector<1x9xf32>
    %cst_144 = arith.constant dense<0.000000e+00> : vector<1x64xf32>
    %144 = tpu.matmul %143, %126, %cst_144 {dimension_numbers = #tpu.dot_dimension_numbers<[1], [0], [0], [1], [0, 0, 1, 1], [], []>} : vector<1x9xf32>, vector<9x64xf32>, vector<1x64xf32> -> vector<1x64xf32>
    %c2_145 = arith.constant 2 : index
    %c0_146 = arith.constant 0 : index
    %c0_147 = arith.constant 0 : index
    %145 = vector.load %arg8[%c2_145, %c0_146, %c0_147] : memref<9x64x64xf32, #tpu.memory_space<vmem>>, vector<1x64x64xf32>
    %146 = vector.shape_cast %145 : vector<1x64x64xf32> to vector<64x64xf32>
    %cst_148 = arith.constant dense<0.000000e+00> : vector<1x64xf32>
    %147 = tpu.matmul %144, %146, %cst_148 {dimension_numbers = #tpu.dot_dimension_numbers<[1], [0], [0], [1], [0, 0, 1, 1], [], []>} : vector<1x64xf32>, vector<64x64xf32>, vector<1x64xf32> -> vector<1x64xf32>
    %148 = arith.addf %141, %147 : vector<1x64xf32>
    %c3_149 = arith.constant 3 : index
    %c0_150 = arith.constant 0 : index
    %c0_151 = arith.constant 0 : index
    %149 = vector.load %arg7[%c3_149, %c0_150, %c0_151] : memref<9x1x9xf32, #tpu.memory_space<vmem>>, vector<1x1x9xf32>
    %150 = vector.shape_cast %149 : vector<1x1x9xf32> to vector<1x9xf32>
    %cst_152 = arith.constant dense<0.000000e+00> : vector<1x64xf32>
    %151 = tpu.matmul %150, %126, %cst_152 {dimension_numbers = #tpu.dot_dimension_numbers<[1], [0], [0], [1], [0, 0, 1, 1], [], []>} : vector<1x9xf32>, vector<9x64xf32>, vector<1x64xf32> -> vector<1x64xf32>
    %c3_153 = arith.constant 3 : index
    %c0_154 = arith.constant 0 : index
    %c0_155 = arith.constant 0 : index
    %152 = vector.load %arg8[%c3_153, %c0_154, %c0_155] : memref<9x64x64xf32, #tpu.memory_space<vmem>>, vector<1x64x64xf32>
    %153 = vector.shape_cast %152 : vector<1x64x64xf32> to vector<64x64xf32>
    %cst_156 = arith.constant dense<0.000000e+00> : vector<1x64xf32>
    %154 = tpu.matmul %151, %153, %cst_156 {dimension_numbers = #tpu.dot_dimension_numbers<[1], [0], [0], [1], [0, 0, 1, 1], [], []>} : vector<1x64xf32>, vector<64x64xf32>, vector<1x64xf32> -> vector<1x64xf32>
    %155 = arith.addf %148, %154 : vector<1x64xf32>
    %c4_157 = arith.constant 4 : index
    %c0_158 = arith.constant 0 : index
    %c0_159 = arith.constant 0 : index
    %156 = vector.load %arg7[%c4_157, %c0_158, %c0_159] : memref<9x1x9xf32, #tpu.memory_space<vmem>>, vector<1x1x9xf32>
    %157 = vector.shape_cast %156 : vector<1x1x9xf32> to vector<1x9xf32>
    %cst_160 = arith.constant dense<0.000000e+00> : vector<1x64xf32>
    %158 = tpu.matmul %157, %126, %cst_160 {dimension_numbers = #tpu.dot_dimension_numbers<[1], [0], [0], [1], [0, 0, 1, 1], [], []>} : vector<1x9xf32>, vector<9x64xf32>, vector<1x64xf32> -> vector<1x64xf32>
    %c4_161 = arith.constant 4 : index
    %c0_162 = arith.constant 0 : index
    %c0_163 = arith.constant 0 : index
    %159 = vector.load %arg8[%c4_161, %c0_162, %c0_163] : memref<9x64x64xf32, #tpu.memory_space<vmem>>, vector<1x64x64xf32>
    %160 = vector.shape_cast %159 : vector<1x64x64xf32> to vector<64x64xf32>
    %cst_164 = arith.constant dense<0.000000e+00> : vector<1x64xf32>
    %161 = tpu.matmul %158, %160, %cst_164 {dimension_numbers = #tpu.dot_dimension_numbers<[1], [0], [0], [1], [0, 0, 1, 1], [], []>} : vector<1x64xf32>, vector<64x64xf32>, vector<1x64xf32> -> vector<1x64xf32>
    %162 = arith.addf %155, %161 : vector<1x64xf32>
    %c5_165 = arith.constant 5 : index
    %c0_166 = arith.constant 0 : index
    %c0_167 = arith.constant 0 : index
    %163 = vector.load %arg7[%c5_165, %c0_166, %c0_167] : memref<9x1x9xf32, #tpu.memory_space<vmem>>, vector<1x1x9xf32>
    %164 = vector.shape_cast %163 : vector<1x1x9xf32> to vector<1x9xf32>
    %cst_168 = arith.constant dense<0.000000e+00> : vector<1x64xf32>
    %165 = tpu.matmul %164, %126, %cst_168 {dimension_numbers = #tpu.dot_dimension_numbers<[1], [0], [0], [1], [0, 0, 1, 1], [], []>} : vector<1x9xf32>, vector<9x64xf32>, vector<1x64xf32> -> vector<1x64xf32>
    %c5_169 = arith.constant 5 : index
    %c0_170 = arith.constant 0 : index
    %c0_171 = arith.constant 0 : index
    %166 = vector.load %arg8[%c5_169, %c0_170, %c0_171] : memref<9x64x64xf32, #tpu.memory_space<vmem>>, vector<1x64x64xf32>
    %167 = vector.shape_cast %166 : vector<1x64x64xf32> to vector<64x64xf32>
    %cst_172 = arith.constant dense<0.000000e+00> : vector<1x64xf32>
    %168 = tpu.matmul %165, %167, %cst_172 {dimension_numbers = #tpu.dot_dimension_numbers<[1], [0], [0], [1], [0, 0, 1, 1], [], []>} : vector<1x64xf32>, vector<64x64xf32>, vector<1x64xf32> -> vector<1x64xf32>
    %169 = arith.addf %162, %168 : vector<1x64xf32>
    %c6_173 = arith.constant 6 : index
    %c0_174 = arith.constant 0 : index
    %c0_175 = arith.constant 0 : index
    %170 = vector.load %arg7[%c6_173, %c0_174, %c0_175] : memref<9x1x9xf32, #tpu.memory_space<vmem>>, vector<1x1x9xf32>
    %171 = vector.shape_cast %170 : vector<1x1x9xf32> to vector<1x9xf32>
    %cst_176 = arith.constant dense<0.000000e+00> : vector<1x64xf32>
    %172 = tpu.matmul %171, %126, %cst_176 {dimension_numbers = #tpu.dot_dimension_numbers<[1], [0], [0], [1], [0, 0, 1, 1], [], []>} : vector<1x9xf32>, vector<9x64xf32>, vector<1x64xf32> -> vector<1x64xf32>
    %c6_177 = arith.constant 6 : index
    %c0_178 = arith.constant 0 : index
    %c0_179 = arith.constant 0 : index
    %173 = vector.load %arg8[%c6_177, %c0_178, %c0_179] : memref<9x64x64xf32, #tpu.memory_space<vmem>>, vector<1x64x64xf32>
    %174 = vector.shape_cast %173 : vector<1x64x64xf32> to vector<64x64xf32>
    %cst_180 = arith.constant dense<0.000000e+00> : vector<1x64xf32>
    %175 = tpu.matmul %172, %174, %cst_180 {dimension_numbers = #tpu.dot_dimension_numbers<[1], [0], [0], [1], [0, 0, 1, 1], [], []>} : vector<1x64xf32>, vector<64x64xf32>, vector<1x64xf32> -> vector<1x64xf32>
    %176 = arith.addf %169, %175 : vector<1x64xf32>
    %c7_181 = arith.constant 7 : index
    %c0_182 = arith.constant 0 : index
    %c0_183 = arith.constant 0 : index
    %177 = vector.load %arg7[%c7_181, %c0_182, %c0_183] : memref<9x1x9xf32, #tpu.memory_space<vmem>>, vector<1x1x9xf32>
    %178 = vector.shape_cast %177 : vector<1x1x9xf32> to vector<1x9xf32>
    %cst_184 = arith.constant dense<0.000000e+00> : vector<1x64xf32>
    %179 = tpu.matmul %178, %126, %cst_184 {dimension_numbers = #tpu.dot_dimension_numbers<[1], [0], [0], [1], [0, 0, 1, 1], [], []>} : vector<1x9xf32>, vector<9x64xf32>, vector<1x64xf32> -> vector<1x64xf32>
    %c7_185 = arith.constant 7 : index
    %c0_186 = arith.constant 0 : index
    %c0_187 = arith.constant 0 : index
    %180 = vector.load %arg8[%c7_185, %c0_186, %c0_187] : memref<9x64x64xf32, #tpu.memory_space<vmem>>, vector<1x64x64xf32>
    %181 = vector.shape_cast %180 : vector<1x64x64xf32> to vector<64x64xf32>
    %cst_188 = arith.constant dense<0.000000e+00> : vector<1x64xf32>
    %182 = tpu.matmul %179, %181, %cst_188 {dimension_numbers = #tpu.dot_dimension_numbers<[1], [0], [0], [1], [0, 0, 1, 1], [], []>} : vector<1x64xf32>, vector<64x64xf32>, vector<1x64xf32> -> vector<1x64xf32>
    %183 = arith.addf %176, %182 : vector<1x64xf32>
    %c8_189 = arith.constant 8 : index
    %c0_190 = arith.constant 0 : index
    %c0_191 = arith.constant 0 : index
    %184 = vector.load %arg7[%c8_189, %c0_190, %c0_191] : memref<9x1x9xf32, #tpu.memory_space<vmem>>, vector<1x1x9xf32>
    %185 = vector.shape_cast %184 : vector<1x1x9xf32> to vector<1x9xf32>
    %cst_192 = arith.constant dense<0.000000e+00> : vector<1x64xf32>
    %186 = tpu.matmul %185, %126, %cst_192 {dimension_numbers = #tpu.dot_dimension_numbers<[1], [0], [0], [1], [0, 0, 1, 1], [], []>} : vector<1x9xf32>, vector<9x64xf32>, vector<1x64xf32> -> vector<1x64xf32>
    %c8_193 = arith.constant 8 : index
    %c0_194 = arith.constant 0 : index
    %c0_195 = arith.constant 0 : index
    %187 = vector.load %arg8[%c8_193, %c0_194, %c0_195] : memref<9x64x64xf32, #tpu.memory_space<vmem>>, vector<1x64x64xf32>
    %188 = vector.shape_cast %187 : vector<1x64x64xf32> to vector<64x64xf32>
    %cst_196 = arith.constant dense<0.000000e+00> : vector<1x64xf32>
    %189 = tpu.matmul %186, %188, %cst_196 {dimension_numbers = #tpu.dot_dimension_numbers<[1], [0], [0], [1], [0, 0, 1, 1], [], []>} : vector<1x64xf32>, vector<64x64xf32>, vector<1x64xf32> -> vector<1x64xf32>
    %190 = arith.addf %183, %189 : vector<1x64xf32>
    %c0_197 = arith.constant 0 : index
    %c0_198 = arith.constant 0 : index
    %191 = vector.load %arg9[%c0_197, %c0_198] : memref<1x64xf32, #tpu.memory_space<vmem>>, vector<1x64xf32>
    %192 = arith.addf %190, %191 : vector<1x64xf32>
    %cst_199 = arith.constant 0.000000e+00 : f32
    %193 = vector.broadcast %cst_199 : f32 to vector<1x64xf32>
    %194 = arith.maximumf %192, %193 : vector<1x64xf32>
    %c0_200 = arith.constant 0 : index
    %c0_201 = arith.constant 0 : index
    %195 = vector.load %arg10[%c0_200, %c0_201] : memref<64x1024xf32, #tpu.memory_space<vmem>>, vector<64x1024xf32>
    %cst_202 = arith.constant dense<0.000000e+00> : vector<1x1024xf32>
    %196 = tpu.matmul %194, %195, %cst_202 {dimension_numbers = #tpu.dot_dimension_numbers<[1], [0], [0], [1], [0, 0, 1, 1], [], []>} : vector<1x64xf32>, vector<64x1024xf32>, vector<1x1024xf32> -> vector<1x1024xf32>
    %c0_203 = arith.constant 0 : index
    %c0_204 = arith.constant 0 : index
    %197 = vector.load %arg11[%c0_203, %c0_204] : memref<1x1024xf32, #tpu.memory_space<vmem>>, vector<1x1024xf32>
    %198 = arith.addf %196, %197 : vector<1x1024xf32>
    %cst_205 = arith.constant 0.000000e+00 : f32
    %199 = vector.broadcast %cst_205 : f32 to vector<1x1024xf32>
    %200 = arith.maximumf %198, %199 : vector<1x1024xf32>
    %c0_206 = arith.constant 0 : index
    %c0_207 = arith.constant 0 : index
    %201 = vector.load %arg12[%c0_206, %c0_207] : memref<1024x128xf32, #tpu.memory_space<vmem>>, vector<1024x128xf32>
    %cst_208 = arith.constant dense<0.000000e+00> : vector<1x128xf32>
    %202 = tpu.matmul %200, %201, %cst_208 {dimension_numbers = #tpu.dot_dimension_numbers<[1], [0], [0], [1], [0, 0, 1, 1], [], []>} : vector<1x1024xf32>, vector<1024x128xf32>, vector<1x128xf32> -> vector<1x128xf32>
    %c0_209 = arith.constant 0 : index
    %c0_210 = arith.constant 0 : index
    %203 = vector.load %arg13[%c0_209, %c0_210] : memref<1x128xf32, #tpu.memory_space<vmem>>, vector<1x128xf32>
    %204 = arith.addf %202, %203 : vector<1x128xf32>
    %c0_211 = arith.constant 0 : index
    %c0_212 = arith.constant 0 : index
    %c0_213 = arith.constant 0 : index
    %205 = vector.load %arg14[%c0_211, %c0_212, %c0_213] : memref<1x1x128xf32, #tpu.memory_space<vmem>>, vector<1x1x128xf32>
    %206 = vector.shape_cast %205 : vector<1x1x128xf32> to vector<1x128xf32>
    %207 = vector.shape_cast %204 : vector<1x128xf32> to vector<1x1x128xf32>
    tpu.vector_store %arg14[%c0_211, %c0_212, %c0_213], %207 {strides = array<i32>} : memref<1x1x128xf32, #tpu.memory_space<vmem>>, vector<1x1x128xf32>,
    return
  }
  func.func @transform_0(%arg0: i32) -> (i32, i32, i32) {
    %c0_i32 = arith.constant 0 : i32
    %c0_i32_0 = arith.constant 0 : i32
    %c0_i32_1 = arith.constant 0 : i32
    return %arg0, %c0_i32, %c0_i32_0 : i32, i32, i32
  }
  func.func @transform_1(%arg0: i32) -> (i32, i32) {
    %c0_i32 = arith.constant 0 : i32
    %c0_i32_0 = arith.constant 0 : i32
    %c0_i32_1 = arith.constant 0 : i32
    return %c0_i32, %c0_i32_0 : i32, i32
  }
  func.func @transform_2(%arg0: i32) -> (i32, i32) {
    %c0_i32 = arith.constant 0 : i32
    %c0_i32_0 = arith.constant 0 : i32
    %c0_i32_1 = arith.constant 0 : i32
    return %c0_i32, %c0_i32_0 : i32, i32
  }
  func.func @transform_3(%arg0: i32) -> (i32, i32, i32) {
    %c0_i32 = arith.constant 0 : i32
    %c0_i32_0 = arith.constant 0 : i32
    %c0_i32_1 = arith.constant 0 : i32
    %c0_i32_2 = arith.constant 0 : i32
    return %c0_i32, %c0_i32_0, %c0_i32_1 : i32, i32, i32
  }
  func.func @transform_4(%arg0: i32) -> (i32, i32, i32) {
    %c0_i32 = arith.constant 0 : i32
    %c0_i32_0 = arith.constant 0 : i32
    %c0_i32_1 = arith.constant 0 : i32
    %c0_i32_2 = arith.constant 0 : i32
    return %c0_i32, %c0_i32_0, %c0_i32_1 : i32, i32, i32
  }
  func.func @transform_5(%arg0: i32) -> (i32, i32) {
    %c0_i32 = arith.constant 0 : i32
    %c0_i32_0 = arith.constant 0 : i32
    %c0_i32_1 = arith.constant 0 : i32
    return %c0_i32, %c0_i32_0 : i32, i32
  }
  func.func @transform_6(%arg0: i32) -> (i32, i32, i32) {
    %c0_i32 = arith.constant 0 : i32
    %c0_i32_0 = arith.constant 0 : i32
    %c0_i32_1 = arith.constant 0 : i32
    %c0_i32_2 = arith.constant 0 : i32
    return %c0_i32, %c0_i32_0, %c0_i32_1 : i32, i32, i32
  }
  func.func @transform_7(%arg0: i32) -> (i32, i32, i32) {
    %c0_i32 = arith.constant 0 : i32
    %c0_i32_0 = arith.constant 0 : i32
    %c0_i32_1 = arith.constant 0 : i32
    %c0_i32_2 = arith.constant 0 : i32
    return %c0_i32, %c0_i32_0, %c0_i32_1 : i32, i32, i32
  }
  func.func @transform_8(%arg0: i32) -> (i32, i32) {
    %c0_i32 = arith.constant 0 : i32
    %c0_i32_0 = arith.constant 0 : i32
    %c0_i32_1 = arith.constant 0 : i32
    return %c0_i32, %c0_i32_0 : i32, i32
  }
  func.func @transform_9(%arg0: i32) -> (i32, i32) {
    %c0_i32 = arith.constant 0 : i32
    %c0_i32_0 = arith.constant 0 : i32
    %c0_i32_1 = arith.constant 0 : i32
    return %c0_i32, %c0_i32_0 : i32, i32
  }
  func.func @transform_10(%arg0: i32) -> (i32, i32) {
    %c0_i32 = arith.constant 0 : i32
    %c0_i32_0 = arith.constant 0 : i32
    %c0_i32_1 = arith.constant 0 : i32
    return %c0_i32, %c0_i32_0 : i32, i32
  }
  func.func @transform_11(%arg0: i32) -> (i32, i32) {
    %c0_i32 = arith.constant 0 : i32
    %c0_i32_0 = arith.constant 0 : i32
    %c0_i32_1 = arith.constant 0 : i32
    return %c0_i32, %c0_i32_0 : i32, i32
  }
  func.func @transform_12(%arg0: i32) -> (i32, i32) {
    %c0_i32 = arith.constant 0 : i32
    %c0_i32_0 = arith.constant 0 : i32
    %c0_i32_1 = arith.constant 0 : i32
    return %c0_i32, %c0_i32_0 : i32, i32
  }
  func.func @transform_13(%arg0: i32) -> (i32, i32, i32) {
    %c0_i32 = arith.constant 0 : i32
    %c0_i32_0 = arith.constant 0 : i32
    %c0_i32_1 = arith.constant 0 : i32
    return %arg0, %c0_i32, %c0_i32_0 : i32, i32, i32
  }
}

</mosaic_0001>

<bundles_post_ra>
// kernel: a2c_forward.1
= control target key start
LH: loop header
LB: loop body
LE: loop exit
PB: predicated region body
PF: predicated region fallthrough
CT: control target
= control target key end

     0   :  { %s8067_s25 = smov 0   ;;  %s9714_s0 = inlined_call_operand.vmem [shape: f32[2,64,256], index: 0, kind: input, shape index: {}]   ;;  %s9715_s1 = inlined_call_operand.vmem [shape: f32[256,32], index: 1, kind: input, shape index: {}]   ;;  %s9716_s2 = inlined_call_operand.vmem [shape: f32[1,32], index: 2, kind: input, shape index: {}]   ;;  %s9717_s3 = inlined_call_operand.vmem [shape: f32[16,9,64], index: 3, kind: input, shape index: {}]   ;;  %s9718_s4 = inlined_call_operand.vmem [shape: f32[16,32,64], index: 4, kind: input, shape index: {}]   ;;  %s9719_s5 = inlined_call_operand.vmem [shape: f32[1,64], index: 5, kind: input, shape index: {}]   ;;  %s9720_s6 = inlined_call_operand.vmem [shape: f32[9,1,9], index: 6, kind: input, shape index: {}]   ;;  %s9721_s7 = inlined_call_operand.vmem [shape: f32[9,64,64], index: 7, kind: input, shape index: {}]   ;;  %s9722_s8 = inlined_call_operand.vmem [shape: f32[1,64], index: 8, kind: input, shape index: {}]   ;;  %s9723_s9 = inlined_call_operand.vmem [shape: f32[64,1024], index: 9, kind: input, shape index: {}]   ;;  %s9724_s10 = inlined_call_operand.vmem [shape: f32[1,1024], index: 10, kind: input, shape index: {}]   ;;  %s9725_s11 = inlined_call_operand.vmem [shape: f32[1024,128], index: 11, kind: input, shape index: {}]   ;;  %s9726_s12 = inlined_call_operand.vmem [shape: f32[1,128], index: 12, kind: input, shape index: {}]   ;;  %s9727_s13 = inlined_call_operand.vmem [shape: f32[2,1,128], index: 13, kind: output, shape index: {}]  }
   0x1 LB: > { %s5648_s26 = sadd.s32 4294967295, %s7991_s25   ;;  %p5652_p0 = scmp.ge.s32.totalorder %s7991_s25, 1  ;;  %s7991_s25 = sphi %s8067_s25, %s23_s25  }
   0x2   : > { %p387_p1 = scmp.lt.s32.totalorder %s7991_s25, 3 }
   0x4   : > { %p388_p2 = pnand %p5652_p0, %p387_p1 }
   0x5   : > { %v469_v0 = vld [vmem:[%s9715_s1 + $0x80] sm:$0xff] (!%p388_p2)  ;;  %v470_v1 = vld [vmem:[%s9715_s1 + $0x88] sm:$0xff] (!%p388_p2)  ;;  %p429_p3 = scmp.lt.s32.totalorder (!%p388_p2), %s5648_s26, 1  ;;  %v471_v5 = vld [vmem:[%s9715_s1 + $0x90] sm:$0xff] (!%p388_p2)  ;;  %vm607_vm0 = vcmask (!%p388_p2), 523264   ;;  %vm782_vm1 = vcmask (!%p388_p2), 261120  }
   0x6   : > { %391 = sbr.rel (%p388_p2) target bundleno = 3517 (0xdbd), region = 72  ;;  %v453_v2 = vld [vmem:[%s9715_s1] sm:$0xff] (!%p388_p2)  ;;  %v7191_v3 = vpack.c.bf16 (!%p388_p2), %v470_v1, %v469_v0  ;;  %v454_v4 = vld [vmem:[%s9715_s1 + $0x8] sm:$0xff] (!%p388_p2)  ;;  %v472_v6 = vld [vmem:[%s9715_s1 + $0x98] sm:$0xff] (!%p388_p2)  ;;  %vm7994_vm2 = vmmov (!%p388_p2), 0   ;;  %vm3369_vm3 = vcmask (!%p388_p2), 1040384  }
   0x7   : > { %v7193_v7 = vpack.c.bf16 (!%p388_p2), %v454_v4, %v453_v2  ;;  %v7195_v8 = vpack.c.bf16 (!%p388_p2), %v472_v6, %v471_v5  ;;  %v455_v9 = vld [vmem:[%s9715_s1 + $0x10] sm:$0xff] (!%p388_p2)  ;;  %v456_v10 = vld [vmem:[%s9715_s1 + $0x18] sm:$0xff] (!%p388_p2)  ;;  %v473_v11 = vld [vmem:[%s9715_s1 + $0xa0] sm:$0xff] (!%p388_p2)  ;;  %vm7996_vm4 = vmmov (!%p388_p2), 1   ;;  %vm3365_vm6 = vcmask (!%p388_p2), 72704  }
   0x8   : > { %7192 = vmatprep.subr.bf16.mxu0 (!%p388_p2), %v7191_v3  ;;  %v474_v12 = vld [vmem:[%s9715_s1 + $0xa8] sm:$0xff] (!%p388_p2)  ;;  %v7197_v13 = vpack.c.bf16 (!%p388_p2), %v456_v10, %v455_v9  ;;  %v457_v15 = vld [vmem:[%s9715_s1 + $0x20] sm:$0xff] (!%p388_p2)  ;;  %v475_v17 = vld [vmem:[%s9715_s1 + $0xb0] sm:$0xff] (!%p388_p2) }
   0x9   : > { %7194 = vmatpush3.bf16.msra.mxu0 (!%p388_p2), %v7193_v7  ;;  %v7199_v14 = vpack.c.bf16 (!%p388_p2), %v474_v12, %v473_v11  ;;  %v458_v16 = vld [vmem:[%s9715_s1 + $0x28] sm:$0xff] (!%p388_p2)  ;;  %v476_v18 = vld [vmem:[%s9715_s1 + $0xb8] sm:$0xff] (!%p388_p2)  ;;  %v459_v21 = vld [vmem:[%s9715_s1 + $0x30] sm:$0xff] (!%p388_p2) }
   0xa   : > { %7196 = vmatprep.subr.bf16.mxu0 (!%p388_p2), %v7195_v8  ;;  %v7201_v19 = vpack.c.bf16 (!%p388_p2), %v458_v16, %v457_v15  ;;  %v7203_v20 = vpack.c.bf16 (!%p388_p2), %v476_v18, %v475_v17  ;;  %v460_v22 = vld [vmem:[%s9715_s1 + $0x38] sm:$0xff] (!%p388_p2)  ;;  %v477_v23 = vld [vmem:[%s9715_s1 + $0xc0] sm:$0xff] (!%p388_p2)  ;;  %v478_v24 = vld [vmem:[%s9715_s1 + $0xc8] sm:$0xff] (!%p388_p2) }
   0xb   : > { %v7205_v26 = vpack.c.bf16 (!%p388_p2), %v460_v22, %v459_v21  ;;  %v7207_v27 = vpack.c.bf16 (!%p388_p2), %v478_v24, %v477_v23  ;;  %v461_v28 = vld [vmem:[%s9715_s1 + $0x40] sm:$0xff] (!%p388_p2)  ;;  %v462_v29 = vld [vmem:[%s9715_s1 + $0x48] sm:$0xff] (!%p388_p2)  ;;  %v479_v30 = vld [vmem:[%s9715_s1 + $0xd0] sm:$0xff] (!%p388_p2) }
   0xc   : > { %v480_v31 = vld [vmem:[%s9715_s1 + $0xd8] sm:$0xff] (!%p388_p2)  ;;  %v7209_v32 = vpack.c.bf16 (!%p388_p2), %v462_v29, %v461_v28  ;;  %v463_v34 = vld [vmem:[%s9715_s1 + $0x50] sm:$0xff] (!%p388_p2)  ;;  %v481_v36 = vld [vmem:[%s9715_s1 + $0xe0] sm:$0xff] (!%p388_p2) }
   0xd   : > { %s9731_s26 = smov (!%p429_p3, %s5648_s26), 1  ;;  %7198 = vmatpush3.bf16.msra.mxu0 %v7197_v13  ;;  %v7211_v33 = vpack.c.bf16 %v480_v31, %v479_v30  ;;  %v464_v35 = vld [vmem:[%s9715_s1 + $0x58] sm:$0xff]  ;;  %v482_v37 = vld [vmem:[%s9715_s1 + $0xe8] sm:$0xff]  ;;  %v465_v40 = vld [vmem:[%s9715_s1 + $0x60] sm:$0xff] }
   0xe   : > { %s5916_s15 = sshll.u32 %s9731_s26, 7  ;;  %7200 = vmatprep.subr.bf16.mxu0 %v7199_v14  ;;  %v7213_v38 = vpack.c.bf16 %v464_v35, %v463_v34  ;;  %v7215_v39 = vpack.c.bf16 %v482_v37, %v481_v36  ;;  %v466_v41 = vld [vmem:[%s9715_s1 + $0x68] sm:$0xff]  ;;  %v483_v42 = vld [vmem:[%s9715_s1 + $0xf0] sm:$0xff]  ;;  %v484_v43 = vld [vmem:[%s9715_s1 + $0xf8] sm:$0xff]  ;;  %s436_s20 = scalar_lea.vmem %s9727_s13, %s9731_s26 }
   0xf   : > { %s8123_s28 = scalar_lea.vmem %s9714_s0, %s5916_s15  ;;  %v7217_v44 = vpack.c.bf16 %v466_v41, %v465_v40  ;;  %v7219_v45 = vpack.c.bf16 %v484_v43, %v483_v42  ;;  %v467_v46 = vld [vmem:[%s9715_s1 + $0x70] sm:$0xff]  ;;  %v468_v47 = vld [vmem:[%s9715_s1 + $0x78] sm:$0xff]  ;;  %v605_v0 = vld [vmem:[%s9717_s3] sm:$0xff] }
  0x10   : > { %v438_v25 = vld [vmem:[%s8123_s28 + $0x8] sm:$0xff]  ;;  %v7221_v48 = vpack.c.bf16 %v468_v47, %v467_v46  ;;  %v437_v49 = vld [vmem:[%s8123_s28] sm:$0xff]  ;;  %v440_v50 = vld [vmem:[%s8123_s28 + $0x18] sm:$0xff]  ;;  %6493 = vmatprep.mubr.msk.f32.mxu1 %vm607_vm0, %v605_v0 }
  0x11   : > { %556 = vmatprep.mubr.f32.mxu0 %v438_v25  ;;  %7202 = vmatpush3.bf16.msra.mxu0 %v7201_v19  ;;  %v439_v51 = vld [vmem:[%s8123_s28 + $0x10] sm:$0xff]  ;;  %v442_v52 = vld [vmem:[%s8123_s28 + $0x28] sm:$0xff]  ;;  %v441_v53 = vld [vmem:[%s8123_s28 + $0x20] sm:$0xff] }
  0x12   : > { %7204 = vmatprep.subr.bf16.mxu0 %v7203_v20  ;;  %v444_v54 = vld [vmem:[%s8123_s28 + $0x38] sm:$0xff]  ;;  %v443_v55 = vld [vmem:[%s8123_s28 + $0x30] sm:$0xff]  ;;  %v446_v56 = vld [vmem:[%s8123_s28 + $0x48] sm:$0xff] }
  0x13   : > { %v445_v57 = vld [vmem:[%s8123_s28 + $0x40] sm:$0xff]  ;;  %v448_v58 = vld [vmem:[%s8123_s28 + $0x58] sm:$0xff]  ;;  %v447_v59 = vld [vmem:[%s8123_s28 + $0x50] sm:$0xff] }
  0x14   : > { %v450_v60 = vld [vmem:[%s8123_s28 + $0x68] sm:$0xff]  ;;  %v449_v61 = vld [vmem:[%s8123_s28 + $0x60] sm:$0xff]  ;;  %v452_v62 = vld [vmem:[%s8123_s28 + $0x78] sm:$0xff] }
  0x15   : > { %7206 = vmatpush3.bf16.msra.mxu0 %v7205_v26  ;;  %v451_v63 = vld [vmem:[%s8123_s28 + $0x70] sm:$0xff]  ;;  %v5670_v1 = vld [vmem:[%s9717_s3 + $0x20] sm:$0xff]  ;;  %v606_v47 = vld [vmem:[%s9717_s3 + $0x8] sm:$0x1] }
  0x16   : > { %7208 = vmatprep.subr.bf16.mxu0 %v7207_v27  ;;  %v5655_v5 = vld [vmem:[%s9716_s2] ss:$0 sm:$0xff]  ;;  %v5664_v0 = vld [vmem:[%s9718_s4 + $0x30] sm:$0xff]  ;;  %vm8710_vm5 = vmpackc.low %vm3369_vm3, %vm7996_vm4 }
  0x19   : > { %7210 = vmatpush3.bf16.msra.mxu0 %v7209_v32 }
  0x1a   : > { %7212 = vmatprep.subr.bf16.mxu0 %v7211_v33 }
  0x1d   : > { %7214 = vmatpush3.bf16.msra.mxu0 %v7213_v38 }
  0x1e   : > { %7216 = vmatprep.subr.bf16.mxu0 %v7215_v39 }
  0x21   : > { %7218 = vmatpush3.bf16.msra.mxu0 %v7217_v44 }
  0x22   : > { %7220 = vmatprep.subr.bf16.mxu0 %v7219_v45 }
  0x25   : > { %7222 = vmatpush3.bf16.msra.mxu0 %v7221_v48  ;;  %v5671_v48 = vld [vmem:[%s9717_s3 + $0x28] sm:$0x1] }
  0x28   : > { %557 = vmatmul.mubr.f32.vlgmr.msra.gmra.mrb[0].mxu0 %v437_v49  ;;  %v5658_v49 = vld [vmem:[%s9717_s3 + $0x10] sm:$0xff] }
  0x29   : > { %561 = vmatprep.mubr.f32.mxu0 %v440_v50  ;;  %v5690_v50 = vld [vmem:[%s9717_s3 + $0x40] sm:$0xff] }
  0x2c   : > { %562 = vmatmul.mubr.f32.gmra.mrb[2].mxu0 %v439_v51  ;;  %v5659_v51 = vld [vmem:[%s9717_s3 + $0x18] sm:$0x1] }
  0x2d   : > { %566 = vmatprep.mubr.f32.mxu0 %v442_v52  ;;  %v5691_v52 = vld [vmem:[%s9717_s3 + $0x48] sm:$0x1] }
  0x30   : > { %567 = vmatmul.mubr.f32.gmra.mrb[4].mxu0 %v441_v53  ;;  %v5700_v53 = vld [vmem:[%s9717_s3 + $0x50] sm:$0xff] }
  0x31   : > { %571 = vmatprep.mubr.f32.mxu0 %v444_v54  ;;  %v5701_v54 = vld [vmem:[%s9717_s3 + $0x58] sm:$0x1] }
  0x34   : > { %572 = vmatmul.mubr.f32.gmra.mrb[6].mxu0 %v443_v55  ;;  %v5710_v55 = vld [vmem:[%s9717_s3 + $0x60] sm:$0xff] }
  0x35   : > { %576 = vmatprep.mubr.f32.mxu0 %v446_v56  ;;  %v5711_v56 = vld [vmem:[%s9717_s3 + $0x68] sm:$0x1] }
  0x38   : > { %577 = vmatmul.mubr.f32.gmra.mrb[8].mxu0 %v445_v57  ;;  %v5730_v57 = vld [vmem:[%s9717_s3 + $0x80] sm:$0xff] }
  0x39   : > { %581 = vmatprep.mubr.f32.mxu0 %v448_v58  ;;  %v5731_v58 = vld [vmem:[%s9717_s3 + $0x88] sm:$0x1] }
  0x3c   : > { %582 = vmatmul.mubr.f32.gmra.mrb[10].mxu0 %v447_v59  ;;  %v5740_v59 = vld [vmem:[%s9717_s3 + $0x90] sm:$0xff] }
  0x3d   : > { %586 = vmatprep.mubr.f32.mxu0 %v450_v60  ;;  %v5741_v60 = vld [vmem:[%s9717_s3 + $0x98] sm:$0x1] }
  0x40   : > { %587 = vmatmul.mubr.f32.gmra.mrb[12].mxu0 %v449_v61  ;;  %v5750_v61 = vld [vmem:[%s9717_s3 + $0xa0] sm:$0xff] }
  0x41   : > { %591 = vmatprep.mubr.f32.mxu0 %v452_v62  ;;  %v5662_v62 = vld [vmem:[%s9718_s4 + $0x20] sm:$0xff] }
  0x44   : > { %592 = vmatmul.mubr.f32.gmra.mrb[14].mxu0 %v451_v63  ;;  %v5663_v63 = vld [vmem:[%s9718_s4 + $0x28] sm:$0xff] }
  0x45   : > { %6553 = vmatprep.mubr.msk.f32.mxu0 %vm607_vm0, %v5670_v1  ;;  %v7255_v1 = vpack.c.bf16 %v5663_v63, %v5662_v62  ;;  %v5715_v62 = vld [vmem:[%s9718_s4 + $0xc8] sm:$0xff] }
  0xfb   : > { %v5949_v2 = vpop.f32.mrb[0].mxu0 }
  0xfc   : > { %v5950_v3 = vpop.f32.mrb[1].mxu0 }
  0xfd   : > { %v5951_v4 = vadd.f32 %v5950_v3, %v5949_v2  ;;  %v5665_v2 = vld [vmem:[%s9718_s4 + $0x38] sm:$0xff] }
  0xfe   : > { %v7259_v3 = vpack.c.bf16 %v5665_v2, %v5664_v0  ;;  %v5716_v0 = vld [vmem:[%s9718_s4 + $0xd0] sm:$0xff] }
  0xff   : > { %v5952_v6 = vpop.f32.mrb[2].mxu0  ;;  %v559_v8 = vadd.f32 %v5951_v4, %v5655_v5  ;;  %v5751_v4 = vld [vmem:[%s9717_s3 + $0xa8] sm:$0x1] }
 0x100   : > { %v5953_v7 = vpop.f32.mrb[3].mxu0 }
 0x101   : > { %v5954_v9 = vadd.f32 %v5953_v7, %v5952_v6  ;;  %v597_v13 = vmax.f32 %v559_v8, 0.0  ;;  %v689_v6 = vld [vmem:[%s9718_s4] sm:$0xff]  ;;  %v690_v7 = vld [vmem:[%s9718_s4 + $0x8] sm:$0xff] }
 0x102   : > { %v7263_v8 = vpack.c.bf16 %v690_v7, %v689_v6  ;;  %v5726_v7 = vld [vmem:[%s9718_s4 + $0xf0] sm:$0xff] }
 0x103   : > { %v564_v10 = vadd.f32 %v5954_v9, %v5655_v5  ;;  %v5955_v11 = vpop.f32.mrb[4].mxu0  ;;  %v5771_v9 = vld [vmem:[%s9717_s3 + $0xc8] sm:$0x1] }
 0x104   : > { %v5956_v12 = vpop.f32.mrb[5].mxu0 }
 0x105   : > { %v598_v14 = vmax.f32 %v564_v10, 0.0  ;;  %v5957_v15 = vadd.f32 %v5956_v12, %v5955_v11  ;;  %v5780_v10 = vld [vmem:[%s9717_s3 + $0xd0] sm:$0xff]  ;;  %v5781_v11 = vld [vmem:[%s9717_s3 + $0xd8] sm:$0x1] }
 0x107   : > { %v8206_v16 = vpack.c.bf16 %v598_v14, %v597_v13  ;;  %v5958_v17 = vpop.f32.mrb[6].mxu0  ;;  %v569_v19 = vadd.f32 %v5957_v15, %v5655_v5 }
 0x108   : > { %v5959_v18 = vpop.f32.mrb[7].mxu0 }
 0x109   : > { %v5960_v20 = vadd.f32 %v5959_v18, %v5958_v17  ;;  %7224 = vmatprep.subr.bf16.mxu1 %v8206_v16  ;;  %7272 = vmatprep.subr.bf16.mxu0 %v8206_v16  ;;  %v599_v24 = vmax.f32 %v569_v19, 0.0  ;;  %v691_v17 = vld [vmem:[%s9718_s4 + $0x10] sm:$0xff]  ;;  %v692_v18 = vld [vmem:[%s9718_s4 + $0x18] sm:$0xff] }
 0x10a   : > { %7226 = vmatpush3.bf16.msra.mxu1 %v8206_v16  ;;  %7274 = vmatpush3.bf16.msra.mxu0 %v8206_v16 }
 0x10b   : > { %v574_v21 = vadd.f32 %v5960_v20, %v5655_v5  ;;  %v5961_v22 = vpop.f32.mrb[8].mxu0 }
 0x10c   : > { %v5962_v23 = vpop.f32.mrb[9].mxu0 }
 0x10d   : > { %v600_v25 = vmax.f32 %v574_v21, 0.0  ;;  %v5963_v26 = vadd.f32 %v5962_v23, %v5961_v22  ;;  %v7267_v22 = vpack.c.bf16 %v692_v18, %v691_v17 }
 0x10f   : > { %v8212_v27 = vpack.c.bf16 %v600_v25, %v599_v24  ;;  %v5964_v28 = vpop.f32.mrb[10].mxu0  ;;  %v579_v30 = vadd.f32 %v5963_v26, %v5655_v5  ;;  %v5674_v24 = vld [vmem:[%s9718_s4 + $0x40] sm:$0xff]  ;;  %v5675_v25 = vld [vmem:[%s9718_s4 + $0x48] sm:$0xff] }
 0x110   : > { %v5965_v29 = vpop.f32.mrb[11].mxu0  ;;  %v7287_v26 = vpack.c.bf16 %v5675_v25, %v5674_v24  ;;  %v5737_v24 = vld [vmem:[%s9718_s4 + $0x118] sm:$0xff] }
 0x111   : > { %v5966_v31 = vadd.f32 %v5965_v29, %v5964_v28  ;;  %7228 = vmatprep.subr.bf16.mxu1 %v8212_v27  ;;  %7276 = vmatprep.subr.bf16.mxu0 %v8212_v27  ;;  %v601_v35 = vmax.f32 %v579_v30, 0.0  ;;  %v5676_v28 = vld [vmem:[%s9718_s4 + $0x50] sm:$0xff]  ;;  %v5677_v29 = vld [vmem:[%s9718_s4 + $0x58] sm:$0xff] }
 0x112   : > { %7230 = vmatpush3.bf16.msra.mxu1 %v8212_v27  ;;  %7278 = vmatpush3.bf16.msra.mxu0 %v8212_v27  ;;  %v7291_v30 = vpack.c.bf16 %v5677_v29, %v5676_v28  ;;  %v5744_v29 = vld [vmem:[%s9718_s4 + $0x120] sm:$0xff] }
 0x113   : > { %v584_v32 = vadd.f32 %v5966_v31, %v5655_v5  ;;  %v5967_v33 = vpop.f32.mrb[12].mxu0  ;;  %v5680_v31 = vld [vmem:[%s9717_s3 + $0x30] sm:$0xff] }
 0x114   : > { %v5968_v34 = vpop.f32.mrb[13].mxu0 }
 0x115   : > { %v602_v36 = vmax.f32 %v584_v32, 0.0  ;;  %v5969_v37 = vadd.f32 %v5968_v34, %v5967_v33  ;;  %v5684_v32 = vld [vmem:[%s9718_s4 + $0x60] sm:$0xff]  ;;  %v5685_v33 = vld [vmem:[%s9718_s4 + $0x68] sm:$0xff] }
 0x116   : > { %v7311_v34 = vpack.c.bf16 %v5685_v33, %v5684_v32  ;;  %v5746_v32 = vld [vmem:[%s9718_s4 + $0x130] sm:$0xff]  ;;  %v5747_v33 = vld [vmem:[%s9718_s4 + $0x138] sm:$0xff] }
 0x117   : > { %v8218_v38 = vpack.c.bf16 %v602_v36, %v601_v35  ;;  %v5970_v39 = vpop.f32.mrb[14].mxu0  ;;  %v589_v41 = vadd.f32 %v5969_v37, %v5655_v5  ;;  %v5686_v35 = vld [vmem:[%s9718_s4 + $0x70] sm:$0xff]  ;;  %v5687_v36 = vld [vmem:[%s9718_s4 + $0x78] sm:$0xff] }
 0x118   : > { %v5971_v40 = vpop.f32.mrb[15].mxu0  ;;  %v5681_v37 = vld [vmem:[%s9717_s3 + $0x38] sm:$0x1] }
 0x119   : > { %v5972_v42 = vadd.f32 %v5971_v40, %v5970_v39  ;;  %7232 = vmatprep.subr.bf16.mxu1 %v8218_v38  ;;  %7280 = vmatprep.subr.bf16.mxu0 %v8218_v38  ;;  %v603_v44 = vmax.f32 %v589_v41, 0.0  ;;  %v7315_v39 = vpack.c.bf16 %v5687_v36, %v5686_v35  ;;  %v5694_v40 = vld [vmem:[%s9718_s4 + $0x80] sm:$0xff]  ;;  %v5695_v41 = vld [vmem:[%s9718_s4 + $0x88] sm:$0xff] }
 0x11a   : > { %7234 = vmatpush3.bf16.msra.mxu1 %v8218_v38  ;;  %7282 = vmatpush3.bf16.msra.mxu0 %v8218_v38  ;;  %v5754_v35 = vld [vmem:[%s9718_s4 + $0x140] sm:$0xff]  ;;  %v5755_v36 = vld [vmem:[%s9718_s4 + $0x148] sm:$0xff] }
 0x11b   : > { %v594_v43 = vadd.f32 %v5972_v42, %v5655_v5  ;;  %v5770_v5 = vld [vmem:[%s9717_s3 + $0xc0] sm:$0xff]  ;;  %v7335_v42 = vpack.c.bf16 %v5695_v41, %v5694_v40  ;;  %v5757_v40 = vld [vmem:[%s9718_s4 + $0x158] sm:$0xff] }
 0x11d   : > { %v604_v45 = vmax.f32 %v594_v43, 0.0 }
 0x11f   : > { %v8224_v46 = vpack.c.bf16 %v604_v45, %v603_v44 }
 0x121   : > { %7236 = vmatprep.subr.bf16.mxu1 %v8224_v46  ;;  %7284 = vmatprep.subr.bf16.mxu0 %v8224_v46 }
 0x122   : > { %7238 = vmatpush3.bf16.msra.mxu1 %v8224_v46  ;;  %7286 = vmatpush3.bf16.msra.mxu0 %v8224_v46 }
 0x123   : > { %7240 = vmatprep.subr.bf16.mxu1 %v8206_v16  ;;  %7320 = vmatprep.subr.bf16.mxu0 %v8206_v16 }
 0x125   : > { %6494 = vmatmul.mubr.msk.f32.vlgmr.msra.gmra.mrb[0].mxu1 %vm607_vm0, %v606_v47  ;;  %6554 = vmatmul.mubr.msk.f32.vlgmr.msra.gmra.mrb[16].mxu0 %vm607_vm0, %v5671_v48 }
 0x126   : > { %7242 = vmatpush3.bf16.msra.mxu1 %v8206_v16  ;;  %7322 = vmatpush3.bf16.msra.mxu0 %v8206_v16 }
 0x127   : > { %7244 = vmatprep.subr.bf16.mxu1 %v8212_v27  ;;  %7324 = vmatprep.subr.bf16.mxu0 %v8212_v27 }
 0x128   : > { %6512 = vmatprep.mubr.msk.f32.mxu1 %vm607_vm0, %v5658_v49  ;;  %6613 = vmatprep.mubr.msk.f32.mxu0 %vm607_vm0, %v5690_v50  ;;  %v5696_v50 = vld [vmem:[%s9718_s4 + $0x90] sm:$0xff] }
 0x12a   : > { %7246 = vmatpush3.bf16.msra.mxu1 %v8212_v27  ;;  %7326 = vmatpush3.bf16.msra.mxu0 %v8212_v27 }
 0x12b   : > { %7248 = vmatprep.subr.bf16.mxu1 %v8218_v38  ;;  %7328 = vmatprep.subr.bf16.mxu0 %v8218_v38 }
 0x12e   : > { %7250 = vmatpush3.bf16.msra.mxu1 %v8218_v38  ;;  %7330 = vmatpush3.bf16.msra.mxu0 %v8218_v38 }
 0x12f   : > { %7252 = vmatprep.subr.bf16.mxu1 %v8224_v46  ;;  %7332 = vmatprep.subr.bf16.mxu0 %v8224_v46 }
 0x132   : > { %7254 = vmatpush3.bf16.msra.mxu1 %v8224_v46  ;;  %7334 = vmatpush3.bf16.msra.mxu0 %v8224_v46 }
 0x133   : > { %7344 = vmatprep.subr.bf16.mxu0 %v8206_v16  ;;  %7256 = vmatprep.subr.bf16.mxu1 %v7255_v1 }
 0x135   : > { %6513 = vmatmul.mubr.msk.f32.vlgmr.msra.gmra.mrb[2].mxu1 %vm607_vm0, %v5659_v51  ;;  %6614 = vmatmul.mubr.msk.f32.vlgmr.msra.gmra.mrb[18].mxu0 %vm607_vm0, %v5691_v52  ;;  %v5697_v51 = vld [vmem:[%s9718_s4 + $0x98] sm:$0xff] }
 0x136   : > { %7346 = vmatpush3.bf16.msra.mxu0 %v8206_v16  ;;  %6643 = vmatprep.mubr.msk.f32.mxu0 %vm607_vm0, %v5700_v53 }
 0x137   : > { %7348 = vmatprep.subr.bf16.mxu0 %v8212_v27  ;;  %7258 = vmatpush3.bf16.msra.mxu1 %v7255_v1  ;;  %v5717_v1 = vld [vmem:[%s9718_s4 + $0xd8] sm:$0xff] }
 0x138   : > { %7260 = vmatprep.subr.bf16.mxu1 %v7259_v3  ;;  %v7387_v2 = vpack.c.bf16 %v5717_v1, %v5716_v0  ;;  %v5785_v0 = vld [vmem:[%s9718_s4 + $0x1a8] sm:$0xff] }
 0x13a   : > { %7350 = vmatpush3.bf16.msra.mxu0 %v8212_v27 }
 0x13b   : > { %7352 = vmatprep.subr.bf16.mxu0 %v8218_v38  ;;  %7262 = vmatpush3.bf16.msra.mxu1 %v7259_v3  ;;  %v5720_v3 = vld [vmem:[%s9717_s3 + $0x70] sm:$0xff] }
 0x13c   : > { %7264 = vmatprep.subr.bf16.mxu1 %v7263_v8 }
 0x13e   : > { %7354 = vmatpush3.bf16.msra.mxu0 %v8218_v38 }
 0x13f   : > { %7356 = vmatprep.subr.bf16.mxu0 %v8224_v46 }
 0x142   : > { %7358 = vmatpush3.bf16.msra.mxu0 %v8224_v46 }
 0x143   : > { %7368 = vmatprep.subr.bf16.mxu0 %v8206_v16 }
 0x145   : > { %6644 = vmatmul.mubr.msk.f32.vlgmr.msra.gmra.mrb[20].mxu0 %vm607_vm0, %v5701_v54  ;;  %v7339_v54 = vpack.c.bf16 %v5697_v51, %v5696_v50  ;;  %v5774_v51 = vld [vmem:[%s9718_s4 + $0x180] sm:$0xff] }
 0x146   : > { %7370 = vmatpush3.bf16.msra.mxu0 %v8206_v16  ;;  %6673 = vmatprep.mubr.msk.f32.mxu0 %vm607_vm0, %v5710_v55  ;;  %v5704_v55 = vld [vmem:[%s9718_s4 + $0xa0] sm:$0xff] }
 0x147   : > { %7372 = vmatprep.subr.bf16.mxu0 %v8212_v27 }
 0x14a   : > { %7374 = vmatpush3.bf16.msra.mxu0 %v8212_v27 }
 0x14b   : > { %7376 = vmatprep.subr.bf16.mxu0 %v8218_v38 }
 0x14e   : > { %7378 = vmatpush3.bf16.msra.mxu0 %v8218_v38 }
 0x14f   : > { %7380 = vmatprep.subr.bf16.mxu0 %v8224_v46 }
 0x152   : > { %7382 = vmatpush3.bf16.msra.mxu0 %v8224_v46 }
 0x153   : > { %7416 = vmatprep.subr.bf16.mxu0 %v8206_v16 }
 0x155   : > { %6674 = vmatmul.mubr.msk.f32.vlgmr.msra.gmra.mrb[22].mxu0 %vm607_vm0, %v5711_v56  ;;  %v5705_v56 = vld [vmem:[%s9718_s4 + $0xa8] sm:$0xff] }
 0x156   : > { %7418 = vmatpush3.bf16.msra.mxu0 %v8206_v16  ;;  %6733 = vmatprep.mubr.msk.f32.mxu0 %vm607_vm0, %v5730_v57  ;;  %v7359_v57 = vpack.c.bf16 %v5705_v56, %v5704_v55 }
 0x157   : > { %7420 = vmatprep.subr.bf16.mxu0 %v8212_v27 }
 0x15a   : > { %7422 = vmatpush3.bf16.msra.mxu0 %v8212_v27 }
 0x15b   : > { %7424 = vmatprep.subr.bf16.mxu0 %v8218_v38 }
 0x15e   : > { %7426 = vmatpush3.bf16.msra.mxu0 %v8218_v38 }
 0x15f   : > { %7428 = vmatprep.subr.bf16.mxu0 %v8224_v46 }
 0x162   : > { %7430 = vmatpush3.bf16.msra.mxu0 %v8224_v46 }
 0x163   : > { %7440 = vmatprep.subr.bf16.mxu0 %v8206_v16 }
 0x165   : > { %6734 = vmatmul.mubr.msk.f32.vlgmr.msra.gmra.mrb[24].mxu0 %vm607_vm0, %v5731_v58  ;;  %v5706_v58 = vld [vmem:[%s9718_s4 + $0xb0] sm:$0xff] }
 0x166   : > { %7442 = vmatpush3.bf16.msra.mxu0 %v8206_v16  ;;  %6763 = vmatprep.mubr.msk.f32.mxu0 %vm607_vm0, %v5740_v59  ;;  %v5707_v59 = vld [vmem:[%s9718_s4 + $0xb8] sm:$0xff] }
 0x167   : > { %7444 = vmatprep.subr.bf16.mxu0 %v8212_v27 }
 0x16a   : > { %7446 = vmatpush3.bf16.msra.mxu0 %v8212_v27 }
 0x16b   : > { %7448 = vmatprep.subr.bf16.mxu0 %v8218_v38 }
 0x16e   : > { %7450 = vmatpush3.bf16.msra.mxu0 %v8218_v38 }
 0x16f   : > { %7452 = vmatprep.subr.bf16.mxu0 %v8224_v46 }
 0x172   : > { %7454 = vmatpush3.bf16.msra.mxu0 %v8224_v46 }
 0x173   : > { %7464 = vmatprep.subr.bf16.mxu0 %v8206_v16 }
 0x175   : > { %6764 = vmatmul.mubr.msk.f32.vlgmr.msra.gmra.mrb[26].mxu0 %vm607_vm0, %v5741_v60  ;;  %v7363_v60 = vpack.c.bf16 %v5707_v59, %v5706_v58  ;;  %v5776_v58 = vld [vmem:[%s9718_s4 + $0x190] sm:$0xff]  ;;  %v5777_v59 = vld [vmem:[%s9718_s4 + $0x198] sm:$0xff] }
 0x176   : > { %7466 = vmatpush3.bf16.msra.mxu0 %v8206_v16  ;;  %6793 = vmatprep.mubr.msk.f32.mxu0 %vm607_vm0, %v5750_v61  ;;  %v5714_v61 = vld [vmem:[%s9718_s4 + $0xc0] sm:$0xff] }
 0x177   : > { %7468 = vmatprep.subr.bf16.mxu0 %v8212_v27  ;;  %v7383_v63 = vpack.c.bf16 %v5715_v62, %v5714_v61  ;;  %v7531_v62 = vpack.c.bf16 %v5777_v59, %v5776_v58  ;;  %v5829_v58 = vld [vmem:[%s9721_s7 + $0x80] sm:$0xff]  ;;  %v5830_v59 = vld [vmem:[%s9721_s7 + $0x88] sm:$0xff] }
 0x17a   : > { %7470 = vmatpush3.bf16.msra.mxu0 %v8212_v27 }
 0x17b   : > { %7472 = vmatprep.subr.bf16.mxu0 %v8218_v38 }
 0x17e   : > { %7474 = vmatpush3.bf16.msra.mxu0 %v8218_v38 }
 0x17f   : > { %7476 = vmatprep.subr.bf16.mxu0 %v8224_v46 }
 0x182   : > { %7478 = vmatpush3.bf16.msra.mxu0 %v8224_v46 }
 0x183   : > { %7512 = vmatprep.subr.bf16.mxu0 %v8206_v16 }
 0x185   : > { %6794 = vmatmul.mubr.msk.f32.vlgmr.msra.gmra.mrb[28].mxu0 %vm607_vm0, %v5751_v4  ;;  %v5724_v4 = vld [vmem:[%s9718_s4 + $0xe0] sm:$0xff] }
 0x186   : > { %7514 = vmatpush3.bf16.msra.mxu0 %v8206_v16  ;;  %6853 = vmatprep.mubr.msk.f32.mxu0 %vm607_vm0, %v5770_v5  ;;  %v5725_v5 = vld [vmem:[%s9718_s4 + $0xe8] sm:$0xff] }
 0x187   : > { %7516 = vmatprep.subr.bf16.mxu0 %v8212_v27  ;;  %v7407_v6 = vpack.c.bf16 %v5725_v5, %v5724_v4  ;;  %v5794_v5 = vld [vmem:[%s9718_s4 + $0x1c0] sm:$0xff] }
 0x18a   : > { %7518 = vmatpush3.bf16.msra.mxu0 %v8212_v27 }
 0x18b   : > { %7520 = vmatprep.subr.bf16.mxu0 %v8218_v38 }
 0x18e   : > { %7522 = vmatpush3.bf16.msra.mxu0 %v8218_v38 }
 0x18f   : > { %7524 = vmatprep.subr.bf16.mxu0 %v8224_v46 }
 0x192   : > { %7526 = vmatpush3.bf16.msra.mxu0 %v8224_v46 }
 0x193   : > { %7536 = vmatprep.subr.bf16.mxu0 %v8206_v16 }
 0x195   : > { %6854 = vmatmul.mubr.msk.f32.vlgmr.msra.gmra.mrb[30].mxu0 %vm607_vm0, %v5771_v9  ;;  %v5721_v9 = vld [vmem:[%s9717_s3 + $0x78] sm:$0x1] }
 0x196   : > { %7538 = vmatpush3.bf16.msra.mxu0 %v8206_v16  ;;  %6883 = vmatprep.mubr.msk.f32.mxu0 %vm607_vm0, %v5780_v10 }
 0x197   : > { %7540 = vmatprep.subr.bf16.mxu0 %v8212_v27 }
 0x19a   : > { %7542 = vmatpush3.bf16.msra.mxu0 %v8212_v27 }
 0x19b   : > { %7544 = vmatprep.subr.bf16.mxu0 %v8218_v38 }
 0x19e   : > { %7546 = vmatpush3.bf16.msra.mxu0 %v8218_v38 }
 0x19f   : > { %7548 = vmatprep.subr.bf16.mxu0 %v8224_v46 }
 0x1a2   : > { %7550 = vmatpush3.bf16.msra.mxu0 %v8224_v46 }
 0x1a3   : > { %7560 = vmatprep.subr.bf16.mxu0 %v8206_v16 }
 0x1a5   : > { %6884 = vmatmul.mubr.msk.f32.vlgmr.msra.gmra.mrb[32].mxu0 %vm607_vm0, %v5781_v11  ;;  %v5734_v11 = vld [vmem:[%s9718_s4 + $0x100] sm:$0xff] }
 0x1a6   : > { %7562 = vmatpush3.bf16.msra.mxu0 %v8206_v16 }
 0x1a7   : > { %7564 = vmatprep.subr.bf16.mxu0 %v8212_v27 }
 0x1aa   : > { %7566 = vmatpush3.bf16.msra.mxu0 %v8212_v27 }
 0x1ab   : > { %7568 = vmatprep.subr.bf16.mxu0 %v8218_v38 }
 0x1ae   : > { %7570 = vmatpush3.bf16.msra.mxu0 %v8218_v38 }
 0x1af   : > { %7572 = vmatprep.subr.bf16.mxu0 %v8224_v46 }
 0x1b2   : > { %7574 = vmatpush3.bf16.msra.mxu0 %v8224_v46 }
 0x1f8   : > { %v6495_v12 = vpop.f32.mrb[0].mxu1  ;;  %v6555_v13 = vpop.f32.mrb[16].mxu0 }
 0x1f9   : > { %v680_v14 = vpop.f32.mrb[1].mxu1  ;;  %v1020_v15 = vpop.f32.mrb[17].mxu0 }
 0x208   : > { %v6514_v19 = vpop.f32.mrb[2].mxu1  ;;  %v8414_v20 = vpop.f32.mrb[18].mxu0 }
 0x209   : > { %v768_v21 = vpop.f32.mrb[3].mxu1  ;;  %v1364_v23 = vpop.f32.mrb[19].mxu0 }
 0x20a   : > { %6523 = vmatprep.mubr.msk.f32.mxu1 %vm782_vm1, %v768_v21 }
 0x20b   : > { %6524 = vmatmul.mubr.msk.f32.vlgmr.msra.gmra.mrb[4].mxu1 %vm782_vm1, %v6514_v19  ;;  %v5790_v19 = vld [vmem:[%s9717_s3 + $0xe0] sm:$0xff] }
 0x20c   : > { %7266 = vmatpush3.bf16.msra.mxu1 %v7263_v8  ;;  %6534 = vmatprep.mubr.msk.f32.mxu1 %vm782_vm1, %v680_v14  ;;  %v5727_v8 = vld [vmem:[%s9718_s4 + $0xf8] sm:$0xff] }
 0x20d   : > { %7268 = vmatprep.subr.bf16.mxu1 %v7267_v22  ;;  %v7411_v10 = vpack.c.bf16 %v5727_v8, %v5726_v7  ;;  %6913 = vmatprep.mubr.msk.f32.mxu0 %vm607_vm0, %v5790_v19  ;;  %v5796_v8 = vld [vmem:[%s9718_s4 + $0x1d0] sm:$0xff]  ;;  %v7993_v19 = vmov 0.0|0.0  }
 0x20e   : > { %7611 = vmatprep.subr.bf16.mxu0 %v7993_v19 }
 0x210   : > { %7270 = vmatpush3.bf16.msra.mxu1 %v7267_v22 }
 0x211   : > { %7288 = vmatprep.subr.bf16.mxu1 %v7287_v26 }
 0x213   : > { %6535 = vmatmul.mubr.msk.f32.vlgmr.msra.gmra.mrb[4].mxu1 %vm782_vm1, %v6495_v12  ;;  %v5735_v12 = vld [vmem:[%s9718_s4 + $0x108] sm:$0xff] }
 0x214   : > { %7290 = vmatpush3.bf16.msra.mxu1 %v7287_v26  ;;  %6564 = vmatprep.mubr.msk.f32.mxu1 %vm782_vm1, %v1020_v15 }
 0x215   : > { %7292 = vmatprep.subr.bf16.mxu1 %v7291_v30 }
 0x218   : > { %7294 = vmatpush3.bf16.msra.mxu1 %v7291_v30  ;;  %v6645_v43 = vpop.f32.mrb[20].mxu0  ;;  %v5745_v30 = vld [vmem:[%s9718_s4 + $0x128] sm:$0xff] }
 0x219   : > { %7296 = vmatprep.subr.bf16.mxu1 %v8206_v16  ;;  %v1536_v44 = vpop.f32.mrb[21].mxu0 }
 0x21b   : > { %6565 = vmatmul.mubr.msk.f32.vlgmr.msra.gmra.mrb[4].mxu1 %vm782_vm1, %v6555_v13  ;;  %v7431_v13 = vpack.c.bf16 %v5735_v12, %v5734_v11  ;;  %v5800_v11 = vld [vmem:[%s9717_s3 + $0xf0] sm:$0xff]  ;;  %v5804_v12 = vld [vmem:[%s9718_s4 + $0x1e0] sm:$0xff] }
 0x21c   : > { %7298 = vmatpush3.bf16.msra.mxu1 %v8206_v16  ;;  %6583 = vmatprep.mubr.msk.f32.mxu1 %vm607_vm0, %v5680_v31  ;;  %v7455_v31 = vpack.c.bf16 %v5745_v30, %v5744_v29  ;;  %v5816_v29 = vld [vmem:[%s9721_s7 + $0x40] sm:$0xff]  ;;  %v5817_v30 = vld [vmem:[%s9721_s7 + $0x48] sm:$0xff] }
 0x21d   : > { %7300 = vmatprep.subr.bf16.mxu1 %v8212_v27 }
 0x220   : > { %7302 = vmatpush3.bf16.msra.mxu1 %v8212_v27 }
 0x221   : > { %7304 = vmatprep.subr.bf16.mxu1 %v8218_v38 }
 0x224   : > { %7306 = vmatpush3.bf16.msra.mxu1 %v8218_v38 }
 0x225   : > { %7308 = vmatprep.subr.bf16.mxu1 %v8224_v46 }
 0x228   : > { %7310 = vmatpush3.bf16.msra.mxu1 %v8224_v46  ;;  %v6675_v45 = vpop.f32.mrb[22].mxu0 }
 0x229   : > { %7312 = vmatprep.subr.bf16.mxu1 %v7311_v34  ;;  %v1708_v47 = vpop.f32.mrb[23].mxu0 }
 0x22b   : > { %6584 = vmatmul.mubr.msk.f32.vlgmr.msra.gmra.mrb[6].mxu1 %vm607_vm0, %v5681_v37  ;;  %v7479_v37 = vpack.c.bf16 %v5755_v36, %v5754_v35  ;;  %v5813_v35 = vld [vmem:[%s9720_s6 + $0x1] sm:$0x1]  ;;  %v7616_v36 = vpack.c.bf16 %v5817_v30, %v5816_v29 }
 0x22c   : > { %7314 = vmatpush3.bf16.msra.mxu1 %v7311_v34  ;;  %v7459_v34 = vpack.c.bf16 %v5747_v33, %v5746_v32  ;;  %v3444_v32 = vld [vmem:[%s9721_s7 + $0x8] sm:$0xff]  ;;  %v5853_v30 = vld [vmem:[%s9721_s7 + $0x100] sm:$0xff] }
 0x22d   : > { %7316 = vmatprep.subr.bf16.mxu1 %v7315_v39 }
 0x230   : > { %7318 = vmatpush3.bf16.msra.mxu1 %v7315_v39  ;;  %v5756_v39 = vld [vmem:[%s9718_s4 + $0x150] sm:$0xff] }
 0x231   : > { %7336 = vmatprep.subr.bf16.mxu1 %v7335_v42  ;;  %v7483_v41 = vpack.c.bf16 %v5757_v40, %v5756_v39  ;;  %v5818_v39 = vld [vmem:[%s9721_s7 + $0x50] sm:$0xff]  ;;  %v5819_v40 = vld [vmem:[%s9721_s7 + $0x58] sm:$0xff] }
 0x238   : > { %v8468_v48 = vpop.f32.mrb[24].mxu0 }
 0x239   : > { %v8470_v49 = vpop.f32.mrb[25].mxu0 }
 0x248   : > { %v6765_v14 = vpop.f32.mrb[26].mxu0 }
 0x249   : > { %v2224_v15 = vpop.f32.mrb[27].mxu0 }
 0x258   : > { %v6795_v17 = vpop.f32.mrb[28].mxu0 }
 0x259   : > { %v2396_v18 = vpop.f32.mrb[29].mxu0 }
 0x268   : > { %v8551_v21 = vpop.f32.mrb[30].mxu0 }
 0x269   : > { %v8554_v22 = vpop.f32.mrb[31].mxu0 }
 0x2fe   : > { %v6585_v52 = vpop.f32.mrb[6].mxu1 }
 0x2ff   : > { %v1192_v53 = vpop.f32.mrb[7].mxu1 }
 0x300   : > { %6594 = vmatprep.mubr.msk.f32.mxu1 %vm782_vm1, %v1192_v53 }
 0x301   : > { %6595 = vmatmul.mubr.msk.f32.vlgmr.msra.gmra.mrb[4].mxu1 %vm782_vm1, %v6585_v52  ;;  %v5775_v52 = vld [vmem:[%s9718_s4 + $0x188] sm:$0xff] }
 0x302   : > { %7338 = vmatpush3.bf16.msra.mxu1 %v7335_v42  ;;  %6624 = vmatprep.mubr.msk.f32.mxu1 %vm782_vm1, %v1364_v23  ;;  %v5736_v23 = vld [vmem:[%s9718_s4 + $0x110] sm:$0xff]  ;;  %v7527_v53 = vpack.c.bf16 %v5775_v52, %v5774_v51 }
 0x303   : > { %7340 = vmatprep.subr.bf16.mxu1 %v7339_v54  ;;  %v7435_v28 = vpack.c.bf16 %v5737_v24, %v5736_v23  ;;  %v5760_v42 = vld [vmem:[%s9717_s3 + $0xb0] sm:$0xff] }
 0x304   : > { %v5822_v52 = vld [vmem:[%s9721_s7 + $0x70] sm:$0xff] }
 0x306   : > { %7342 = vmatpush3.bf16.msra.mxu1 %v7339_v54  ;;  %v6885_v54 = vpop.f32.mrb[32].mxu0 }
 0x307   : > { %7360 = vmatprep.subr.bf16.mxu1 %v7359_v57  ;;  %v2912_v55 = vpop.f32.mrb[33].mxu0 }
 0x309   : > { %6625 = vmatmul.mubr.msk.f32.vlgmr.msra.gmra.mrb[4].mxu1 %vm782_vm1, %v8414_v20  ;;  %v5791_v20 = vld [vmem:[%s9717_s3 + $0xe8] sm:$0x1] }
 0x30a   : > { %7362 = vmatpush3.bf16.msra.mxu1 %v7359_v57  ;;  %6654 = vmatprep.mubr.msk.f32.mxu1 %vm782_vm1, %v1536_v44  ;;  %v5765_v44 = vld [vmem:[%s9718_s4 + $0x168] sm:$0xff] }
 0x30b   : > { %7364 = vmatprep.subr.bf16.mxu1 %v7363_v60  ;;  %6914 = vmatmul.mubr.msk.f32.vlgmr.msra.gmra.mrb[34].mxu0 %vm607_vm0, %v5791_v20  ;;  %v5810_v20 = vld [vmem:[%s9719_s5] ss:$0 sm:$0xff] }
 0x30e   : > { %7366 = vmatpush3.bf16.msra.mxu1 %v7363_v60 }
 0x30f   : > { %7384 = vmatprep.subr.bf16.mxu1 %v7383_v63 }
 0x311   : > { %6655 = vmatmul.mubr.msk.f32.vlgmr.msra.gmra.mrb[4].mxu1 %vm782_vm1, %v6645_v43  ;;  %v5764_v43 = vld [vmem:[%s9718_s4 + $0x160] sm:$0xff] }
 0x312   : > { %7386 = vmatpush3.bf16.msra.mxu1 %v7383_v63  ;;  %6684 = vmatprep.mubr.msk.f32.mxu1 %vm782_vm1, %v1708_v47  ;;  %v5766_v47 = vld [vmem:[%s9718_s4 + $0x170] sm:$0xff]  ;;  %v5784_v63 = vld [vmem:[%s9718_s4 + $0x1a0] sm:$0xff] }
 0x313   : > { %7388 = vmatprep.subr.bf16.mxu1 %v7387_v2  ;;  %v7551_v1 = vpack.c.bf16 %v5785_v0, %v5784_v63 }
 0x316   : > { %7390 = vmatpush3.bf16.msra.mxu1 %v7387_v2  ;;  %v5786_v2 = vld [vmem:[%s9718_s4 + $0x1b0] sm:$0xff] }
 0x317   : > { %7392 = vmatprep.subr.bf16.mxu1 %v8206_v16 }
 0x319   : > { %6685 = vmatmul.mubr.msk.f32.vlgmr.msra.gmra.mrb[4].mxu1 %vm782_vm1, %v6675_v45  ;;  %v7503_v45 = vpack.c.bf16 %v5765_v44, %v5764_v43  ;;  %v7619_v43 = vpack.c.bf16 %v5819_v40, %v5818_v39  ;;  %v5850_v40 = vld [vmem:[%s9720_s6 + $0x4] sm:$0x1] }
 0x31a   : > { %7394 = vmatpush3.bf16.msra.mxu1 %v8206_v16  ;;  %6703 = vmatprep.mubr.msk.f32.mxu1 %vm607_vm0, %v5720_v3  ;;  %v5787_v3 = vld [vmem:[%s9718_s4 + $0x1b8] sm:$0xff] }
 0x31b   : > { %7396 = vmatprep.subr.bf16.mxu1 %v8212_v27  ;;  %v7555_v4 = vpack.c.bf16 %v5787_v3, %v5786_v2  ;;  %v5826_v2 = vld [vmem:[%s9720_s6 + $0x2] sm:$0x1]  ;;  %v5838_v3 = vld [vmem:[%s9720_s6 + $0x3] sm:$0x1] }
 0x31e   : > { %7398 = vmatpush3.bf16.msra.mxu1 %v8212_v27 }
 0x31f   : > { %7400 = vmatprep.subr.bf16.mxu1 %v8218_v38 }
 0x322   : > { %7402 = vmatpush3.bf16.msra.mxu1 %v8218_v38 }
 0x323   : > { %7404 = vmatprep.subr.bf16.mxu1 %v8224_v46 }
 0x326   : > { %7406 = vmatpush3.bf16.msra.mxu1 %v8224_v46 }
 0x327   : > { %7408 = vmatprep.subr.bf16.mxu1 %v7407_v6 }
 0x329   : > { %6704 = vmatmul.mubr.msk.f32.vlgmr.msra.gmra.mrb[8].mxu1 %vm607_vm0, %v5721_v9  ;;  %v5797_v9 = vld [vmem:[%s9718_s4 + $0x1d8] sm:$0xff] }
 0x32a   : > { %7410 = vmatpush3.bf16.msra.mxu1 %v7407_v6  ;;  %v5795_v6 = vld [vmem:[%s9718_s4 + $0x1c8] sm:$0xff] }
 0x32b   : > { %7412 = vmatprep.subr.bf16.mxu1 %v7411_v10  ;;  %v7575_v7 = vpack.c.bf16 %v5795_v6, %v5794_v5  ;;  %v5831_v6 = vld [vmem:[%s9721_s7 + $0x90] sm:$0xff] }
 0x32e   : > { %7414 = vmatpush3.bf16.msra.mxu1 %v7411_v10  ;;  %v7579_v10 = vpack.c.bf16 %v5797_v9, %v5796_v8  ;;  %v5843_v8 = vld [vmem:[%s9721_s7 + $0xd0] sm:$0xff]  ;;  %v5844_v9 = vld [vmem:[%s9721_s7 + $0xd8] sm:$0xff] }
 0x32f   : > { %7432 = vmatprep.subr.bf16.mxu1 %v7431_v13 }
 0x3de   : > { %v6915_v56 = vpop.f32.mrb[34].mxu0 }
 0x3df   : > { %v3084_v57 = vpop.f32.mrb[35].mxu0 }
 0x3fc   : > { %v6705_v25 = vpop.f32.mrb[8].mxu1 }
 0x3fd   : > { %v1880_v26 = vpop.f32.mrb[9].mxu1 }
 0x3fe   : > { %6714 = vmatprep.mubr.msk.f32.mxu1 %vm782_vm1, %v1880_v26 }
 0x3ff   : > { %6715 = vmatmul.mubr.msk.f32.vlgmr.msra.gmra.mrb[4].mxu1 %vm782_vm1, %v6705_v25 }
 0x400   : > { %7434 = vmatpush3.bf16.msra.mxu1 %v7431_v13  ;;  %6744 = vmatprep.mubr.msk.f32.mxu1 %vm782_vm1, %v8470_v49  ;;  %v5761_v49 = vld [vmem:[%s9717_s3 + $0xb8] sm:$0x1]  ;;  %v5805_v13 = vld [vmem:[%s9718_s4 + $0x1e8] sm:$0xff] }
 0x401   : > { %7436 = vmatprep.subr.bf16.mxu1 %v7435_v28 }
 0x404   : > { %7438 = vmatpush3.bf16.msra.mxu1 %v7435_v28 }
 0x405   : > { %7456 = vmatprep.subr.bf16.mxu1 %v7455_v31 }
 0x407   : > { %6745 = vmatmul.mubr.msk.f32.vlgmr.msra.gmra.mrb[4].mxu1 %vm782_vm1, %v8468_v48  ;;  %v5767_v48 = vld [vmem:[%s9718_s4 + $0x178] sm:$0xff] }
 0x408   : > { %7458 = vmatpush3.bf16.msra.mxu1 %v7455_v31  ;;  %6774 = vmatprep.mubr.msk.f32.mxu1 %vm782_vm1, %v2224_v15  ;;  %v7507_v50 = vpack.c.bf16 %v5767_v48, %v5766_v47  ;;  %v5801_v15 = vld [vmem:[%s9717_s3 + $0xf8] sm:$0x1]  ;;  %v3443_v31 = vld [vmem:[%s9721_s7] sm:$0xff]  ;;  %v5821_v47 = vld [vmem:[%s9721_s7 + $0x68] sm:$0xff] }
 0x409   : > { %7460 = vmatprep.subr.bf16.mxu1 %v7459_v34  ;;  %v3447_v48 = vld [vmem:[%s9721_s7 + $0x20] sm:$0xff] }
 0x40c   : > { %7462 = vmatpush3.bf16.msra.mxu1 %v7459_v34  ;;  %v3364_v34 = vld [vmem:[%s9720_s6] sm:$0x1] }
 0x40d   : > { %7480 = vmatprep.subr.bf16.mxu1 %v7479_v37 }
 0x40f   : > { %6775 = vmatmul.mubr.msk.f32.vlgmr.msra.gmra.mrb[4].mxu1 %vm782_vm1, %v6765_v14  ;;  %v5806_v14 = vld [vmem:[%s9718_s4 + $0x1f0] sm:$0xff] }
 0x410   : > { %7482 = vmatpush3.bf16.msra.mxu1 %v7479_v37  ;;  %6804 = vmatprep.mubr.msk.f32.mxu1 %vm782_vm1, %v2396_v18  ;;  %v7628_v37 = vpack.c.bf16 %v3444_v32, %v3443_v31  ;;  %v5854_v31 = vld [vmem:[%s9721_s7 + $0x108] sm:$0xff]  ;;  %v5865_v32 = vld [vmem:[%s9721_s7 + $0x140] sm:$0xff] }
 0x411   : > { %7484 = vmatprep.subr.bf16.mxu1 %v7483_v41 }
 0x414   : > { %7486 = vmatpush3.bf16.msra.mxu1 %v7483_v41  ;;  %v3445_v41 = vld [vmem:[%s9721_s7 + $0x10] sm:$0xff] }
 0x415   : > { %7488 = vmatprep.subr.bf16.mxu1 %v8206_v16 }
 0x417   : > { %6805 = vmatmul.mubr.msk.f32.vlgmr.msra.gmra.mrb[4].mxu1 %vm782_vm1, %v6795_v17 }
 0x418   : > { %7490 = vmatpush3.bf16.msra.mxu1 %v8206_v16  ;;  %6823 = vmatprep.mubr.msk.f32.mxu1 %vm607_vm0, %v5760_v42  ;;  %v3446_v42 = vld [vmem:[%s9721_s7 + $0x18] sm:$0xff] }
 0x419   : > { %7492 = vmatprep.subr.bf16.mxu1 %v8212_v27  ;;  %v7631_v44 = vpack.c.bf16 %v3446_v42, %v3445_v41  ;;  %v5862_v41 = vld [vmem:[%s9720_s6 + $0x5] sm:$0x1]  ;;  %v7676_v42 = vpack.c.bf16 %v5854_v31, %v5853_v30  ;;  %v5883_v30 = vld [vmem:[%s9721_s7 + $0x1b0] sm:$0xff]  ;;  %v5884_v31 = vld [vmem:[%s9721_s7 + $0x1b8] sm:$0xff] }
 0x41c   : > { %7494 = vmatpush3.bf16.msra.mxu1 %v8212_v27 }
 0x41d   : > { %7496 = vmatprep.subr.bf16.mxu1 %v8218_v38 }
 0x420   : > { %7498 = vmatpush3.bf16.msra.mxu1 %v8218_v38 }
 0x421   : > { %7500 = vmatprep.subr.bf16.mxu1 %v8224_v46 }
 0x424   : > { %7502 = vmatpush3.bf16.msra.mxu1 %v8224_v46 }
 0x425   : > { %7504 = vmatprep.subr.bf16.mxu1 %v7503_v45 }
 0x427   : > { %6824 = vmatmul.mubr.msk.f32.vlgmr.msra.gmra.mrb[10].mxu1 %vm607_vm0, %v5761_v49  ;;  %v3448_v49 = vld [vmem:[%s9721_s7 + $0x28] sm:$0xff] }
 0x428   : > { %7506 = vmatpush3.bf16.msra.mxu1 %v7503_v45  ;;  %v5820_v45 = vld [vmem:[%s9721_s7 + $0x60] sm:$0xff]  ;;  %v7634_v51 = vpack.c.bf16 %v3448_v49, %v3447_v48  ;;  %v5868_v48 = vld [vmem:[%s9721_s7 + $0x158] sm:$0xff] }
 0x429   : > { %7508 = vmatprep.subr.bf16.mxu1 %v7507_v50 }
 0x42c   : > { %7510 = vmatpush3.bf16.msra.mxu1 %v7507_v50  ;;  %v7622_v50 = vpack.c.bf16 %v5821_v47, %v5820_v45  ;;  %v5856_v45 = vld [vmem:[%s9721_s7 + $0x118] sm:$0xff]  ;;  %v5867_v47 = vld [vmem:[%s9721_s7 + $0x150] sm:$0xff] }
 0x42d   : > { %7528 = vmatprep.subr.bf16.mxu1 %v7527_v53 }
 0x4fa   : > { %v6825_v60 = vpop.f32.mrb[10].mxu1 }
 0x4fb   : > { %v2568_v61 = vpop.f32.mrb[11].mxu1 }
 0x4fc   : > { %6834 = vmatprep.mubr.msk.f32.mxu1 %vm782_vm1, %v2568_v61  ;;  %v5842_v61 = vld [vmem:[%s9721_s7 + $0xc8] sm:$0xff] }
 0x4fd   : > { %6835 = vmatmul.mubr.msk.f32.vlgmr.msra.gmra.mrb[4].mxu1 %vm782_vm1, %v6825_v60  ;;  %v5841_v60 = vld [vmem:[%s9721_s7 + $0xc0] sm:$0xff] }
 0x4fe   : > { %7530 = vmatpush3.bf16.msra.mxu1 %v7527_v53  ;;  %6864 = vmatprep.mubr.msk.f32.mxu1 %vm782_vm1, %v8554_v22  ;;  %v5823_v53 = vld [vmem:[%s9721_s7 + $0x78] sm:$0xff]  ;;  %v7660_v5 = vpack.c.bf16 %v5842_v61, %v5841_v60 }
 0x4ff   : > { %7532 = vmatprep.subr.bf16.mxu1 %v7531_v62  ;;  %v5872_v61 = vld [vmem:[%s9721_s7 + $0x178] sm:$0xff] }
 0x502   : > { %7534 = vmatpush3.bf16.msra.mxu1 %v7531_v62 }
 0x503   : > { %7552 = vmatprep.subr.bf16.mxu1 %v7551_v1 }
 0x505   : > { %6865 = vmatmul.mubr.msk.f32.vlgmr.msra.gmra.mrb[4].mxu1 %vm782_vm1, %v8551_v21 }
 0x506   : > { %7554 = vmatpush3.bf16.msra.mxu1 %v7551_v1  ;;  %6894 = vmatprep.mubr.msk.f32.mxu1 %vm782_vm1, %v2912_v55  ;;  %v3450_v55 = vld [vmem:[%s9721_s7 + $0x38] sm:$0xff] }
 0x507   : > { %7556 = vmatprep.subr.bf16.mxu1 %v7555_v4 }
 0x50a   : > { %7558 = vmatpush3.bf16.msra.mxu1 %v7555_v4  ;;  %v7644_v4 = vpack.c.bf16 %v5830_v59, %v5829_v58  ;;  %v5860_v58 = vld [vmem:[%s9721_s7 + $0x138] sm:$0xff]  ;;  %v5871_v59 = vld [vmem:[%s9721_s7 + $0x170] sm:$0xff] }
 0x50b   : > { %7576 = vmatprep.subr.bf16.mxu1 %v7575_v7 }
 0x50d   : > { %6895 = vmatmul.mubr.msk.f32.vlgmr.msra.gmra.mrb[4].mxu1 %vm782_vm1, %v6885_v54  ;;  %v3449_v54 = vld [vmem:[%s9721_s7 + $0x30] sm:$0xff] }
 0x50e   : > { %7578 = vmatpush3.bf16.msra.mxu1 %v7575_v7  ;;  %6924 = vmatprep.mubr.msk.f32.mxu1 %vm782_vm1, %v3084_v57  ;;  %v7637_v57 = vpack.c.bf16 %v3450_v55, %v3449_v54  ;;  %v5832_v7 = vld [vmem:[%s9721_s7 + $0x98] sm:$0xff]  ;;  %v5870_v54 = vld [vmem:[%s9721_s7 + $0x168] sm:$0xff] }
 0x50f   : > { %7580 = vmatprep.subr.bf16.mxu1 %v7579_v10 }
 0x512   : > { %7582 = vmatpush3.bf16.msra.mxu1 %v7579_v10  ;;  %v7647_v10 = vpack.c.bf16 %v5832_v7, %v5831_v6  ;;  %v5878_v6 = vld [vmem:[%s9721_s7 + $0x188] sm:$0xff]  ;;  %v5889_v7 = vld [vmem:[%s9721_s7 + $0x1c0] sm:$0xff] }
 0x513   : > { %7584 = vmatprep.subr.bf16.mxu1 %v8206_v16 }
 0x515   : > { %6925 = vmatmul.mubr.msk.f32.vlgmr.msra.gmra.mrb[4].mxu1 %vm782_vm1, %v6915_v56  ;;  %v7625_v56 = vpack.c.bf16 %v5823_v53, %v5822_v52  ;;  %v5858_v52 = vld [vmem:[%s9721_s7 + $0x128] sm:$0xff]  ;;  %v5869_v53 = vld [vmem:[%s9721_s7 + $0x160] sm:$0xff] }
 0x516   : > { %7586 = vmatpush3.bf16.msra.mxu1 %v8206_v16  ;;  %6943 = vmatprep.mubr.msk.f32.mxu1 %vm607_vm0, %v5800_v11  ;;  %v7599_v16 = vpack.c.bf16 %v5805_v13, %v5804_v12  ;;  %v7663_v11 = vpack.c.bf16 %v5844_v9, %v5843_v8  ;;  %v5833_v12 = vld [vmem:[%s9721_s7 + $0xa0] sm:$0xff]  ;;  %v5834_v13 = vld [vmem:[%s9721_s7 + $0xa8] sm:$0xff] }
 0x517   : > { %7588 = vmatprep.subr.bf16.mxu1 %v8212_v27  ;;  %v5890_v8 = vld [vmem:[%s9721_s7 + $0x1c8] sm:$0xff] }
 0x51a   : > { %7590 = vmatpush3.bf16.msra.mxu1 %v8212_v27  ;;  %v5807_v27 = vld [vmem:[%s9718_s4 + $0x1f8] sm:$0xff] }
 0x51b   : > { %7592 = vmatprep.subr.bf16.mxu1 %v8218_v38  ;;  %v7603_v17 = vpack.c.bf16 %v5807_v27, %v5806_v14  ;;  %v5846_v14 = vld [vmem:[%s9721_s7 + $0xe8] sm:$0xff]  ;;  %v7650_v27 = vpack.c.bf16 %v5834_v13, %v5833_v12  ;;  %v5874_v13 = vld [vmem:[%s9720_s6 + $0x6] sm:$0x1] }
 0x51e   : > { %7594 = vmatpush3.bf16.msra.mxu1 %v8218_v38 }
 0x51f   : > { %7596 = vmatprep.subr.bf16.mxu1 %v8224_v46 }
 0x522   : > { %7598 = vmatpush3.bf16.msra.mxu1 %v8224_v46  ;;  %v7995_v46 = vmov 0.0  }
 0x523   : > { %7600 = vmatprep.subr.bf16.mxu1 %v7599_v16  ;;  %6968 = vmatprep.mubr.msk.f32.mxu0 %vm7994_vm2, %v7995_v46 }
 0x525   : > { %6944 = vmatmul.mubr.msk.f32.vlgmr.msra.gmra.mrb[12].mxu1 %vm607_vm0, %v5801_v15 }
 0x526   : > { %7602 = vmatpush3.bf16.msra.mxu1 %v7599_v16  ;;  %v5845_v16 = vld [vmem:[%s9721_s7 + $0xe0] sm:$0xff] }
 0x527   : > { %7604 = vmatprep.subr.bf16.mxu1 %v7603_v17  ;;  %v7666_v15 = vpack.c.bf16 %v5846_v14, %v5845_v16  ;;  %v5886_v16 = vld [vmem:[%s9720_s6 + $0x7] sm:$0x1] }
 0x52a   : > { %7606 = vmatpush3.bf16.msra.mxu1 %v7603_v17  ;;  %v5835_v17 = vld [vmem:[%s9721_s7 + $0xb0] sm:$0xff] }
 0x52b   : > { %7607 = vmatprep.subr.bf16.mxu1 %v7993_v19 }
 0x5f8   : > { %v6945_v38 = vpop.f32.mrb[12].mxu1 }
 0x5f9   : > { %v3256_v18 = vpop.f32.mrb[13].mxu1 }
 0x5fa   : > { %6954 = vmatprep.mubr.msk.f32.mxu1 %vm782_vm1, %v3256_v18  ;;  %v5847_v18 = vld [vmem:[%s9721_s7 + $0xf0] sm:$0xff] }
 0x5fb   : > { %6955 = vmatmul.mubr.msk.f32.vlgmr.msra.gmra.mrb[4].mxu1 %vm782_vm1, %v6945_v38  ;;  %v5836_v38 = vld [vmem:[%s9721_s7 + $0xb8] sm:$0xff] }
 0x5fc   : > { %6961 = vmatprep.mubr.msk.f32.mxu1 %vm7994_vm2, %v7995_v46 }
 0x6ce   : > { %v6956_v21 = vpop.f32.mrb[4].mxu1 }
 0x6cf   : > { %v3361_v22 = vadd.f32 %v6956_v21, %v5810_v20  ;;  %v3342_v23 = vpop.f32.mrb[5].mxu1  ;;  %v5848_v21 = vld [vmem:[%s9721_s7 + $0xf8] sm:$0xff] }
 0x6d0   : > { %v3360_v24 = vadd.f32 %v5810_v20, %v3342_v23  ;;  %v7653_v20 = vpack.c.bf16 %v5836_v38, %v5835_v17  ;;  %v5880_v17 = vld [vmem:[%s9721_s7 + $0x198] sm:$0xff]  ;;  %v5891_v38 = vld [vmem:[%s9721_s7 + $0x1d0] sm:$0xff] }
 0x6d1   : > { %v3363_v25 = vmax.f32 %v3361_v22, 0.0  ;;  %v7669_v22 = vpack.c.bf16 %v5848_v21, %v5847_v18  ;;  %v5892_v18 = vld [vmem:[%s9721_s7 + $0x1d8] sm:$0xff] }
 0x6d2   : > { %v3362_v26 = vmax.f32 %v3360_v24, 0.0  ;;  %v7727_v21 = vpack.c.bf16 %v5892_v18, %v5891_v38  ;;  %v4809_v18 = vld [vmem:[%s9723_s9 + $0x98] sm:$0xff] }
 0x6d4   : > { %v8726_v33 = vpack.c.bf16 %v3363_v25, %v3362_v26 }
 0x6d6   : > { %7610 = vmatpush3.bf16.msk.msra.mxu1 %vm8710_vm5, %v8726_v33  ;;  %7614 = vmatpush3.bf16.msk.msra.mxu0 %vm8710_vm5, %v8726_v33 }
 0x6d7   : > { %7615 = vmatprep.subr.bf16.mxu0 %v7993_v19  ;;  %7627 = vmatprep.subr.bf16.mxu1 %v7993_v19 }
 0x6d9   : > { %6962 = vmatmul.mubr.msk.f32.vlgmr.msra.gmra.mrb[14].mxu1 %vm3365_vm6, %v3364_v34  ;;  %6969 = vmatmul.mubr.msk.f32.vlgmr.msra.gmra.mrb[36].mxu0 %vm3365_vm6, %v5813_v35  ;;  %v5866_v34 = vld [vmem:[%s9721_s7 + $0x148] sm:$0xff] }
 0x6da   : > { %7617 = vmatpush3.bf16.msra.mxu0 %v7616_v36  ;;  %7629 = vmatpush3.bf16.msra.mxu1 %v7628_v37 }
 0x6db   : > { %7618 = vmatprep.subr.bf16.mxu0 %v7993_v19  ;;  %7630 = vmatprep.subr.bf16.mxu1 %v7993_v19 }
 0x6dc   : > { %6987 = vmatprep.mubr.msk.f32.mxu0 %vm7994_vm2, %v7995_v46  ;;  %7006 = vmatprep.mubr.msk.f32.mxu1 %vm7994_vm2, %v7995_v46 }
 0x6de   : > { %7620 = vmatpush3.bf16.msra.mxu0 %v7619_v43  ;;  %7632 = vmatpush3.bf16.msra.mxu1 %v7631_v44  ;;  %v7692_v43 = vpack.c.bf16 %v5866_v34, %v5865_v32  ;;  %v5855_v44 = vld [vmem:[%s9721_s7 + $0x110] sm:$0xff]  ;;  %v7717_v32 = vpack.c.bf16 %v5884_v31, %v5883_v30 }
 0x6df   : > { %7621 = vmatprep.subr.bf16.mxu0 %v7993_v19  ;;  %7633 = vmatprep.subr.bf16.mxu1 %v7993_v19  ;;  %v7679_v49 = vpack.c.bf16 %v5856_v45, %v5855_v44  ;;  %v5895_v34 = vld [vmem:[%s9721_s7 + $0x1f0] sm:$0xff]  ;;  %v5901_v44 = vld [vmem:[%s9721_s7 + $0x200] sm:$0xff]  ;;  %v5902_v45 = vld [vmem:[%s9721_s7 + $0x208] sm:$0xff] }
 0x6e0   : > { %v4816_v30 = vld [vmem:[%s9723_s9 + $0xd0] sm:$0xff] }
 0x6e2   : > { %7623 = vmatpush3.bf16.msra.mxu0 %v7622_v50  ;;  %7635 = vmatpush3.bf16.msra.mxu1 %v7634_v51  ;;  %v7695_v50 = vpack.c.bf16 %v5868_v48, %v5867_v47  ;;  %v5857_v51 = vld [vmem:[%s9721_s7 + $0x120] sm:$0xff] }
 0x6e3   : > { %7624 = vmatprep.subr.bf16.mxu0 %v7993_v19  ;;  %7636 = vmatprep.subr.bf16.mxu1 %v7993_v19  ;;  %v7682_v55 = vpack.c.bf16 %v5858_v52, %v5857_v51  ;;  %v5898_v51 = vld [vmem:[%s9720_s6 + $0x8] sm:$0x1]  ;;  %v7740_v52 = vpack.c.bf16 %v5902_v45, %v5901_v44  ;;  %v4841_v44 = vld [vmem:[%s9723_s9 + $0x198] sm:$0xff] }
 0x6e6   : > { %7626 = vmatpush3.bf16.msra.mxu0 %v7625_v56  ;;  %7638 = vmatpush3.bf16.msra.mxu1 %v7637_v57  ;;  %v7698_v56 = vpack.c.bf16 %v5870_v54, %v5869_v53  ;;  %v5859_v57 = vld [vmem:[%s9721_s7 + $0x130] sm:$0xff]  ;;  %v5904_v54 = vld [vmem:[%s9721_s7 + $0x218] sm:$0xff] }
 0x6e7   : > { %7639 = vmatprep.subr.bf16.mxu0 %v7993_v19  ;;  %7655 = vmatprep.subr.bf16.mxu1 %v7993_v19  ;;  %v7685_v60 = vpack.c.bf16 %v5860_v58, %v5859_v57  ;;  %v5903_v53 = vld [vmem:[%s9721_s7 + $0x210] sm:$0xff]  ;;  %v5908_v58 = vld [vmem:[%s9721_s7 + $0x238] sm:$0xff] }
 0x6e8   : > { %v7743_v28 = vpack.c.bf16 %v5904_v54, %v5903_v53  ;;  %v5907_v57 = vld [vmem:[%s9721_s7 + $0x230] sm:$0xff] }
 0x7ac   : > { %v3439_v62 = vpop.f32.mrb[14].mxu1  ;;  %v3522_v63 = vpop.f32.mrb[36].mxu0 }
 0x7ad   : > { %v6970_v0 = vpop.f32.mrb[37].mxu0  ;;  %6988 = vmatmul.mubr.msk.f32.vlgmr.msra.gmra.mrb[38].mxu0 %vm607_vm0, %v3522_v63  ;;  %7007 = vmatmul.mubr.msk.f32.vlgmr.msra.gmra.mrb[16].mxu1 %vm607_vm0, %v3439_v62  ;;  %v6963_v1 = vpop.f32.mrb[15].mxu1  ;;  %v7701_v62 = vpack.c.bf16 %v5872_v61, %v5871_v59  ;;  %v7749_v59 = vpack.c.bf16 %v5908_v58, %v5907_v57  ;;  %v4799_v61 = vld [vmem:[%s9723_s9 + $0x48] sm:$0xff]  ;;  %v4805_v57 = vld [vmem:[%s9723_s9 + $0x78] sm:$0xff] }
 0x7ae   : > { %7642 = vmatpush3.bf16.msk.msra.mxu0 %vm8710_vm5, %v8726_v33  ;;  %7658 = vmatpush3.bf16.msk.msra.mxu1 %vm8710_vm5, %v8726_v33 }
 0x7af   : > { %7013 = vmatprep.mubr.msk.f32.mxu0 %vm7994_vm2, %v7995_v46  ;;  %7039 = vmatprep.mubr.msk.f32.mxu1 %vm7994_vm2, %v7995_v46 }
 0x7b0   : > { %7643 = vmatprep.subr.bf16.mxu0 %v7993_v19  ;;  %7659 = vmatprep.subr.bf16.mxu1 %v7993_v19 }
 0x7b1   : > { %7014 = vmatmul.mubr.msk.f32.vlgmr.msra.gmra.mrb[40].mxu0 %vm3365_vm6, %v5826_v2  ;;  %7040 = vmatmul.mubr.msk.f32.vlgmr.msra.gmra.mrb[18].mxu1 %vm3365_vm6, %v5838_v3 }
 0x7b2   : > { %7645 = vmatpush3.bf16.msra.mxu0 %v7644_v4  ;;  %7661 = vmatpush3.bf16.msra.mxu1 %v7660_v5  ;;  %v5877_v4 = vld [vmem:[%s9721_s7 + $0x180] sm:$0xff] }
 0x7b3   : > { %7646 = vmatprep.subr.bf16.mxu0 %v7993_v19  ;;  %7662 = vmatprep.subr.bf16.mxu1 %v7993_v19  ;;  %v7708_v14 = vpack.c.bf16 %v5878_v6, %v5877_v4  ;;  %v4807_v4 = vld [vmem:[%s9723_s9 + $0x88] sm:$0xff] }
 0x7b4   : > { %7032 = vmatprep.mubr.msk.f32.mxu0 %vm7994_vm2, %v7995_v46  ;;  %7058 = vmatprep.mubr.msk.f32.mxu1 %vm7994_vm2, %v7995_v46 }
 0x7b6   : > { %7648 = vmatpush3.bf16.msra.mxu0 %v7647_v10  ;;  %7664 = vmatpush3.bf16.msra.mxu1 %v7663_v11 }
 0x7b7   : > { %7649 = vmatprep.subr.bf16.mxu0 %v7993_v19  ;;  %7665 = vmatprep.subr.bf16.mxu1 %v7993_v19 }
 0x7ba   : > { %7651 = vmatpush3.bf16.msra.mxu0 %v7650_v27  ;;  %7667 = vmatpush3.bf16.msra.mxu1 %v7666_v15  ;;  %v7724_v27 = vpack.c.bf16 %v5890_v8, %v5889_v7  ;;  %v5879_v15 = vld [vmem:[%s9721_s7 + $0x190] sm:$0xff]  ;;  %v4806_v7 = vld [vmem:[%s9723_s9 + $0x80] sm:$0xff] }
 0x7bb   : > { %7652 = vmatprep.subr.bf16.mxu0 %v7993_v19  ;;  %7668 = vmatprep.subr.bf16.mxu1 %v7993_v19  ;;  %v4814_v8 = vld [vmem:[%s9723_s9 + $0xc0] sm:$0xff] }
 0x7be   : > { %7654 = vmatpush3.bf16.msra.mxu0 %v7653_v20  ;;  %7670 = vmatpush3.bf16.msra.mxu1 %v7669_v22  ;;  %v7711_v20 = vpack.c.bf16 %v5880_v17, %v5879_v15  ;;  %v5881_v22 = vld [vmem:[%s9721_s7 + $0x1a0] sm:$0xff]  ;;  %v4800_v15 = vld [vmem:[%s9723_s9 + $0x50] sm:$0xff] }
 0x7bf   : > { %7671 = vmatprep.subr.bf16.mxu0 %v7993_v19  ;;  %7687 = vmatprep.subr.bf16.mxu1 %v7993_v19 }
 0x880   : > { %v3604_v23 = vpop.f32.mrb[38].mxu0  ;;  %v3677_v24 = vpop.f32.mrb[16].mxu1 }
 0x881   : > { %v6989_v25 = vpop.f32.mrb[39].mxu0  ;;  %v3678_v26 = vadd.f32 %v3677_v24, %v3604_v23  ;;  %v7008_v29 = vpop.f32.mrb[17].mxu1  ;;  %v5882_v23 = vld [vmem:[%s9721_s7 + $0x1a8] sm:$0xff] }
 0x882   : > { %v7714_v24 = vpack.c.bf16 %v5882_v23, %v5881_v22  ;;  %v5893_v25 = vld [vmem:[%s9721_s7 + $0x1e0] sm:$0xff] }
 0x884   : > { %v3752_v35 = vpop.f32.mrb[40].mxu0  ;;  %v3910_v36 = vpop.f32.mrb[18].mxu1 }
 0x885   : > { %v7015_v37 = vpop.f32.mrb[41].mxu0  ;;  %7033 = vmatmul.mubr.msk.f32.vlgmr.msra.gmra.mrb[42].mxu0 %vm607_vm0, %v3752_v35  ;;  %7059 = vmatmul.mubr.msk.f32.vlgmr.msra.gmra.mrb[20].mxu1 %vm607_vm0, %v3910_v36  ;;  %v7041_v39 = vpop.f32.mrb[19].mxu1  ;;  %v5896_v35 = vld [vmem:[%s9721_s7 + $0x1f8] sm:$0xff] }
 0x886   : > { %7674 = vmatpush3.bf16.msk.msra.mxu0 %vm8710_vm5, %v8726_v33  ;;  %7690 = vmatpush3.bf16.msk.msra.mxu1 %vm8710_vm5, %v8726_v33  ;;  %v7733_v36 = vpack.c.bf16 %v5896_v35, %v5895_v34  ;;  %v4833_v34 = vld [vmem:[%s9723_s9 + $0x158] sm:$0xff] }
 0x887   : > { %7065 = vmatprep.mubr.msk.f32.mxu0 %vm7994_vm2, %v7995_v46  ;;  %7091 = vmatprep.mubr.msk.f32.mxu1 %vm7994_vm2, %v7995_v46 }
 0x888   : > { %7675 = vmatprep.subr.bf16.mxu0 %v7993_v19  ;;  %7691 = vmatprep.subr.bf16.mxu1 %v7993_v19 }
 0x889   : > { %7066 = vmatmul.mubr.msk.f32.vlgmr.msra.gmra.mrb[44].mxu0 %vm3365_vm6, %v5850_v40  ;;  %7092 = vmatmul.mubr.msk.f32.vlgmr.msra.gmra.mrb[22].mxu1 %vm3365_vm6, %v5862_v41 }
 0x88a   : > { %7677 = vmatpush3.bf16.msra.mxu0 %v7676_v42  ;;  %7693 = vmatpush3.bf16.msra.mxu1 %v7692_v43 }
 0x88b   : > { %7678 = vmatprep.subr.bf16.mxu0 %v7993_v19  ;;  %7694 = vmatprep.subr.bf16.mxu1 %v7993_v19 }
 0x88c   : > { %7084 = vmatprep.mubr.msk.f32.mxu0 %vm7994_vm2, %v7995_v46  ;;  %7110 = vmatprep.mubr.msk.f32.mxu1 %vm7994_vm2, %v7995_v46 }
 0x88e   : > { %7680 = vmatpush3.bf16.msra.mxu0 %v7679_v49  ;;  %7696 = vmatpush3.bf16.msra.mxu1 %v7695_v50 }
 0x88f   : > { %7681 = vmatprep.subr.bf16.mxu0 %v7993_v19  ;;  %7697 = vmatprep.subr.bf16.mxu1 %v7993_v19 }
 0x892   : > { %7683 = vmatpush3.bf16.msra.mxu0 %v7682_v55  ;;  %7699 = vmatpush3.bf16.msra.mxu1 %v7698_v56  ;;  %v5906_v55 = vld [vmem:[%s9721_s7 + $0x228] sm:$0xff] }
 0x893   : > { %7684 = vmatprep.subr.bf16.mxu0 %v7993_v19  ;;  %7700 = vmatprep.subr.bf16.mxu1 %v7993_v19 }
 0x896   : > { %7686 = vmatpush3.bf16.msra.mxu0 %v7685_v60  ;;  %7702 = vmatpush3.bf16.msra.mxu1 %v7701_v62  ;;  %v4791_v60 = vld [vmem:[%s9723_s9 + $0x8] sm:$0xff] }
 0x897   : > { %7703 = vmatprep.subr.bf16.mxu0 %v7993_v19  ;;  %7719 = vmatprep.subr.bf16.mxu1 %v7993_v19  ;;  %v7751_v62 = vpack.c.bf16 %v4799_v61, %v4791_v60  ;;  %v4787_v60 = vld [vmem:[%s9722_s8] sm:$0x1] }
 0x898   : > { %v4794_v61 = vld [vmem:[%s9723_s9 + $0x20] sm:$0xff] }
 0x958   : > { %v3834_v63 = vpop.f32.mrb[42].mxu0  ;;  %v3992_v0 = vpop.f32.mrb[20].mxu1 }
 0x959   : > { %v3838_v1 = vadd.f32 %v3834_v63, %v3678_v26  ;;  %v7034_v2 = vpop.f32.mrb[43].mxu0  ;;  %v7060_v3 = vpop.f32.mrb[21].mxu1  ;;  %v5894_v26 = vld [vmem:[%s9721_s7 + $0x1e8] sm:$0xff]  ;;  %v4801_v63 = vld [vmem:[%s9723_s9 + $0x58] sm:$0xff] }
 0x95a   : > { %v7730_v29 = vpack.c.bf16 %v5894_v26, %v5893_v25 }
 0x95b   : > { %v3996_v5 = vadd.f32 %v3992_v0, %v3838_v1  ;;  %v4790_v0 = vld [vmem:[%s9723_s9] sm:$0xff] }
 0x95c   : > { %v4068_v9 = vpop.f32.mrb[44].mxu0  ;;  %v4226_v10 = vpop.f32.mrb[22].mxu1  ;;  %v4798_v1 = vld [vmem:[%s9723_s9 + $0x40] sm:$0xff] }
 0x95d   : > { %v7067_v11 = vpop.f32.mrb[45].mxu0  ;;  %7085 = vmatmul.mubr.msk.f32.vlgmr.msra.gmra.mrb[46].mxu0 %vm607_vm0, %v4068_v9  ;;  %7111 = vmatmul.mubr.msk.f32.vlgmr.msra.gmra.mrb[24].mxu1 %vm607_vm0, %v4226_v10  ;;  %v7093_v12 = vpop.f32.mrb[23].mxu1  ;;  %v7753_v3 = vpack.c.bf16 %v4798_v1, %v4790_v0  ;;  %v7757_v9 = vpack.c.bf16 %v4814_v8, %v4806_v7  ;;  %v4823_v10 = vld [vmem:[%s9723_s9 + $0x108] sm:$0xff]  ;;  %v4796_v0 = vld [vmem:[%s9723_s9 + $0x30] sm:$0xff] }
 0x95e   : > { %7706 = vmatpush3.bf16.msk.msra.mxu0 %vm8710_vm5, %v8726_v33  ;;  %7722 = vmatpush3.bf16.msk.msra.mxu1 %vm8710_vm5, %v8726_v33  ;;  %v4831_v11 = vld [vmem:[%s9723_s9 + $0x148] sm:$0xff]  ;;  %v4804_v1 = vld [vmem:[%s9723_s9 + $0x70] sm:$0xff] }
 0x95f   : > { %7117 = vmatprep.mubr.msk.f32.mxu0 %vm7994_vm2, %v7995_v46  ;;  %7143 = vmatprep.mubr.msk.f32.mxu1 %vm7994_vm2, %v7995_v46  ;;  %v7759_v12 = vpack.c.bf16 %v4831_v11, %v4823_v10  ;;  %v7801_v8 = vpack.c.bf16 %v4804_v1, %v4796_v0  ;;  %v4818_v10 = vld [vmem:[%s9723_s9 + $0xe0] sm:$0xff]  ;;  %v5212_v1 = vld [vmem:[%s9725_s11 + $0xa8] sm:$0xff] }
 0x960   : > { %7707 = vmatprep.subr.bf16.mxu0 %v7993_v19  ;;  %7723 = vmatprep.subr.bf16.mxu1 %v7993_v19  ;;  %v5211_v0 = vld [vmem:[%s9725_s11 + $0xa0] sm:$0xff] }
 0x961   : > { %7118 = vmatmul.mubr.msk.f32.vlgmr.msra.gmra.mrb[48].mxu0 %vm3365_vm6, %v5874_v13  ;;  %7144 = vmatmul.mubr.msk.f32.vlgmr.msra.gmra.mrb[26].mxu1 %vm3365_vm6, %v5886_v16  ;;  %v4822_v13 = vld [vmem:[%s9723_s9 + $0x100] sm:$0xff] }
 0x962   : > { %7709 = vmatpush3.bf16.msra.mxu0 %v7708_v14  ;;  %7725 = vmatpush3.bf16.msra.mxu1 %v7724_v27  ;;  %v4830_v16 = vld [vmem:[%s9723_s9 + $0x140] sm:$0xff]  ;;  %v4792_v27 = vld [vmem:[%s9723_s9 + $0x10] sm:$0xff] }
 0x963   : > { %7710 = vmatprep.subr.bf16.mxu0 %v7993_v19  ;;  %7726 = vmatprep.subr.bf16.mxu1 %v7993_v19  ;;  %v7761_v14 = vpack.c.bf16 %v4830_v16, %v4822_v13  ;;  %v4812_v16 = vld [vmem:[%s9723_s9 + $0xb0] sm:$0xff] }
 0x964   : > { %7136 = vmatprep.mubr.msk.f32.mxu0 %vm7994_vm2, %v7995_v46  ;;  %7162 = vmatprep.mubr.msk.f32.mxu1 %vm7994_vm2, %v7995_v46 }
 0x966   : > { %7712 = vmatpush3.bf16.msra.mxu0 %v7711_v20  ;;  %7728 = vmatpush3.bf16.msra.mxu1 %v7727_v21  ;;  %v4817_v20 = vld [vmem:[%s9723_s9 + $0xd8] sm:$0xff] }
 0x967   : > { %7713 = vmatprep.subr.bf16.mxu0 %v7993_v19  ;;  %7729 = vmatprep.subr.bf16.mxu1 %v7993_v19  ;;  %v7771_v26 = vpack.c.bf16 %v4817_v20, %v4809_v18 }
 0x96a   : > { %7715 = vmatpush3.bf16.msra.mxu0 %v7714_v24  ;;  %7731 = vmatpush3.bf16.msra.mxu1 %v7730_v29  ;;  %v7769_v24 = vpack.c.bf16 %v4800_v15, %v4792_v27  ;;  %v4808_v29 = vld [vmem:[%s9723_s9 + $0x90] sm:$0xff]  ;;  %v4827_v27 = vld [vmem:[%s9723_s9 + $0x128] sm:$0xff] }
 0x96b   : > { %7716 = vmatprep.subr.bf16.mxu0 %v7993_v19  ;;  %7732 = vmatprep.subr.bf16.mxu1 %v7993_v19  ;;  %v4835_v15 = vld [vmem:[%s9723_s9 + $0x168] sm:$0xff] }
 0x96e   : > { %7718 = vmatpush3.bf16.msra.mxu0 %v7717_v32  ;;  %7734 = vmatpush3.bf16.msra.mxu1 %v7733_v36  ;;  %v4825_v32 = vld [vmem:[%s9723_s9 + $0x118] sm:$0xff]  ;;  %v7773_v36 = vpack.c.bf16 %v4816_v30, %v4808_v29  ;;  %v4843_v29 = vld [vmem:[%s9723_s9 + $0x1a8] sm:$0xff] }
 0x96f   : > { %7735 = vmatprep.subr.bf16.mxu0 %v7993_v19  ;;  %7752 = vmatprep.subr.bf16.mxu1 %v7751_v62  ;;  %v4851_v30 = vld [vmem:[%s9723_s9 + $0x1e8] sm:$0xff] }
 0xa30   : > { %v4150_v37 = vpop.f32.mrb[46].mxu0  ;;  %v4308_v39 = vpop.f32.mrb[24].mxu1 }
 0xa31   : > { %v4154_v40 = vadd.f32 %v4150_v37, %v3996_v5  ;;  %v7086_v41 = vpop.f32.mrb[47].mxu0  ;;  %v7112_v42 = vpop.f32.mrb[25].mxu1  ;;  %v4815_v5 = vld [vmem:[%s9723_s9 + $0xc8] sm:$0xff]  ;;  %v7775_v37 = vpack.c.bf16 %v4833_v34, %v4825_v32  ;;  %v4853_v32 = vld [vmem:[%s9723_s9 + $0x1f8] sm:$0xff] }
 0xa32   : > { %v7755_v6 = vpack.c.bf16 %v4815_v5, %v4807_v4  ;;  %v4839_v42 = vld [vmem:[%s9723_s9 + $0x188] sm:$0xff]  ;;  %v4813_v4 = vld [vmem:[%s9723_s9 + $0xb8] sm:$0xff] }
 0xa33   : > { %v9037_v43 = vadd.f32 %v4308_v39, %v4154_v40  ;;  %v4824_v39 = vld [vmem:[%s9723_s9 + $0x110] sm:$0xff]  ;;  %v4821_v5 = vld [vmem:[%s9723_s9 + $0xf8] sm:$0xff] }
 0xa34   : > { %v4384_v47 = vpop.f32.mrb[48].mxu0  ;;  %v4542_v48 = vpop.f32.mrb[26].mxu1  ;;  %v4832_v40 = vld [vmem:[%s9723_s9 + $0x150] sm:$0xff]  ;;  %v7803_v13 = vpack.c.bf16 %v4821_v5, %v4813_v4 }
 0xa35   : > { %v7119_v49 = vpop.f32.mrb[49].mxu0  ;;  %7137 = vmatmul.mubr.msk.f32.vlgmr.msra.gmra.mrb[50].mxu0 %vm607_vm0, %v4384_v47  ;;  %7163 = vmatmul.mubr.msk.f32.vlgmr.msra.gmra.mrb[28].mxu1 %vm607_vm0, %v4542_v48  ;;  %v7145_v50 = vpop.f32.mrb[27].mxu1  ;;  %v7777_v41 = vpack.c.bf16 %v4832_v40, %v4824_v39  ;;  %v4849_v47 = vld [vmem:[%s9723_s9 + $0x1d8] sm:$0xff]  ;;  %v4838_v48 = vld [vmem:[%s9723_s9 + $0x180] sm:$0xff]  ;;  %v7795_v39 = vpack.c.bf16 %v4851_v30, %v4843_v29 }
 0xa36   : > { %7738 = vmatpush3.bf16.msk.msra.mxu0 %vm8710_vm5, %v8726_v33  ;;  %7169 = vmatprep.mubr.msk.f32.mxu0 %vm7994_vm2, %v7995_v46  ;;  %v5905_v33 = vld [vmem:[%s9721_s7 + $0x220] sm:$0xff]  ;;  %v7779_v49 = vpack.c.bf16 %v4849_v47, %v4841_v44 }
 0xa37   : > { %7739 = vmatprep.subr.bf16.mxu0 %v7993_v19  ;;  %4963 = vmatprep.mubr.f32.mxu1 %v7995_v46  ;;  %v7746_v56 = vpack.c.bf16 %v5906_v55, %v5905_v33  ;;  %v4846_v50 = vld [vmem:[%s9723_s9 + $0x1c0] sm:$0xff]  ;;  %v4803_v33 = vld [vmem:[%s9723_s9 + $0x68] sm:$0xff]  ;;  %v4797_v55 = vld [vmem:[%s9723_s9 + $0x38] sm:$0xff] }
 0xa38   : > { %7754 = vmatpush1.bf16.msra.mxu1 %v7753_v3  ;;  %v7765_v53 = vpack.c.bf16 %v4846_v50, %v4838_v48  ;;  %v7799_v58 = vpack.c.bf16 %v4805_v57, %v4797_v55  ;;  %v4819_v3 = vld [vmem:[%s9723_s9 + $0xe8] sm:$0xff]  ;;  %v5239_v44 = vld [vmem:[%s9725_s11 + $0x180] sm:$0xff]  ;;  %v5241_v55 = vld [vmem:[%s9725_s11 + $0x190] sm:$0xff] }
 0xa39   : > { %7170 = vmatmul.mubr.msk.f32.vlgmr.msra.gmra.mrb[52].mxu0 %vm3365_vm6, %v5898_v51  ;;  %7756 = vmatprep.subr.bf16.mxu1 %v7755_v6  ;;  %v4840_v51 = vld [vmem:[%s9723_s9 + $0x190] sm:$0xff]  ;;  %v5192_v50 = vld [vmem:[%s9725_s11 + $0x8] sm:$0xff] }
 0xa3a   : > { %7741 = vmatpush3.bf16.msra.mxu0 %v7740_v52  ;;  %7188 = vmatprep.mubr.msk.f32.mxu0 %vm7994_vm2, %v7995_v46  ;;  %v4848_v52 = vld [vmem:[%s9723_s9 + $0x1d0] sm:$0xff] }
 0xa3b   : > { %7742 = vmatprep.subr.bf16.mxu0 %v7993_v19  ;;  %v7781_v54 = vpack.c.bf16 %v4848_v52, %v4840_v51 }
 0xa3c   : > { %7758 = vmatpush1.bf16.msra.mxu1 %v7757_v9  ;;  %v4810_v9 = vld [vmem:[%s9723_s9 + $0xa0] sm:$0xff] }
 0xa3d   : > { %7760 = vmatprep.subr.bf16.mxu1 %v7759_v12  ;;  %v7789_v18 = vpack.c.bf16 %v4818_v10, %v4810_v9  ;;  %v5227_v10 = vld [vmem:[%s9725_s11 + $0x120] sm:$0xff] }
 0xa3e   : > { %7744 = vmatpush3.bf16.msra.mxu0 %v7743_v28  ;;  %v4795_v28 = vld [vmem:[%s9723_s9 + $0x28] sm:$0xff] }
 0xa3f   : > { %7745 = vmatprep.subr.bf16.mxu0 %v7993_v19 }
 0xa40   : > { %7762 = vmatpush1.bf16.msra.mxu1 %v7761_v14  ;;  %v4820_v14 = vld [vmem:[%s9723_s9 + $0xf0] sm:$0xff] }
 0xa41   : > { %v7805_v20 = vpack.c.bf16 %v4820_v14, %v4812_v16  ;;  %v5245_v16 = vld [vmem:[%s9725_s11 + $0x1b0] sm:$0xff]  ;;  %v5246_v14 = vld [vmem:[%s9725_s11 + $0x1b8] sm:$0xff] }
 0xa42   : > { %7747 = vmatpush3.bf16.msra.mxu0 %v7746_v56  ;;  %v7783_v56 = vpack.c.bf16 %v4803_v33, %v4795_v28  ;;  %v5209_v28 = vld [vmem:[%s9725_s11 + $0x90] sm:$0xff]  ;;  %v5210_v33 = vld [vmem:[%s9725_s11 + $0x98] sm:$0xff] }
 0xa43   : > { %7748 = vmatprep.subr.bf16.mxu0 %v7993_v19  ;;  %v4793_v19 = vld [vmem:[%s9723_s9 + $0x18] sm:$0xff] }
 0xa44   : > { %v7767_v2 = vpack.c.bf16 %v4801_v63, %v4793_v19  ;;  %v4802_v19 = vld [vmem:[%s9723_s9 + $0x60] sm:$0xff] }
 0xa45   : > { %v7785_v7 = vpack.c.bf16 %v4802_v19, %v4794_v61  ;;  %v7819_v61 = vpack.c.bf16 %v5210_v33, %v5209_v28 }
 0xa46   : > { %7750 = vmatpush3.bf16.msra.mxu0 %v7749_v59 }
 0xa47   : > { %7768 = vmatprep.subr.bf16.mxu0 %v7767_v2  ;;  %v4811_v2 = vld [vmem:[%s9723_s9 + $0xa8] sm:$0xff] }
 0xa48   : > { %v7787_v12 = vpack.c.bf16 %v4819_v3, %v4811_v2  ;;  %v5243_v2 = vld [vmem:[%s9725_s11 + $0x1a0] sm:$0xff]  ;;  %v5244_v3 = vld [vmem:[%s9725_s11 + $0x1a8] sm:$0xff] }
 0xa49   : > { %v7855_v9 = vpack.c.bf16 %v5244_v3, %v5243_v2  ;;  %v5254_v2 = vld [vmem:[%s9725_s11 + $0x1f8] sm:$0xff]  ;;  %v5205_v3 = vld [vmem:[%s9725_s11 + $0x70] sm:$0xff] }
 0xb08   : > { %v4466_v17 = vpop.f32.mrb[50].mxu0  ;;  %v4624_v38 = vpop.f32.mrb[28].mxu1 }
 0xb09   : > { %v4470_v21 = vadd.f32 %v4466_v17, %v9037_v43  ;;  %v7138_v22 = vpop.f32.mrb[51].mxu0  ;;  %v7164_v23 = vpop.f32.mrb[29].mxu1  ;;  %v4847_v43 = vld [vmem:[%s9723_s9 + $0x1c8] sm:$0xff]  ;;  %v4829_v17 = vld [vmem:[%s9723_s9 + $0x138] sm:$0xff] }
 0xb0a   : > { %v7763_v45 = vpack.c.bf16 %v4847_v43, %v4839_v42  ;;  %v4834_v22 = vld [vmem:[%s9723_s9 + $0x160] sm:$0xff]  ;;  %v7791_v23 = vpack.c.bf16 %v4835_v15, %v4827_v27  ;;  %v5208_v43 = vld [vmem:[%s9725_s11 + $0x88] sm:$0xff] }
 0xb0b   : > { %v4628_v25 = vadd.f32 %v4624_v38, %v4470_v21  ;;  %v4837_v38 = vld [vmem:[%s9723_s9 + $0x178] sm:$0xff]  ;;  %v4826_v21 = vld [vmem:[%s9723_s9 + $0x120] sm:$0xff] }
 0xb0c   : > { %v4700_v31 = vpop.f32.mrb[52].mxu0  ;;  %7764 = vmatprep.subr.bf16.mxu1 %v7763_v45  ;;  %v7793_v34 = vpack.c.bf16 %v4834_v22, %v4826_v21  ;;  %v5207_v42 = vld [vmem:[%s9725_s11 + $0x80] sm:$0xff]  ;;  %v5240_v45 = vld [vmem:[%s9725_s11 + $0x188] sm:$0xff]  ;;  %v5229_v21 = vld [vmem:[%s9725_s11 + $0x130] sm:$0xff] }
 0xb0d   : > { %v7171_v35 = vpop.f32.mrb[53].mxu0  ;;  %7189 = vmatmul.mubr.msk.f32.vlgmr.msra.gmra.mrb[54].mxu0 %vm607_vm0, %v4700_v31  ;;  %7766 = vmatpush1.bf16.msra.mxu1 %v7765_v53  ;;  %v4845_v31 = vld [vmem:[%s9723_s9 + $0x1b8] sm:$0xff]  ;;  %v7815_v51 = vpack.c.bf16 %v5208_v43, %v5207_v42  ;;  %v7847_v52 = vpack.c.bf16 %v5240_v45, %v5239_v44  ;;  %v5223_v53 = vld [vmem:[%s9725_s11 + $0x100] sm:$0xff]  ;;  %v5201_v44 = vld [vmem:[%s9725_s11 + $0x50] sm:$0xff] }
 0xb0e   : > { %7770 = vmatpush1.bf16.msra.mxu0 %v7769_v24  ;;  %5034 = vmatprep.mubr.f32.mxu0 %v7995_v46  ;;  %v7807_v24 = vpack.c.bf16 %v4837_v38, %v4829_v17  ;;  %v7811_v40 = vpack.c.bf16 %v4853_v32, %v4845_v31  ;;  %v5197_v17 = vld [vmem:[%s9725_s11 + $0x30] sm:$0xff]  ;;  %v5198_v38 = vld [vmem:[%s9725_s11 + $0x38] sm:$0xff]  ;;  %v5199_v31 = vld [vmem:[%s9725_s11 + $0x40] sm:$0xff] }
 0xb0f   : > { %7772 = vmatprep.subr.bf16.mxu0 %v7771_v26  ;;  %7784 = vmatprep.subr.bf16.mxu1 %v7783_v56  ;;  %v4836_v26 = vld [vmem:[%s9723_s9 + $0x170] sm:$0xff]  ;;  %v5242_v56 = vld [vmem:[%s9725_s11 + $0x198] sm:$0xff]  ;;  %v7829_v29 = vpack.c.bf16 %v5198_v38, %v5197_v17  ;;  %v5200_v32 = vld [vmem:[%s9725_s11 + $0x48] sm:$0xff] }
 0xb10   : > { %v7851_v19 = vpack.c.bf16 %v5242_v56, %v5241_v55  ;;  %v5230_v22 = vld [vmem:[%s9725_s11 + $0x138] sm:$0xff]  ;;  %v7833_v42 = vpack.c.bf16 %v5200_v32, %v5199_v31  ;;  %v5203_v55 = vld [vmem:[%s9725_s11 + $0x60] sm:$0xff]  ;;  %v5256_v31 = vld [vmem:[%s9725_s11 + $0x208] sm:$0xff] }
 0xb11   : > { %v7861_v30 = vpack.c.bf16 %v5230_v22, %v5229_v21  ;;  %v5202_v45 = vld [vmem:[%s9725_s11 + $0x58] sm:$0xff] }
 0xb12   : > { %7774 = vmatpush1.bf16.msra.mxu0 %v7773_v36  ;;  %v4842_v36 = vld [vmem:[%s9723_s9 + $0x1a0] sm:$0xff]  ;;  %v7837_v28 = vpack.c.bf16 %v5202_v45, %v5201_v44  ;;  %v5306_v44 = vld [vmem:[%s9725_s11 + $0x398] sm:$0xff] }
 0xb13   : > { %7776 = vmatprep.subr.bf16.mxu0 %v7775_v37  ;;  %v4850_v37 = vld [vmem:[%s9723_s9 + $0x1e0] sm:$0xff] }
 0xb14   : > { %v7797_v47 = vpack.c.bf16 %v4850_v37, %v4842_v36  ;;  %v5231_v36 = vld [vmem:[%s9725_s11 + $0x140] sm:$0xff]  ;;  %v5232_v37 = vld [vmem:[%s9725_s11 + $0x148] sm:$0xff] }
 0xb15   : > { %v7865_v43 = vpack.c.bf16 %v5232_v37, %v5231_v36  ;;  %v5287_v37 = vld [vmem:[%s9725_s11 + $0x300] sm:$0xff] }
 0xb16   : > { %7778 = vmatpush1.bf16.msra.mxu0 %v7777_v41  ;;  %v4852_v41 = vld [vmem:[%s9723_s9 + $0x1f0] sm:$0xff] }
 0xb17   : > { %7780 = vmatprep.subr.bf16.mxu0 %v7779_v49  ;;  %v5191_v49 = vld [vmem:[%s9725_s11] sm:$0xff] }
 0xb18   : > { %v7817_v57 = vpack.c.bf16 %v5192_v50, %v5191_v49  ;;  %v5233_v49 = vld [vmem:[%s9725_s11 + $0x150] sm:$0xff]  ;;  %v5234_v50 = vld [vmem:[%s9725_s11 + $0x158] sm:$0xff] }
 0xb19   : > { %v7869_v33 = vpack.c.bf16 %v5234_v50, %v5233_v49  ;;  %v5257_v50 = vld [vmem:[%s9725_s11 + $0x210] sm:$0xff] }
 0xb1a   : > { %7782 = vmatpush1.bf16.msra.mxu0 %v7781_v54  ;;  %v5224_v54 = vld [vmem:[%s9725_s11 + $0x108] sm:$0xff] }
 0xb1b   : > { %7800 = vmatprep.subr.bf16.mxu0 %v7799_v58  ;;  %v7849_v58 = vpack.c.bf16 %v5224_v54, %v5223_v53  ;;  %v5251_v53 = vld [vmem:[%s9725_s11 + $0x1e0] sm:$0xff]  ;;  %v5252_v54 = vld [vmem:[%s9725_s11 + $0x1e8] sm:$0xff] }
 0xbe0   : > { %v4782_v59 = vpop.f32.mrb[54].mxu0 }
 0xbe1   : > { %v4786_v62 = vadd.f32 %v4782_v59, %v4628_v25  ;;  %v7190_v63 = vpop.f32.mrb[55].mxu0  ;;  %v4828_v25 = vld [vmem:[%s9723_s9 + $0x130] sm:$0xff] }
 0xbe2   : > { %v7809_v35 = vpack.c.bf16 %v4836_v26, %v4828_v25  ;;  %v5193_v59 = vld [vmem:[%s9725_s11 + $0x10] sm:$0xff]  ;;  %v5226_v63 = vld [vmem:[%s9725_s11 + $0x118] sm:$0xff]  ;;  %v5247_v25 = vld [vmem:[%s9725_s11 + $0x1c0] sm:$0xff] }
 0xbe3   : > { %v4788_v6 = vadd.f32 %v4787_v60, %v4786_v62  ;;  %v5194_v60 = vld [vmem:[%s9725_s11 + $0x18] sm:$0xff]  ;;  %v5225_v62 = vld [vmem:[%s9725_s11 + $0x110] sm:$0xff]  ;;  %v5248_v26 = vld [vmem:[%s9725_s11 + $0x1c8] sm:$0xff] }
 0xbe4   : > { %v7821_v4 = vpack.c.bf16 %v5194_v60, %v5193_v59  ;;  %v7853_v5 = vpack.c.bf16 %v5226_v63, %v5225_v62  ;;  %v5235_v59 = vld [vmem:[%s9725_s11 + $0x160] sm:$0xff]  ;;  %v5236_v60 = vld [vmem:[%s9725_s11 + $0x168] sm:$0xff]  ;;  %v5221_v62 = vld [vmem:[%s9725_s11 + $0xf0] sm:$0xff] }
 0xbe5   : > { %v9225_v11 = vmax.f32 %v4788_v6, 0.0  ;;  %v5195_v6 = vld [vmem:[%s9725_s11 + $0x20] sm:$0xff]  ;;  %v5222_v63 = vld [vmem:[%s9725_s11 + $0xf8] sm:$0xff] }
 0xbe7   : > { %5910 = vmatmul.mubr.msk.f32.vlgmr.msra.gmra.mrb[30].mxu1 %vm607_vm0, %v9225_v11  ;;  %5911 = vmatmul.mubr.msk.f32.vlgmr.msra.gmra.mrb[56].mxu0 %vm607_vm0, %v9225_v11 }
 0xbe8   : > { %7786 = vmatpush1.bf16.msra.mxu1 %v7785_v7  ;;  %7802 = vmatpush1.bf16.msra.mxu0 %v7801_v8  ;;  %v5196_v7 = vld [vmem:[%s9725_s11 + $0x28] sm:$0xff]  ;;  %v7823_v8 = vpack.c.bf16 %v5212_v1, %v5211_v0  ;;  %v5253_v0 = vld [vmem:[%s9725_s11 + $0x1f0] sm:$0xff]  ;;  %v7843_v1 = vpack.c.bf16 %v5222_v63, %v5221_v62 }
 0xbe9   : > { %7788 = vmatprep.subr.bf16.mxu1 %v7787_v12  ;;  %7804 = vmatprep.subr.bf16.mxu0 %v7803_v13  ;;  %v5213_v12 = vld [vmem:[%s9725_s11 + $0xb0] sm:$0xff]  ;;  %v5214_v13 = vld [vmem:[%s9725_s11 + $0xb8] sm:$0xff]  ;;  %v7825_v27 = vpack.c.bf16 %v5196_v7, %v5195_v6  ;;  %v5260_v62 = vld [vmem:[%s9725_s11 + $0x228] sm:$0xff] }
 0xbea   : > { %5105 = vmatprep.mubr.f32.mxu1 %v7995_v46  ;;  %5176 = vmatprep.mubr.f32.mxu0 %v7995_v46  ;;  %v4844_v46 = vld [vmem:[%s9723_s9 + $0x1b0] sm:$0xff] }
 0xbeb   : > { %v7813_v48 = vpack.c.bf16 %v4852_v41, %v4844_v46  ;;  %v5249_v46 = vld [vmem:[%s9725_s11 + $0x1d0] sm:$0xff]  ;;  %v5250_v41 = vld [vmem:[%s9725_s11 + $0x1d8] sm:$0xff] }
 0xbec   : > { %7790 = vmatpush1.bf16.msra.mxu1 %v7789_v18  ;;  %7806 = vmatpush1.bf16.msra.mxu0 %v7805_v20  ;;  %v7827_v18 = vpack.c.bf16 %v5214_v13, %v5213_v12  ;;  %v7859_v20 = vpack.c.bf16 %v5246_v14, %v5245_v16  ;;  %v5237_v7 = vld [vmem:[%s9725_s11 + $0x170] sm:$0xff]  ;;  %v5303_v12 = vld [vmem:[%s9725_s11 + $0x380] sm:$0xff]  ;;  %v5304_v16 = vld [vmem:[%s9725_s11 + $0x388] sm:$0xff] }
 0xbed   : > { %7792 = vmatprep.subr.bf16.mxu1 %v7791_v23  ;;  %7808 = vmatprep.subr.bf16.mxu0 %v7807_v24  ;;  %v5215_v23 = vld [vmem:[%s9725_s11 + $0xc0] sm:$0xff]  ;;  %v5216_v24 = vld [vmem:[%s9725_s11 + $0xc8] sm:$0xff]  ;;  %v7911_v14 = vpack.c.bf16 %v5304_v16, %v5303_v12  ;;  %v5262_v12 = vld [vmem:[%s9725_s11 + $0x238] sm:$0xff] }
 0xbf0   : > { %7794 = vmatpush1.bf16.msra.mxu1 %v7793_v34  ;;  %7810 = vmatpush1.bf16.msra.mxu0 %v7809_v35  ;;  %v7831_v34 = vpack.c.bf16 %v5216_v24, %v5215_v23  ;;  %v7863_v35 = vpack.c.bf16 %v5248_v26, %v5247_v25 }
 0xbf1   : > { %7796 = vmatprep.subr.bf16.mxu1 %v7795_v39  ;;  %7812 = vmatprep.subr.bf16.mxu0 %v7811_v40  ;;  %v5217_v39 = vld [vmem:[%s9725_s11 + $0xd0] sm:$0xff]  ;;  %v5218_v40 = vld [vmem:[%s9725_s11 + $0xd8] sm:$0xff] }
 0xbf4   : > { %7798 = vmatpush1.bf16.msra.mxu1 %v7797_v47  ;;  %7814 = vmatpush1.bf16.msra.mxu0 %v7813_v48  ;;  %v7835_v47 = vpack.c.bf16 %v5218_v40, %v5217_v39  ;;  %v7867_v48 = vpack.c.bf16 %v5250_v41, %v5249_v46  ;;  %v5288_v39 = vld [vmem:[%s9725_s11 + $0x308] sm:$0xff]  ;;  %v5273_v40 = vld [vmem:[%s9725_s11 + $0x290] sm:$0xff] }
 0xbf5   : > { %7816 = vmatprep.subr.bf16.mxu1 %v7815_v51  ;;  %7848 = vmatprep.subr.bf16.mxu0 %v7847_v52  ;;  %v5219_v51 = vld [vmem:[%s9725_s11 + $0xe0] sm:$0xff]  ;;  %v5220_v52 = vld [vmem:[%s9725_s11 + $0xe8] sm:$0xff]  ;;  %v7913_v49 = vpack.c.bf16 %v5288_v39, %v5287_v37 }
 0xbf6   : > { %v7839_v56 = vpack.c.bf16 %v5220_v52, %v5219_v51  ;;  %v5258_v51 = vld [vmem:[%s9725_s11 + $0x218] sm:$0xff]  ;;  %v5295_v37 = vld [vmem:[%s9725_s11 + $0x340] sm:$0xff]  ;;  %v5296_v39 = vld [vmem:[%s9725_s11 + $0x348] sm:$0xff] }
 0xbf7   : > { %5912 = vmatmul.mubr.msk.f32.vlgmr.msra.gmra.mrb[32].mxu1 %vm607_vm0, %v9225_v11  ;;  %5913 = vmatmul.mubr.msk.f32.vlgmr.msra.gmra.mrb[58].mxu0 %vm607_vm0, %v9225_v11  ;;  %v5228_v11 = vld [vmem:[%s9725_s11 + $0x128] sm:$0xff] }
 0xbf8   : > { %7818 = vmatpush3.bf16.msra.mxu1 %v7817_v57  ;;  %7850 = vmatpush3.bf16.msra.mxu0 %v7849_v58  ;;  %v7857_v15 = vpack.c.bf16 %v5228_v11, %v5227_v10  ;;  %v7871_v57 = vpack.c.bf16 %v5252_v54, %v5251_v53  ;;  %v5204_v58 = vld [vmem:[%s9725_s11 + $0x68] sm:$0xff]  ;;  %v5271_v10 = vld [vmem:[%s9725_s11 + $0x280] sm:$0xff] }
 0xbf9   : > { %7820 = vmatprep.subr.bf16.mxu1 %v7819_v61  ;;  %7852 = vmatprep.subr.bf16.mxu0 %v7851_v19  ;;  %v7841_v61 = vpack.c.bf16 %v5204_v58, %v5203_v55  ;;  %v7873_v19 = vpack.c.bf16 %v5236_v60, %v5235_v59  ;;  %v5272_v11 = vld [vmem:[%s9725_s11 + $0x288] sm:$0xff]  ;;  %v5290_v55 = vld [vmem:[%s9725_s11 + $0x318] sm:$0xff]  ;;  %v5307_v58 = vld [vmem:[%s9725_s11 + $0x3a0] sm:$0xff]  ;;  %v7885_v60 = vpack.c.bf16 %v5258_v51, %v5257_v50 }
 0xbfa   : > { %v7879_v13 = vpack.c.bf16 %v5272_v11, %v5271_v10  ;;  %v5308_v59 = vld [vmem:[%s9725_s11 + $0x3a8] sm:$0xff]  ;;  %v5261_v11 = vld [vmem:[%s9725_s11 + $0x230] sm:$0xff]  ;;  %v5266_v51 = vld [vmem:[%s9725_s11 + $0x258] sm:$0xff] }
 0xbfb   : > { %v5265_v50 = vld [vmem:[%s9725_s11 + $0x250] sm:$0xff] }
 0xbfc   : > { %7822 = vmatpush3.bf16.msra.mxu1 %v7821_v4  ;;  %7854 = vmatpush3.bf16.msra.mxu0 %v7853_v5  ;;  %v5206_v4 = vld [vmem:[%s9725_s11 + $0x78] sm:$0xff]  ;;  %v7875_v5 = vpack.c.bf16 %v5254_v2, %v5253_v0  ;;  %v7919_v0 = vpack.c.bf16 %v5308_v59, %v5307_v58  ;;  %v5292_v2 = vld [vmem:[%s9725_s11 + $0x328] sm:$0xff]  ;;  %v7901_v59 = vpack.c.bf16 %v5266_v51, %v5265_v50 }
 0xbfd   : > { %7824 = vmatprep.subr.bf16.mxu1 %v7823_v8  ;;  %7856 = vmatprep.subr.bf16.mxu0 %v7855_v9  ;;  %v7845_v6 = vpack.c.bf16 %v5206_v4, %v5205_v3  ;;  %v5238_v8 = vld [vmem:[%s9725_s11 + $0x178] sm:$0xff]  ;;  %v5277_v3 = vld [vmem:[%s9725_s11 + $0x2b0] sm:$0xff] }
 0xbfe   : > { %v7877_v9 = vpack.c.bf16 %v5238_v8, %v5237_v7  ;;  %v5309_v7 = vld [vmem:[%s9725_s11 + $0x3b0] sm:$0xff]  ;;  %v5310_v8 = vld [vmem:[%s9725_s11 + $0x3b8] sm:$0xff] }
 0xbff   : > { %v7923_v16 = vpack.c.bf16 %v5310_v8, %v5309_v7 }
 0xc00   : > { %7826 = vmatpush3.bf16.msra.mxu1 %v7825_v27  ;;  %7858 = vmatpush3.bf16.msra.mxu0 %v7857_v15  ;;  %v4856_v27 = vlaneseq }
 0xc01   : > { %7828 = vmatprep.subr.bf16.mxu1 %v7827_v18  ;;  %7860 = vmatprep.subr.bf16.mxu0 %v7859_v20  ;;  %v9502_v18 = vld [vmem:[%s9724_s10] sm:$0xff] }
 0xc02   : > { %v9495_v15 = vshrl.u32 %v4856_v27, 7  ;;  %v5294_v27 = vld [vmem:[%s9725_s11 + $0x338] sm:$0xff] }
 0xc04   : > { %7830 = vmatpush3.bf16.msra.mxu1 %v7829_v29  ;;  %7862 = vmatpush3.bf16.msra.mxu0 %v7861_v30  ;;  %v4858_v17 = vsub.s32 0, %v9495_v15  ;;  %v4866_v38 = vsub.s32 2, %v9495_v15  ;;  %v4862_v20 = vsub.s32 1, %v9495_v15  ;;  %v4870_v21 = vsub.s32 3, %v9495_v15  ;;  %v5255_v30 = vld [vmem:[%s9725_s11 + $0x200] sm:$0xff] }
 0xc05   : > { %7832 = vmatprep.subr.bf16.mxu1 %v7831_v34  ;;  %7864 = vmatprep.subr.bf16.mxu0 %v7863_v35  ;;  %v4878_v4 = vsub.s32 5, %v9495_v15  ;;  %v4874_v58 = vsub.s32 4, %v9495_v15 }
 0xc06   : > { %v4859_v22 = vrot.slane %v9502_v18, %v4858_v17  ;;  %v4867_v23 = vrot.slane %v9502_v18, %v4866_v38  ;;  %v4863_v24 = vrot.slane %v9502_v18, %v4862_v20  ;;  %v4871_v25 = vrot.slane %v9502_v18, %v4870_v21  ;;  %v5279_v17 = vld [vmem:[%s9725_s11 + $0x2c0] sm:$0xff]  ;;  %v5280_v21 = vld [vmem:[%s9725_s11 + $0x2c8] sm:$0xff] }
 0xc07   : > { %v4879_v38 = vrot.slane %v9502_v18, %v4878_v4  ;;  %v5317_v4 = vld [vmem:[%s9725_s11 + $0x3f0] sm:$0xff] }
 0xc08   : > { %7834 = vmatpush3.bf16.msra.mxu1 %v7833_v42  ;;  %7866 = vmatpush3.bf16.msra.mxu0 %v7865_v43  ;;  %v5274_v42 = vld [vmem:[%s9725_s11 + $0x298] sm:$0xff]  ;;  %v5305_v43 = vld [vmem:[%s9725_s11 + $0x390] sm:$0xff] }
 0xc09   : > { %7836 = vmatprep.subr.bf16.mxu1 %v7835_v47  ;;  %7868 = vmatprep.subr.bf16.mxu0 %v7867_v48  ;;  %v7881_v48 = vpack.c.bf16 %v5256_v31, %v5255_v30  ;;  %v7883_v54 = vpack.c.bf16 %v5274_v42, %v5273_v40  ;;  %v5263_v30 = vld [vmem:[%s9725_s11 + $0x240] sm:$0xff]  ;;  %v5264_v31 = vld [vmem:[%s9725_s11 + $0x248] sm:$0xff]  ;;  %v5281_v40 = vld [vmem:[%s9725_s11 + $0x2d0] sm:$0xff] }
 0xc0a   : > { %v5282_v42 = vld [vmem:[%s9725_s11 + $0x2d8] sm:$0xff] }
 0xc0c   : > { %7838 = vmatpush3.bf16.msra.mxu1 %v7837_v28  ;;  %7870 = vmatpush3.bf16.msra.mxu0 %v7869_v33  ;;  %v7915_v28 = vpack.c.bf16 %v5306_v44, %v5305_v43  ;;  %v5289_v33 = vld [vmem:[%s9725_s11 + $0x310] sm:$0xff]  ;;  %v5314_v44 = vld [vmem:[%s9725_s11 + $0x3d8] sm:$0xff] }
 0xc0d   : > { %7840 = vmatprep.subr.bf16.mxu1 %v7839_v56  ;;  %7872 = vmatprep.subr.bf16.mxu0 %v7871_v57  ;;  %v5275_v56 = vld [vmem:[%s9725_s11 + $0x2a0] sm:$0xff]  ;;  %v5276_v57 = vld [vmem:[%s9725_s11 + $0x2a8] sm:$0xff]  ;;  %v5313_v43 = vld [vmem:[%s9725_s11 + $0x3d0] sm:$0xff] }
 0xc0e   : > { %v7887_v63 = vpack.c.bf16 %v5276_v57, %v5275_v56  ;;  %v5315_v56 = vld [vmem:[%s9725_s11 + $0x3e0] sm:$0xff]  ;;  %v5316_v57 = vld [vmem:[%s9725_s11 + $0x3e8] sm:$0xff] }
 0xc10   : > { %7842 = vmatpush3.bf16.msra.mxu1 %v7841_v61  ;;  %7874 = vmatpush3.bf16.msra.mxu0 %v7873_v19  ;;  %v7917_v61 = vpack.c.bf16 %v5290_v55, %v5289_v33  ;;  %v5259_v19 = vld [vmem:[%s9725_s11 + $0x220] sm:$0xff]  ;;  %v5284_v55 = vld [vmem:[%s9725_s11 + $0x2e8] sm:$0xff] }
 0xc11   : > { %7844 = vmatprep.subr.bf16.mxu1 %v7843_v1  ;;  %7876 = vmatprep.subr.bf16.mxu0 %v7875_v5  ;;  %v5291_v1 = vld [vmem:[%s9725_s11 + $0x320] sm:$0xff]  ;;  %v4886_v5 = vsub.s32 7, %v9495_v15 }
 0xc12   : > { %v7921_v10 = vpack.c.bf16 %v5292_v2, %v5291_v1  ;;  %v5283_v33 = vld [vmem:[%s9725_s11 + $0x2e0] sm:$0xff]  ;;  %v5300_v2 = vld [vmem:[%s9725_s11 + $0x368] sm:$0xff] }
 0xc13   : > { %v4887_v20 = vrot.slane %v9502_v18, %v4886_v5  ;;  %v5299_v1 = vld [vmem:[%s9725_s11 + $0x360] sm:$0xff]  ;;  %v5318_v5 = vld [vmem:[%s9725_s11 + $0x3f8] sm:$0xff] }
 0xc14   : > { %7846 = vmatpush3.bf16.msra.mxu1 %v7845_v6  ;;  %7878 = vmatpush3.bf16.msra.mxu0 %v7877_v9  ;;  %v5278_v6 = vld [vmem:[%s9725_s11 + $0x2b8] sm:$0xff]  ;;  %v7889_v9 = vpack.c.bf16 %v5260_v62, %v5259_v19  ;;  %v5268_v19 = vld [vmem:[%s9725_s11 + $0x268] sm:$0xff]  ;;  %v4882_v62 = vsub.s32 6, %v9495_v15  ;;  %v7937_v8 = vpack.c.bf16 %v5300_v2, %v5299_v1 }
 0xc15   : > { %7880 = vmatprep.subr.bf16.mxu1 %v7879_v13  ;;  %7912 = vmatprep.subr.bf16.mxu0 %v7911_v14  ;;  %v7891_v13 = vpack.c.bf16 %v5278_v6, %v5277_v3  ;;  %v5293_v14 = vld [vmem:[%s9725_s11 + $0x330] sm:$0xff]  ;;  %v5286_v15 = vld [vmem:[%s9725_s11 + $0x2f8] sm:$0xff]  ;;  %v4875_v6 = vrot.slane %v9502_v18, %v4874_v58 }
 0xc16   : > { %v5285_v3 = vld [vmem:[%s9725_s11 + $0x2f0] sm:$0xff] }
 0xcba   : > { %v4965_v26 = vpop.f32.mrb[30].mxu1  ;;  %v5036_v29 = vpop.f32.mrb[56].mxu0 }
 0xcbb   : > { %v4966_v32 = vadd.f32 %v4965_v26, %v4859_v22  ;;  %v5037_v34 = vadd.f32 %v5036_v29, %v4867_v23  ;;  %v4967_v35 = vpop.f32.mrb[31].mxu1  ;;  %v5038_v36 = vpop.f32.mrb[57].mxu0  ;;  %v5311_v22 = vld [vmem:[%s9725_s11 + $0x3c0] sm:$0xff]  ;;  %v5312_v23 = vld [vmem:[%s9725_s11 + $0x3c8] sm:$0xff]  ;;  %v7893_v26 = vpack.c.bf16 %v5262_v12, %v5261_v11  ;;  %v7925_v29 = vpack.c.bf16 %v5294_v27, %v5293_v14  ;;  %v5302_v14 = vld [vmem:[%s9725_s11 + $0x378] sm:$0xff] }
 0xcbc   : > { %v4968_v46 = vadd.f32 %v4967_v35, %v4863_v24  ;;  %v5039_v41 = vadd.f32 %v5038_v36, %v4871_v25  ;;  %v7895_v35 = vpack.c.bf16 %v5280_v21, %v5279_v17  ;;  %v7927_v36 = vpack.c.bf16 %v5312_v23, %v5311_v22 }
 0xcbd   : > { %v5183_v52 = vmax.f32 %v4966_v32, 0.0  ;;  %v5185_v53 = vmax.f32 %v5037_v34, 0.0  ;;  %v7907_v11 = vpack.c.bf16 %v5286_v15, %v5285_v3  ;;  %v7939_v12 = vpack.c.bf16 %v5318_v5, %v5317_v4 }
 0xcbe   : > { %v5184_v45 = vmax.f32 %v4968_v46, 0.0  ;;  %v5186_v47 = vmax.f32 %v5039_v41, 0.0 }
 0xcc0   : > { %5384 = vmatprep.mubr.f32.mxu1 %v5184_v45  ;;  %5454 = vmatprep.mubr.f32.mxu0 %v5186_v47 }
 0xcc1   : > { %5385 = vmatmul.mubr.f32.vlgmr.msra.gmra.mrb[34].mxu1 %v5183_v52  ;;  %5455 = vmatmul.mubr.f32.vlgmr.msra.gmra.mrb[60].mxu0 %v5185_v53  ;;  %v7899_v52 = vpack.c.bf16 %v5282_v42, %v5281_v40  ;;  %v7931_v53 = vpack.c.bf16 %v5314_v44, %v5313_v43 }
 0xcc2   : > { %7882 = vmatpush3.bf16.msra.mxu1 %v7881_v48  ;;  %7914 = vmatpush3.bf16.msra.mxu0 %v7913_v49  ;;  %v7897_v48 = vpack.c.bf16 %v5264_v31, %v5263_v30  ;;  %v7929_v49 = vpack.c.bf16 %v5296_v39, %v5295_v37 }
 0xcc3   : > { %7884 = vmatprep.subr.bf16.mxu1 %v7883_v54  ;;  %7916 = vmatprep.subr.bf16.mxu0 %v7915_v28  ;;  %v5297_v54 = vld [vmem:[%s9725_s11 + $0x350] sm:$0xff]  ;;  %v5298_v28 = vld [vmem:[%s9725_s11 + $0x358] sm:$0xff] }
 0xcc6   : > { %7886 = vmatpush3.bf16.msra.mxu1 %v7885_v60  ;;  %7918 = vmatpush3.bf16.msra.mxu0 %v7917_v61  ;;  %v7933_v60 = vpack.c.bf16 %v5298_v28, %v5297_v54  ;;  %v5267_v61 = vld [vmem:[%s9725_s11 + $0x260] sm:$0xff] }
 0xcc7   : > { %7888 = vmatprep.subr.bf16.mxu1 %v7887_v63  ;;  %7920 = vmatprep.subr.bf16.mxu0 %v7919_v0  ;;  %v7903_v63 = vpack.c.bf16 %v5284_v55, %v5283_v33  ;;  %v7935_v0 = vpack.c.bf16 %v5316_v57, %v5315_v56  ;;  %v7905_v7 = vpack.c.bf16 %v5268_v19, %v5267_v61 }
 0xcca   : > { %v9610_v24 = vpop.f32.mrb[32].mxu1  ;;  %v9612_v25 = vpop.f32.mrb[58].mxu0  ;;  %7890 = vmatpush3.bf16.msra.mxu1 %v7889_v9  ;;  %7922 = vmatpush3.bf16.msra.mxu0 %v7921_v10  ;;  %v5269_v9 = vld [vmem:[%s9725_s11 + $0x270] sm:$0xff]  ;;  %v4883_v10 = vrot.slane %v9502_v18, %v4882_v62 }
 0xccb   : > { %v5109_v32 = vpop.f32.mrb[33].mxu1  ;;  %v5180_v34 = vpop.f32.mrb[59].mxu0  ;;  %7892 = vmatprep.subr.bf16.mxu1 %v7891_v13  ;;  %7924 = vmatprep.subr.bf16.mxu0 %v7923_v16  ;;  %v5270_v13 = vld [vmem:[%s9725_s11 + $0x278] sm:$0xff]  ;;  %v5301_v16 = vld [vmem:[%s9725_s11 + $0x370] sm:$0xff]  ;;  %v5108_v17 = vadd.f32 %v9610_v24, %v4875_v6 }
 0xccc   : > { %v5110_v46 = vadd.f32 %v5109_v32, %v4879_v38  ;;  %v5181_v41 = vadd.f32 %v5180_v34, %v4887_v20  ;;  %v7909_v27 = vpack.c.bf16 %v5270_v13, %v5269_v9  ;;  %v7941_v18 = vpack.c.bf16 %v5302_v14, %v5301_v16 }
 0xccd   : > { %v5179_v38 = vadd.f32 %v9612_v25, %v4883_v10  ;;  %v5187_v20 = vmax.f32 %v5108_v17, 0.0 }
 0xcce   : > { %v5188_v45 = vmax.f32 %v5110_v46, 0.0  ;;  %v5190_v47 = vmax.f32 %v5181_v41, 0.0  ;;  %7894 = vmatpush3.bf16.msra.mxu1 %v7893_v26  ;;  %7926 = vmatpush3.bf16.msra.mxu0 %v7925_v29  ;;  %v5319_v26 = vld [vmem:[%s9726_s12] sm:$0x1] }
 0xccf   : > { %7896 = vmatprep.subr.bf16.mxu1 %v7895_v35  ;;  %7928 = vmatprep.subr.bf16.mxu0 %v7927_v36  ;;  %v5189_v21 = vmax.f32 %v5179_v38, 0.0 }
 0xcd0   : > { %5524 = vmatprep.mubr.f32.mxu1 %v5188_v45  ;;  %5594 = vmatprep.mubr.f32.mxu0 %v5190_v47 }
 0xcd2   : > { %7898 = vmatpush3.bf16.msra.mxu1 %v7897_v48  ;;  %7930 = vmatpush3.bf16.msra.mxu0 %v7929_v49 }
 0xcd3   : > { %7900 = vmatprep.subr.bf16.mxu1 %v7899_v52  ;;  %7932 = vmatprep.subr.bf16.mxu0 %v7931_v53 }
 0xcd6   : > { %7902 = vmatpush3.bf16.msra.mxu1 %v7901_v59  ;;  %7934 = vmatpush3.bf16.msra.mxu0 %v7933_v60 }
 0xcd7   : > { %7904 = vmatprep.subr.bf16.mxu1 %v7903_v63  ;;  %7936 = vmatprep.subr.bf16.mxu0 %v7935_v0 }
 0xcda   : > { %7906 = vmatpush3.bf16.msra.mxu1 %v7905_v7  ;;  %7938 = vmatpush3.bf16.msra.mxu0 %v7937_v8 }
 0xcdb   : > { %7908 = vmatprep.subr.bf16.mxu1 %v7907_v11  ;;  %7940 = vmatprep.subr.bf16.mxu0 %v7939_v12 }
 0xcde   : > { %7910 = vmatpush3.bf16.msra.mxu1 %v7909_v27  ;;  %7942 = vmatpush3.bf16.msra.mxu0 %v7941_v18 }
 0xce1   : > { %5525 = vmatmul.mubr.f32.vlgmr.msra.gmra.mrb[36].mxu1 %v5187_v20  ;;  %5595 = vmatmul.mubr.f32.vlgmr.msra.gmra.mrb[62].mxu0 %v5189_v21 }
 0xd94   : > { %v6369_v22 = vpop.f32.mrb[34].mxu1  ;;  %v6404_v23 = vpop.f32.mrb[60].mxu0 }
 0xd95   : > { %v6370_v29 = vpop.f32.mrb[35].mxu1  ;;  %v6405_v30 = vpop.f32.mrb[61].mxu0 }
 0xd96   : > { %v6371_v24 = vadd.f32 %v6370_v29, %v6369_v22  ;;  %v6406_v31 = vadd.f32 %v6405_v30, %v6404_v23 }
 0xd98   : > { %v5387_v25 = vadd.f32 %v6371_v24, %v5319_v26 }
 0xd9a   : > { %v5457_v32 = vadd.f32 %v6406_v31, %v5387_v25 }
 0xdb4   : > { %v6439_v34 = vpop.f32.mrb[36].mxu1  ;;  %v6474_v35 = vpop.f32.mrb[62].mxu0 }
 0xdb5   : > { %v6440_v36 = vpop.f32.mrb[37].mxu1  ;;  %v6475_v37 = vpop.f32.mrb[63].mxu0 }
 0xdb6   : > { %v6441_v39 = vadd.f32 %v6440_v36, %v6439_v34  ;;  %v6476_v40 = vadd.f32 %v6475_v37, %v6474_v35 }
 0xdb8   : > { %v5527_v46 = vadd.f32 %v6441_v39, %v5457_v32 }
 0xdba   : > { %v5597_v41 = vadd.f32 %v6476_v40, %v5527_v46 }
 0xdbc   : > { %5600 = vst [vmem:[%s436_s20] sm:$0x1] %v5597_v41 }
 0xdbd PF: > { %s23_s25 = sadd.s32 1, %s7991_s25  }
 0xdbe   : > { %p20_p4 = scmp.ge.s32.totalorder %s23_s25, 4  }
 0xdc0   :  { %22 = sbr.rel (!%p20_p4) target bundleno = 1 (0x1), region = 148 }

</bundles_post_ra>
